<compile_context>
chip_gen: v6e
topology: v6e:2x2x1
jax: 0.10.0
libtpu: 0.0.40
codegen_flags: <defaults>
</compile_context>

<pallas_src>
import functools

import jax
import jax.numpy as jnp
from jax.experimental import pallas as pl
from jax.experimental.pallas import tpu as pltpu

EPS = 1e-5
LANES = 128
COMPUTE_DTYPE = jnp.bfloat16          # MXU input dtype (accumulation is always f32)
# 48 MiB: above the 16/32 MiB scoped defaults, inside v7x's 64 MiB physical VMEM.
VMEM_LIMIT = 48 * 1024 * 1024


# ---------------------------------------------------------------------------
# In-kernel conv body (shared by both conv kernels)
# ---------------------------------------------------------------------------
def _conv3x3_body(x_pad, w_ref, y_ref, st_ref, *, h, w):
    """3x3 'same' conv of one image + BN partial sums.

    x_pad : (H+2, W+2, C)   spatially padded activation (compute dtype, value)
    w_ref : (3, 3*C, CP)    weights with kh folded into K: w[kw, kh*C+ci, co]
    y_ref : (1, H*W, CP)    raw conv output (f32, pre-BN) -- accumulated in place
    st_ref: (1, 2, CP)      row0 = sum(y), row1 = sum(y*y)
    """
    c = x_pad.shape[-1]
    tm = h * w
    # Fold the kh taps into the contraction: (H, W+2, 3*C).
    xk = jnp.concatenate([x_pad[0:h], x_pad[1:h + 1], x_pad[2:h + 2]], axis=-1)
    y_ref[0] = jnp.dot(xk[:, 0:w, :].reshape(tm, 3 * c), w_ref[0],
                       preferred_element_type=jnp.float32)
    for kw in (1, 2):
        # TODO(synk): the kw=1,2 slices start at misaligned sublane offsets; a
        # pltpu.roll on the W axis would move this work to the XLU slot.
        y_ref[0] += jnp.dot(xk[:, kw:kw + w, :].reshape(tm, 3 * c), w_ref[kw],
                            preferred_element_type=jnp.float32)
    y = y_ref[0]
    st_ref[0] = jnp.concatenate([jnp.sum(y, axis=0, keepdims=True),
                                 jnp.sum(y * y, axis=0, keepdims=True)], axis=0)


# ---------------------------------------------------------------------------
# Kernels
# ---------------------------------------------------------------------------
def _conv1_kernel(xp_ref, w_ref, y_ref, st_ref, *, h, w):
    """xp_ref: (1, H+2, W+2, Cin) bf16 padded image (real Cin, no lane padding)."""
    _conv3x3_body(xp_ref[0], w_ref, y_ref, st_ref, h=h, w=w)


def _bn1_conv2_kernel(y1_ref, sc_ref, sh_ref, w_ref, y_ref, st_ref, a_ref, *, h, w):
    """BN1-apply + ReLU fused into conv2's input path.

    y1_ref : (1, H*W, CP) f32 raw conv1 output
    sc_ref, sh_ref : (1, CP) f32 BN1 scale/shift
    a_ref  : VMEM scratch (H+2, W+2, CP) compute-dtype (padded activated input)
    """
    cp = y_ref.shape[-1]
    a = jnp.maximum(y1_ref[0] * sc_ref[...] + sh_ref[...], 0.0)     # (H*W, CP) f32
    a_ref[...] = jnp.zeros_like(a_ref)            # zero halo ring (VMEM-only, cheap)
    a_ref[1:h + 1, 1:w + 1, :] = a.reshape(h, w, cp).astype(a_ref.dtype)
    _conv3x3_body(a_ref[...], w_ref, y_ref, st_ref, h=h, w=w)


def _bn2_add_relu_kernel(y_ref, sc_ref, sh_ref, r_ref, o_ref):
    """out = relu(y*scale + shift + residual); all lane-dense (CP) tiles."""
    v = y_ref[...] * sc_ref[...] + sh_ref[...] + r_ref[...]
    o_ref[...] = jnp.maximum(v, 0.0).astype(o_ref.dtype)


# ---------------------------------------------------------------------------
# pallas_call wrappers
# ---------------------------------------------------------------------------
def _conv1_call(xp, w1f, *, n, h, w, cp):
    cin = xp.shape[-1]
    m_img = h * w
    cost = pl.CostEstimate(
        flops=2 * n * m_img * 9 * cin * cp,
        transcendentals=0,
        bytes_accessed=(xp.size * xp.dtype.itemsize
                        + w1f.size * w1f.dtype.itemsize
                        + n * m_img * cp * 4 + n * 2 * cp * 4))
    return pl.pallas_call(
        functools.partial(_conv1_kernel, h=h, w=w),
        out_shape=(jax.ShapeDtypeStruct((n, m_img, cp), jnp.float32),
                   jax.ShapeDtypeStruct((n, 2, cp), jnp.float32)),
        grid=(n,),
        in_specs=[pl.BlockSpec((1, h + 2, w + 2, cin), lambda i: (i, 0, 0, 0)),
                  pl.BlockSpec((3, 3 * cin, cp), lambda i: (0, 0, 0))],
        out_specs=(pl.BlockSpec((1, m_img, cp), lambda i: (i, 0, 0)),
                   pl.BlockSpec((1, 2, cp), lambda i: (i, 0, 0))),
        compiler_params=pltpu.CompilerParams(
            dimension_semantics=("parallel",),
            vmem_limit_bytes=VMEM_LIMIT),
        cost_estimate=cost,
    )(xp, w1f)


def _bn1_conv2_call(y1, sc1, sh1, w2f, *, n, h, w, cp):
    m_img = h * w
    cost = pl.CostEstimate(
        flops=2 * n * m_img * 9 * cp * cp + 3 * n * m_img * cp,
        transcendentals=0,
        bytes_accessed=(y1.size * 4 + w2f.size * w2f.dtype.itemsize
                        + n * m_img * cp * 4 + n * 2 * cp * 4 + 4 * cp * 4))
    return pl.pallas_call(
        functools.partial(_bn1_conv2_kernel, h=h, w=w),
        out_shape=(jax.ShapeDtypeStruct((n, m_img, cp), jnp.float32),
                   jax.ShapeDtypeStruct((n, 2, cp), jnp.float32)),
        grid=(n,),
        in_specs=[pl.BlockSpec((1, m_img, cp), lambda i: (i, 0, 0)),
                  pl.BlockSpec((1, cp), lambda i: (0, 0)),
                  pl.BlockSpec((1, cp), lambda i: (0, 0)),
                  pl.BlockSpec((3, 3 * cp, cp), lambda i: (0, 0, 0))],
        out_specs=(pl.BlockSpec((1, m_img, cp), lambda i: (i, 0, 0)),
                   pl.BlockSpec((1, 2, cp), lambda i: (i, 0, 0))),
        scratch_shapes=[pltpu.VMEM((h + 2, w + 2, cp), COMPUTE_DTYPE)],
        compiler_params=pltpu.CompilerParams(
            dimension_semantics=("parallel",),
            vmem_limit_bytes=VMEM_LIMIT),
        cost_estimate=cost,
    )(y1, sc1, sh1, w2f)


def _bn2_apply_call(y2, sc2, sh2, x_res, *, n, h, w, cp):
    m_img = h * w
    tile = pl.BlockSpec((1, m_img, cp), lambda i: (i, 0, 0))
    vec = pl.BlockSpec((1, cp), lambda i: (0, 0))
    return pl.pallas_call(
        _bn2_add_relu_kernel,
        out_shape=jax.ShapeDtypeStruct((n, m_img, cp), jnp.float32),
        grid=(n,),
        in_specs=[tile, vec, vec, tile],
        out_specs=tile,
        compiler_params=pltpu.CompilerParams(
            dimension_semantics=("parallel",),
            vmem_limit_bytes=VMEM_LIMIT),
    )(y2, sc2, sh2, x_res)


# ---------------------------------------------------------------------------
# JAX glue
# ---------------------------------------------------------------------------
def _bn_scale_shift(stats, count, gamma_p, beta_p):
    """Finalize exact batch stats (training-mode BN, biased variance)."""
    total = jnp.sum(stats[:, 0, :], axis=0)
    total_sq = jnp.sum(stats[:, 1, :], axis=0)
    mean = total / count
    var = total_sq / count - mean * mean
    inv_std = jax.lax.rsqrt(var + EPS)
    scale = gamma_p[0] * inv_std
    shift = beta_p[0] - mean * scale
    return scale.reshape(1, -1), shift.reshape(1, -1)


def _pack_conv_weight(w_oihw, cin_pad, cp, dtype):
    """(Cout,Cin,3,3) -> (3, 3*cin_pad, CP) with packed[kw, kh*cin_pad+ci, co]."""
    cout, cin = w_oihw.shape[0], w_oihw.shape[1]
    wt = jnp.transpose(w_oihw, (3, 2, 1, 0))                    # (kw, kh, ci, co)
    wt = jnp.pad(wt, ((0, 0), (0, 0), (0, cin_pad - cin), (0, cp - cout)))
    return wt.reshape(3, 3 * cin_pad, cp).astype(dtype)


def _pack_channel_vec(v, cp):
    return jnp.pad(v.astype(jnp.float32), (0, cp - v.shape[0])).reshape(1, cp)


# ---------------------------------------------------------------------------
# ResNet18 basic block forward (Pallas)
# ---------------------------------------------------------------------------
def resnet18_basic_block(x_nchw, params, *, compute_dtype=COMPUTE_DTYPE):
    """Forward of ResNet18BasicBlock (identity shortcut => stride=1, Cin==Cout)."""
    n, cin, h, w = x_nchw.shape
    cout = params["w1"].shape[0]
    if cin != cout:
        raise ValueError("identity shortcut requires in_channels == out_channels")
    cp = ((cout + LANES - 1) // LANES) * LANES
    m = n * h * w
    count = jnp.float32(m)

    # NCHW -> NHWC. The residual stays f32 (padded to CP so the final store is
    # lane-dense); conv1's input is a single bf16 copy at the REAL channel count,
    # spatially padded by 1 (the only halo copy in HBM).
    # TODO(synk): accept/emit NHWC directly to drop the two boundary transposes.
    x_nhwc = jnp.transpose(x_nchw, (0, 2, 3, 1)).astype(jnp.float32)
    x_res = jnp.pad(x_nhwc, ((0, 0), (0, 0), (0, 0), (0, cp - cin))).reshape(n, h * w, cp)
    xp = jnp.pad(x_nhwc.astype(compute_dtype), ((0, 0), (1, 1), (1, 1), (0, 0)))

    # Conv biases are dropped in the kernels: bias followed by training-mode BN
    # cancels exactly (shift = beta - mean*scale absorbs it).
    w1f = _pack_conv_weight(params["w1"], cin, cp, compute_dtype)
    w2f = _pack_conv_weight(params["w2"], cp, cp, compute_dtype)
    g1 = _pack_channel_vec(params["g1"], cp)
    g2 = _pack_channel_vec(params["g2"], cp)
    be1 = _pack_channel_vec(params["be1"], cp)
    be2 = _pack_channel_vec(params["be2"], cp)

    # --- conv1 -> (batch stats) ---------------------------------------------
    y1, st1 = _conv1_call(xp, w1f, n=n, h=h, w=w, cp=cp)
    sc1, sh1 = _bn_scale_shift(st1, count, g1, be1)

    # --- bn1+relu fused into conv2 -> (batch stats) ---------------------------
    y2, st2 = _bn1_conv2_call(y1, sc1, sh1, w2f, n=n, h=h, w=w, cp=cp)
    sc2, sh2 = _bn_scale_shift(st2, count, g2, be2)

    # --- bn2 apply + residual + relu ------------------------------------------
    out = _bn2_apply_call(y2, sc2, sh2, x_res, n=n, h=h, w=w, cp=cp)

    out = out.reshape(n, h, w, cp)[..., :cout]
    return jnp.transpose(out, (0, 3, 1, 2))                     # NHWC -> NCHW


# ---------------------------------------------------------------------------
# Pure-JAX reference (mirrors the kernel's bf16-GEMM / f32-BN numerics,
# including the conv biases that BN cancels)
# ---------------------------------------------------------------------------
def reference(x_nchw, params, *, compute_dtype=COMPUTE_DTYPE):
    x = jnp.transpose(x_nchw, (0, 2, 3, 1)).astype(jnp.float32)

    def conv(inp, w_oihw, b):
        w_hwio = jnp.transpose(w_oihw, (2, 3, 1, 0)).astype(compute_dtype)
        y = jax.lax.conv_general_dilated(
            inp.astype(compute_dtype), w_hwio, window_strides=(1, 1),
            padding=((1, 1), (1, 1)),
            dimension_numbers=("NHWC", "HWIO", "NHWC"),
            preferred_element_type=jnp.float32)
        return y + b.reshape(1, 1, 1, -1).astype(jnp.float32)

    def bn(y, g, be):
        mu = jnp.mean(y, axis=(0, 1, 2), keepdims=True)
        var = jnp.mean((y - mu) ** 2, axis=(0, 1, 2), keepdims=True)
        return ((y - mu) * jax.lax.rsqrt(var + EPS) * g.reshape(1, 1, 1, -1)
                + be.reshape(1, 1, 1, -1))

    a1 = jax.nn.relu(bn(conv(x, params["w1"], params["b1"]),
                        params["g1"], params["be1"]))
    y2 = bn(conv(a1, params["w2"], params["b2"]), params["g2"], params["be2"])
    out = jax.nn.relu(x + y2)
    return jnp.transpose(out, (0, 3, 1, 2))


# ---------------------------------------------------------------------------
if __name__ == "__main__":
    N, C, H, W = 2, 4, 16, 16

    key = jax.random.PRNGKey(0)
    ks = jax.random.split(key, 9)
    params = {
        "w1": 0.1 * jax.random.normal(ks[0], (C, C, 3, 3), jnp.float32),
        "b1": 0.01 * jax.random.normal(ks[1], (C,), jnp.float32),
        "g1": 1.0 + 0.1 * jax.random.normal(ks[2], (C,), jnp.float32),
        "be1": 0.05 * jax.random.normal(ks[3], (C,), jnp.float32),
        "w2": 0.1 * jax.random.normal(ks[4], (C, C, 3, 3), jnp.float32),
        "b2": 0.01 * jax.random.normal(ks[5], (C,), jnp.float32),
        "g2": 1.0 + 0.1 * jax.random.normal(ks[6], (C,), jnp.float32),
        "be2": 0.05 * jax.random.normal(ks[7], (C,), jnp.float32),
    }
    x = jax.random.normal(ks[8], (N, C, H, W), jnp.float32)

    out = jax.block_until_ready(jax.jit(resnet18_basic_block)(x, params))
    ref = jax.block_until_ready(reference(x, params))

    assert out.shape == (N, C, H, W), out.shape
    err = float(jnp.max(jnp.abs(out - ref)))
    assert err < 5e-3, f"max abs err {err}"
    print("KERNEL_OK")
</pallas_src>

<mosaic_0001>
module attributes {stable_mosaic.version = 11 : i64} {
  func.func @_conv1_kernel(%arg0: i32, %arg1: memref<1x18x18x4xbf16, #tpu.memory_space<vmem>>, %arg2: memref<3x12x128xbf16, #tpu.memory_space<vmem>>, %arg3: memref<1x256x128xf32, #tpu.memory_space<vmem>>, %arg4: memref<1x2x128xf32, #tpu.memory_space<vmem>>) attributes {dimension_semantics = [#tpu.dimension_semantics<parallel>], iteration_bounds = array<i64: 2>, scalar_prefetch = 0 : i64, scratch_operands = 0 : i64, tpu.core_type = #tpu.core_type<tc>, window_params = [{transform_indices = @transform_0, window_bounds = array<i64: 1, 18, 18, 4>}, {pipeline_mode = #tpu.pipeline_mode<synchronous>, transform_indices = @transform_1, window_bounds = array<i64: 3, 12, 128>}, {transform_indices = @transform_2, window_bounds = array<i64: 1, 256, 128>}, {transform_indices = @transform_3, window_bounds = array<i64: 1, 2, 128>}]} {
    %c0 = arith.constant 0 : index
    %c0_0 = arith.constant 0 : index
    %c0_1 = arith.constant 0 : index
    %c0_2 = arith.constant 0 : index
    %0 = vector.load %arg1[%c0, %c0_0, %c0_1, %c0_2] : memref<1x18x18x4xbf16, #tpu.memory_space<vmem>>, vector<1x18x18x4xbf16>
    %1 = vector.shape_cast %0 : vector<1x18x18x4xbf16> to vector<18x18x4xbf16>
    %2 = vector.extract_strided_slice %1 {offsets = [0, 0, 0], sizes = [16, 18, 4], strides = [1, 1, 1]} : vector<18x18x4xbf16> to vector<16x18x4xbf16>
    %3 = vector.extract_strided_slice %1 {offsets = [1, 0, 0], sizes = [16, 18, 4], strides = [1, 1, 1]} : vector<18x18x4xbf16> to vector<16x18x4xbf16>
    %4 = vector.extract_strided_slice %1 {offsets = [2, 0, 0], sizes = [16, 18, 4], strides = [1, 1, 1]} : vector<18x18x4xbf16> to vector<16x18x4xbf16>
    %5 = tpu.concatenate %2, %3, %4 in 2 : vector<16x18x4xbf16>, vector<16x18x4xbf16>, vector<16x18x4xbf16> -> vector<16x18x12xbf16>
    %6 = vector.extract_strided_slice %5 {offsets = [0, 0, 0], sizes = [16, 16, 12], strides = [1, 1, 1]} : vector<16x18x12xbf16> to vector<16x16x12xbf16>
    %7 = vector.shape_cast %6 : vector<16x16x12xbf16> to vector<256x12xbf16>
    %c0_3 = arith.constant 0 : index
    %c0_4 = arith.constant 0 : index
    %c0_5 = arith.constant 0 : index
    %8 = vector.load %arg2[%c0_3, %c0_4, %c0_5] : memref<3x12x128xbf16, #tpu.memory_space<vmem>>, vector<1x12x128xbf16>
    %9 = vector.shape_cast %8 : vector<1x12x128xbf16> to vector<12x128xbf16>
    %cst = arith.constant dense<0.000000e+00> : vector<256x128xf32>
    %10 = tpu.matmul %7, %9, %cst {dimension_numbers = #tpu.dot_dimension_numbers<[1], [0], [0], [1], [0, 0, 1, 1], [], []>} : vector<256x12xbf16>, vector<12x128xbf16>, vector<256x128xf32> -> vector<256x128xf32>
    %c0_6 = arith.constant 0 : index
    %c0_7 = arith.constant 0 : index
    %c0_8 = arith.constant 0 : index
    %11 = vector.load %arg3[%c0_6, %c0_7, %c0_8] : memref<1x256x128xf32, #tpu.memory_space<vmem>>, vector<1x256x128xf32>
    %12 = vector.shape_cast %11 : vector<1x256x128xf32> to vector<256x128xf32>
    %13 = vector.shape_cast %10 : vector<256x128xf32> to vector<1x256x128xf32>
    tpu.vector_store %arg3[%c0_6, %c0_7, %c0_8], %13 {strides = array<i32>} : memref<1x256x128xf32, #tpu.memory_space<vmem>>, vector<1x256x128xf32>,
    %c0_9 = arith.constant 0 : index
    %c0_10 = arith.constant 0 : index
    %c0_11 = arith.constant 0 : index
    %14 = vector.load %arg3[%c0_9, %c0_10, %c0_11] : memref<1x256x128xf32, #tpu.memory_space<vmem>>, vector<1x256x128xf32>
    %15 = vector.shape_cast %14 : vector<1x256x128xf32> to vector<256x128xf32>
    %16 = vector.extract_strided_slice %5 {offsets = [0, 1, 0], sizes = [16, 16, 12], strides = [1, 1, 1]} : vector<16x18x12xbf16> to vector<16x16x12xbf16>
    %17 = vector.shape_cast %16 : vector<16x16x12xbf16> to vector<256x12xbf16>
    %c1 = arith.constant 1 : index
    %c0_12 = arith.constant 0 : index
    %c0_13 = arith.constant 0 : index
    %18 = vector.load %arg2[%c1, %c0_12, %c0_13] : memref<3x12x128xbf16, #tpu.memory_space<vmem>>, vector<1x12x128xbf16>
    %19 = vector.shape_cast %18 : vector<1x12x128xbf16> to vector<12x128xbf16>
    %cst_14 = arith.constant dense<0.000000e+00> : vector<256x128xf32>
    %20 = tpu.matmul %17, %19, %cst_14 {dimension_numbers = #tpu.dot_dimension_numbers<[1], [0], [0], [1], [0, 0, 1, 1], [], []>} : vector<256x12xbf16>, vector<12x128xbf16>, vector<256x128xf32> -> vector<256x128xf32>
    %21 = arith.addf %15, %20 : vector<256x128xf32>
    %c0_15 = arith.constant 0 : index
    %c0_16 = arith.constant 0 : index
    %c0_17 = arith.constant 0 : index
    %22 = vector.load %arg3[%c0_15, %c0_16, %c0_17] : memref<1x256x128xf32, #tpu.memory_space<vmem>>, vector<1x256x128xf32>
    %23 = vector.shape_cast %22 : vector<1x256x128xf32> to vector<256x128xf32>
    %24 = vector.shape_cast %21 : vector<256x128xf32> to vector<1x256x128xf32>
    tpu.vector_store %arg3[%c0_15, %c0_16, %c0_17], %24 {strides = array<i32>} : memref<1x256x128xf32, #tpu.memory_space<vmem>>, vector<1x256x128xf32>,
    %c0_18 = arith.constant 0 : index
    %c0_19 = arith.constant 0 : index
    %c0_20 = arith.constant 0 : index
    %25 = vector.load %arg3[%c0_18, %c0_19, %c0_20] : memref<1x256x128xf32, #tpu.memory_space<vmem>>, vector<1x256x128xf32>
    %26 = vector.shape_cast %25 : vector<1x256x128xf32> to vector<256x128xf32>
    %27 = vector.extract_strided_slice %5 {offsets = [0, 2, 0], sizes = [16, 16, 12], strides = [1, 1, 1]} : vector<16x18x12xbf16> to vector<16x16x12xbf16>
    %28 = vector.shape_cast %27 : vector<16x16x12xbf16> to vector<256x12xbf16>
    %c2 = arith.constant 2 : index
    %c0_21 = arith.constant 0 : index
    %c0_22 = arith.constant 0 : index
    %29 = vector.load %arg2[%c2, %c0_21, %c0_22] : memref<3x12x128xbf16, #tpu.memory_space<vmem>>, vector<1x12x128xbf16>
    %30 = vector.shape_cast %29 : vector<1x12x128xbf16> to vector<12x128xbf16>
    %cst_23 = arith.constant dense<0.000000e+00> : vector<256x128xf32>
    %31 = tpu.matmul %28, %30, %cst_23 {dimension_numbers = #tpu.dot_dimension_numbers<[1], [0], [0], [1], [0, 0, 1, 1], [], []>} : vector<256x12xbf16>, vector<12x128xbf16>, vector<256x128xf32> -> vector<256x128xf32>
    %32 = arith.addf %26, %31 : vector<256x128xf32>
    %c0_24 = arith.constant 0 : index
    %c0_25 = arith.constant 0 : index
    %c0_26 = arith.constant 0 : index
    %33 = vector.load %arg3[%c0_24, %c0_25, %c0_26] : memref<1x256x128xf32, #tpu.memory_space<vmem>>, vector<1x256x128xf32>
    %34 = vector.shape_cast %33 : vector<1x256x128xf32> to vector<256x128xf32>
    %35 = vector.shape_cast %32 : vector<256x128xf32> to vector<1x256x128xf32>
    tpu.vector_store %arg3[%c0_24, %c0_25, %c0_26], %35 {strides = array<i32>} : memref<1x256x128xf32, #tpu.memory_space<vmem>>, vector<1x256x128xf32>,
    %c0_27 = arith.constant 0 : index
    %c0_28 = arith.constant 0 : index
    %c0_29 = arith.constant 0 : index
    %36 = vector.load %arg3[%c0_27, %c0_28, %c0_29] : memref<1x256x128xf32, #tpu.memory_space<vmem>>, vector<1x256x128xf32>
    %37 = vector.shape_cast %36 : vector<1x256x128xf32> to vector<256x128xf32>
    %cst_30 = arith.constant dense<0.000000e+00> : vector<128xf32>
    %38 = vector.multi_reduction <add>, %37, %cst_30 [0] : vector<256x128xf32> to vector<128xf32>
    %39 = vector.shape_cast %38 : vector<128xf32> to vector<1x128xf32>
    %40 = arith.mulf %37, %37 : vector<256x128xf32>
    %cst_31 = arith.constant dense<0.000000e+00> : vector<128xf32>
    %41 = vector.multi_reduction <add>, %40, %cst_31 [0] : vector<256x128xf32> to vector<128xf32>
    %42 = vector.shape_cast %41 : vector<128xf32> to vector<1x128xf32>
    %43 = tpu.concatenate %39, %42 in 0 : vector<1x128xf32>, vector<1x128xf32> -> vector<2x128xf32>
    %c0_32 = arith.constant 0 : index
    %c0_33 = arith.constant 0 : index
    %c0_34 = arith.constant 0 : index
    %44 = vector.load %arg4[%c0_32, %c0_33, %c0_34] : memref<1x2x128xf32, #tpu.memory_space<vmem>>, vector<1x2x128xf32>
    %45 = vector.shape_cast %44 : vector<1x2x128xf32> to vector<2x128xf32>
    %46 = vector.shape_cast %43 : vector<2x128xf32> to vector<1x2x128xf32>
    tpu.vector_store %arg4[%c0_32, %c0_33, %c0_34], %46 {strides = array<i32>} : memref<1x2x128xf32, #tpu.memory_space<vmem>>, vector<1x2x128xf32>,
    return
  }
  func.func @transform_0(%arg0: i32) -> (i32, i32, i32, i32) {
    %c0_i32 = arith.constant 0 : i32
    %c0_i32_0 = arith.constant 0 : i32
    %c0_i32_1 = arith.constant 0 : i32
    %c0_i32_2 = arith.constant 0 : i32
    return %arg0, %c0_i32, %c0_i32_0, %c0_i32_1 : i32, i32, i32, i32
  }
  func.func @transform_1(%arg0: i32) -> (i32, i32, i32) {
    %c0_i32 = arith.constant 0 : i32
    %c0_i32_0 = arith.constant 0 : i32
    %c0_i32_1 = arith.constant 0 : i32
    %c0_i32_2 = arith.constant 0 : i32
    return %c0_i32, %c0_i32_0, %c0_i32_1 : i32, i32, i32
  }
  func.func @transform_2(%arg0: i32) -> (i32, i32, i32) {
    %c0_i32 = arith.constant 0 : i32
    %c0_i32_0 = arith.constant 0 : i32
    %c0_i32_1 = arith.constant 0 : i32
    return %arg0, %c0_i32, %c0_i32_0 : i32, i32, i32
  }
  func.func @transform_3(%arg0: i32) -> (i32, i32, i32) {
    %c0_i32 = arith.constant 0 : i32
    %c0_i32_0 = arith.constant 0 : i32
    %c0_i32_1 = arith.constant 0 : i32
    return %arg0, %c0_i32, %c0_i32_0 : i32, i32, i32
  }
}

module attributes {stable_mosaic.version = 11 : i64} {
  func.func @_bn2_add_relu_kernel(%arg0: i32, %arg1: memref<1x256x128xf32, #tpu.memory_space<vmem>>, %arg2: memref<1x128xf32, #tpu.memory_space<vmem>>, %arg3: memref<1x128xf32, #tpu.memory_space<vmem>>, %arg4: memref<1x256x128xf32, #tpu.memory_space<vmem>>, %arg5: memref<1x256x128xf32, #tpu.memory_space<vmem>>) attributes {dimension_semantics = [#tpu.dimension_semantics<parallel>], iteration_bounds = array<i64: 2>, scalar_prefetch = 0 : i64, scratch_operands = 0 : i64, tpu.core_type = #tpu.core_type<tc>, window_params = [{transform_indices = @transform_0, window_bounds = array<i64: 1, 256, 128>}, {pipeline_mode = #tpu.pipeline_mode<synchronous>, transform_indices = @transform_1, window_bounds = array<i64: 1, 128>}, {pipeline_mode = #tpu.pipeline_mode<synchronous>, transform_indices = @transform_2, window_bounds = array<i64: 1, 128>}, {transform_indices = @transform_3, window_bounds = array<i64: 1, 256, 128>}, {transform_indices = @transform_4, window_bounds = array<i64: 1, 256, 128>}]} {
    %c0 = arith.constant 0 : index
    %c0_0 = arith.constant 0 : index
    %c0_1 = arith.constant 0 : index
    %0 = vector.load %arg1[%c0, %c0_0, %c0_1] : memref<1x256x128xf32, #tpu.memory_space<vmem>>, vector<1x256x128xf32>
    %c0_2 = arith.constant 0 : index
    %c0_3 = arith.constant 0 : index
    %1 = vector.load %arg2[%c0_2, %c0_3] : memref<1x128xf32, #tpu.memory_space<vmem>>, vector<1x128xf32>
    %2 = vector.shape_cast %1 : vector<1x128xf32> to vector<1x1x128xf32>
    %3 = vector.broadcast %2 : vector<1x1x128xf32> to vector<1x256x128xf32>
    %4 = arith.mulf %0, %3 : vector<1x256x128xf32>
    %c0_4 = arith.constant 0 : index
    %c0_5 = arith.constant 0 : index
    %5 = vector.load %arg3[%c0_4, %c0_5] : memref<1x128xf32, #tpu.memory_space<vmem>>, vector<1x128xf32>
    %6 = vector.shape_cast %5 : vector<1x128xf32> to vector<1x1x128xf32>
    %7 = vector.broadcast %6 : vector<1x1x128xf32> to vector<1x256x128xf32>
    %8 = arith.addf %4, %7 : vector<1x256x128xf32>
    %c0_6 = arith.constant 0 : index
    %c0_7 = arith.constant 0 : index
    %c0_8 = arith.constant 0 : index
    %9 = vector.load %arg4[%c0_6, %c0_7, %c0_8] : memref<1x256x128xf32, #tpu.memory_space<vmem>>, vector<1x256x128xf32>
    %10 = arith.addf %8, %9 : vector<1x256x128xf32>
    %cst = arith.constant 0.000000e+00 : f32
    %11 = vector.broadcast %cst : f32 to vector<1x256x128xf32>
    %12 = arith.maximumf %10, %11 : vector<1x256x128xf32>
    %c0_9 = arith.constant 0 : index
    %c0_10 = arith.constant 0 : index
    %c0_11 = arith.constant 0 : index
    %13 = vector.load %arg5[%c0_9, %c0_10, %c0_11] : memref<1x256x128xf32, #tpu.memory_space<vmem>>, vector<1x256x128xf32>
    tpu.vector_store %arg5[%c0_9, %c0_10, %c0_11], %12 {strides = array<i32>} : memref<1x256x128xf32, #tpu.memory_space<vmem>>, vector<1x256x128xf32>,
    return
  }
  func.func @transform_0(%arg0: i32) -> (i32, i32, i32) {
    %c0_i32 = arith.constant 0 : i32
    %c0_i32_0 = arith.constant 0 : i32
    %c0_i32_1 = arith.constant 0 : i32
    return %arg0, %c0_i32, %c0_i32_0 : i32, i32, i32
  }
  func.func @transform_1(%arg0: i32) -> (i32, i32) {
    %c0_i32 = arith.constant 0 : i32
    %c0_i32_0 = arith.constant 0 : i32
    %c0_i32_1 = arith.constant 0 : i32
    return %c0_i32, %c0_i32_0 : i32, i32
  }
  func.func @transform_2(%arg0: i32) -> (i32, i32) {
    %c0_i32 = arith.constant 0 : i32
    %c0_i32_0 = arith.constant 0 : i32
    %c0_i32_1 = arith.constant 0 : i32
    return %c0_i32, %c0_i32_0 : i32, i32
  }
  func.func @transform_3(%arg0: i32) -> (i32, i32, i32) {
    %c0_i32 = arith.constant 0 : i32
    %c0_i32_0 = arith.constant 0 : i32
    %c0_i32_1 = arith.constant 0 : i32
    return %arg0, %c0_i32, %c0_i32_0 : i32, i32, i32
  }
  func.func @transform_4(%arg0: i32) -> (i32, i32, i32) {
    %c0_i32 = arith.constant 0 : i32
    %c0_i32_0 = arith.constant 0 : i32
    %c0_i32_1 = arith.constant 0 : i32
    return %arg0, %c0_i32, %c0_i32_0 : i32, i32, i32
  }
}

module attributes {stable_mosaic.version = 11 : i64} {
  func.func @_bn1_conv2_kernel(%arg0: i32, %arg1: memref<1x256x128xf32, #tpu.memory_space<vmem>>, %arg2: memref<1x128xf32, #tpu.memory_space<vmem>>, %arg3: memref<1x128xf32, #tpu.memory_space<vmem>>, %arg4: memref<3x384x128xbf16, #tpu.memory_space<vmem>>, %arg5: memref<1x256x128xf32, #tpu.memory_space<vmem>>, %arg6: memref<1x2x128xf32, #tpu.memory_space<vmem>>, %arg7: memref<18x18x128xbf16, #tpu.memory_space<vmem>>) attributes {dimension_semantics = [#tpu.dimension_semantics<parallel>], iteration_bounds = array<i64: 2>, scalar_prefetch = 0 : i64, scratch_operands = 1 : i64, tpu.core_type = #tpu.core_type<tc>, window_params = [{transform_indices = @transform_0, window_bounds = array<i64: 1, 256, 128>}, {pipeline_mode = #tpu.pipeline_mode<synchronous>, transform_indices = @transform_1, window_bounds = array<i64: 1, 128>}, {pipeline_mode = #tpu.pipeline_mode<synchronous>, transform_indices = @transform_2, window_bounds = array<i64: 1, 128>}, {pipeline_mode = #tpu.pipeline_mode<synchronous>, transform_indices = @transform_3, window_bounds = array<i64: 3, 384, 128>}, {transform_indices = @transform_4, window_bounds = array<i64: 1, 256, 128>}, {transform_indices = @transform_5, window_bounds = array<i64: 1, 2, 128>}]} {
    %c0 = arith.constant 0 : index
    %c0_0 = arith.constant 0 : index
    %c0_1 = arith.constant 0 : index
    %0 = vector.load %arg1[%c0, %c0_0, %c0_1] : memref<1x256x128xf32, #tpu.memory_space<vmem>>, vector<1x256x128xf32>
    %1 = vector.shape_cast %0 : vector<1x256x128xf32> to vector<256x128xf32>
    %c0_2 = arith.constant 0 : index
    %c0_3 = arith.constant 0 : index
    %2 = vector.load %arg2[%c0_2, %c0_3] : memref<1x128xf32, #tpu.memory_space<vmem>>, vector<1x128xf32>
    %3 = vector.broadcast %2 : vector<1x128xf32> to vector<256x128xf32>
    %4 = arith.mulf %1, %3 : vector<256x128xf32>
    %c0_4 = arith.constant 0 : index
    %c0_5 = arith.constant 0 : index
    %5 = vector.load %arg3[%c0_4, %c0_5] : memref<1x128xf32, #tpu.memory_space<vmem>>, vector<1x128xf32>
    %6 = vector.broadcast %5 : vector<1x128xf32> to vector<256x128xf32>
    %7 = arith.addf %4, %6 : vector<256x128xf32>
    %cst = arith.constant 0.000000e+00 : f32
    %8 = vector.broadcast %cst : f32 to vector<256x128xf32>
    %9 = arith.maximumf %7, %8 : vector<256x128xf32>
    %cst_6 = arith.constant 0.000000e+00 : bf16
    %10 = vector.broadcast %cst_6 : bf16 to vector<18x18x128xbf16>
    %c0_7 = arith.constant 0 : index
    %c0_8 = arith.constant 0 : index
    %c0_9 = arith.constant 0 : index
    %11 = vector.load %arg7[%c0_7, %c0_8, %c0_9] : memref<18x18x128xbf16, #tpu.memory_space<vmem>>, vector<18x18x128xbf16>
    tpu.vector_store %arg7[%c0_7, %c0_8, %c0_9], %10 {strides = array<i32>} : memref<18x18x128xbf16, #tpu.memory_space<vmem>>, vector<18x18x128xbf16>,
    %12 = vector.shape_cast %9 : vector<256x128xf32> to vector<16x16x128xf32>
    %13 = arith.truncf %12 : vector<16x16x128xf32> to vector<16x16x128xbf16>
    %c1 = arith.constant 1 : index
    %c1_10 = arith.constant 1 : index
    %c0_11 = arith.constant 0 : index
    %14 = vector.load %arg7[%c1, %c1_10, %c0_11] : memref<18x18x128xbf16, #tpu.memory_space<vmem>>, vector<16x16x128xbf16>
    tpu.vector_store %arg7[%c1, %c1_10, %c0_11], %13 {strides = array<i32>} : memref<18x18x128xbf16, #tpu.memory_space<vmem>>, vector<16x16x128xbf16>,
    %c0_12 = arith.constant 0 : index
    %c0_13 = arith.constant 0 : index
    %c0_14 = arith.constant 0 : index
    %15 = vector.load %arg7[%c0_12, %c0_13, %c0_14] : memref<18x18x128xbf16, #tpu.memory_space<vmem>>, vector<18x18x128xbf16>
    %16 = vector.extract_strided_slice %15 {offsets = [0, 0, 0], sizes = [16, 18, 128], strides = [1, 1, 1]} : vector<18x18x128xbf16> to vector<16x18x128xbf16>
    %17 = vector.extract_strided_slice %15 {offsets = [1, 0, 0], sizes = [16, 18, 128], strides = [1, 1, 1]} : vector<18x18x128xbf16> to vector<16x18x128xbf16>
    %18 = vector.extract_strided_slice %15 {offsets = [2, 0, 0], sizes = [16, 18, 128], strides = [1, 1, 1]} : vector<18x18x128xbf16> to vector<16x18x128xbf16>
    %19 = tpu.concatenate %16, %17, %18 in 2 : vector<16x18x128xbf16>, vector<16x18x128xbf16>, vector<16x18x128xbf16> -> vector<16x18x384xbf16>
    %20 = vector.extract_strided_slice %19 {offsets = [0, 0, 0], sizes = [16, 16, 384], strides = [1, 1, 1]} : vector<16x18x384xbf16> to vector<16x16x384xbf16>
    %21 = vector.shape_cast %20 : vector<16x16x384xbf16> to vector<256x384xbf16>
    %c0_15 = arith.constant 0 : index
    %c0_16 = arith.constant 0 : index
    %c0_17 = arith.constant 0 : index
    %22 = vector.load %arg4[%c0_15, %c0_16, %c0_17] : memref<3x384x128xbf16, #tpu.memory_space<vmem>>, vector<1x384x128xbf16>
    %23 = vector.shape_cast %22 : vector<1x384x128xbf16> to vector<384x128xbf16>
    %cst_18 = arith.constant dense<0.000000e+00> : vector<256x128xf32>
    %24 = tpu.matmul %21, %23, %cst_18 {dimension_numbers = #tpu.dot_dimension_numbers<[1], [0], [0], [1], [0, 0, 1, 1], [], []>} : vector<256x384xbf16>, vector<384x128xbf16>, vector<256x128xf32> -> vector<256x128xf32>
    %c0_19 = arith.constant 0 : index
    %c0_20 = arith.constant 0 : index
    %c0_21 = arith.constant 0 : index
    %25 = vector.load %arg5[%c0_19, %c0_20, %c0_21] : memref<1x256x128xf32, #tpu.memory_space<vmem>>, vector<1x256x128xf32>
    %26 = vector.shape_cast %25 : vector<1x256x128xf32> to vector<256x128xf32>
    %27 = vector.shape_cast %24 : vector<256x128xf32> to vector<1x256x128xf32>
    tpu.vector_store %arg5[%c0_19, %c0_20, %c0_21], %27 {strides = array<i32>} : memref<1x256x128xf32, #tpu.memory_space<vmem>>, vector<1x256x128xf32>,
    %c0_22 = arith.constant 0 : index
    %c0_23 = arith.constant 0 : index
    %c0_24 = arith.constant 0 : index
    %28 = vector.load %arg5[%c0_22, %c0_23, %c0_24] : memref<1x256x128xf32, #tpu.memory_space<vmem>>, vector<1x256x128xf32>
    %29 = vector.shape_cast %28 : vector<1x256x128xf32> to vector<256x128xf32>
    %30 = vector.extract_strided_slice %19 {offsets = [0, 1, 0], sizes = [16, 16, 384], strides = [1, 1, 1]} : vector<16x18x384xbf16> to vector<16x16x384xbf16>
    %31 = vector.shape_cast %30 : vector<16x16x384xbf16> to vector<256x384xbf16>
    %c1_25 = arith.constant 1 : index
    %c0_26 = arith.constant 0 : index
    %c0_27 = arith.constant 0 : index
    %32 = vector.load %arg4[%c1_25, %c0_26, %c0_27] : memref<3x384x128xbf16, #tpu.memory_space<vmem>>, vector<1x384x128xbf16>
    %33 = vector.shape_cast %32 : vector<1x384x128xbf16> to vector<384x128xbf16>
    %cst_28 = arith.constant dense<0.000000e+00> : vector<256x128xf32>
    %34 = tpu.matmul %31, %33, %cst_28 {dimension_numbers = #tpu.dot_dimension_numbers<[1], [0], [0], [1], [0, 0, 1, 1], [], []>} : vector<256x384xbf16>, vector<384x128xbf16>, vector<256x128xf32> -> vector<256x128xf32>
    %35 = arith.addf %29, %34 : vector<256x128xf32>
    %c0_29 = arith.constant 0 : index
    %c0_30 = arith.constant 0 : index
    %c0_31 = arith.constant 0 : index
    %36 = vector.load %arg5[%c0_29, %c0_30, %c0_31] : memref<1x256x128xf32, #tpu.memory_space<vmem>>, vector<1x256x128xf32>
    %37 = vector.shape_cast %36 : vector<1x256x128xf32> to vector<256x128xf32>
    %38 = vector.shape_cast %35 : vector<256x128xf32> to vector<1x256x128xf32>
    tpu.vector_store %arg5[%c0_29, %c0_30, %c0_31], %38 {strides = array<i32>} : memref<1x256x128xf32, #tpu.memory_space<vmem>>, vector<1x256x128xf32>,
    %c0_32 = arith.constant 0 : index
    %c0_33 = arith.constant 0 : index
    %c0_34 = arith.constant 0 : index
    %39 = vector.load %arg5[%c0_32, %c0_33, %c0_34] : memref<1x256x128xf32, #tpu.memory_space<vmem>>, vector<1x256x128xf32>
    %40 = vector.shape_cast %39 : vector<1x256x128xf32> to vector<256x128xf32>
    %41 = vector.extract_strided_slice %19 {offsets = [0, 2, 0], sizes = [16, 16, 384], strides = [1, 1, 1]} : vector<16x18x384xbf16> to vector<16x16x384xbf16>
    %42 = vector.shape_cast %41 : vector<16x16x384xbf16> to vector<256x384xbf16>
    %c2 = arith.constant 2 : index
    %c0_35 = arith.constant 0 : index
    %c0_36 = arith.constant 0 : index
    %43 = vector.load %arg4[%c2, %c0_35, %c0_36] : memref<3x384x128xbf16, #tpu.memory_space<vmem>>, vector<1x384x128xbf16>
    %44 = vector.shape_cast %43 : vector<1x384x128xbf16> to vector<384x128xbf16>
    %cst_37 = arith.constant dense<0.000000e+00> : vector<256x128xf32>
    %45 = tpu.matmul %42, %44, %cst_37 {dimension_numbers = #tpu.dot_dimension_numbers<[1], [0], [0], [1], [0, 0, 1, 1], [], []>} : vector<256x384xbf16>, vector<384x128xbf16>, vector<256x128xf32> -> vector<256x128xf32>
    %46 = arith.addf %40, %45 : vector<256x128xf32>
    %c0_38 = arith.constant 0 : index
    %c0_39 = arith.constant 0 : index
    %c0_40 = arith.constant 0 : index
    %47 = vector.load %arg5[%c0_38, %c0_39, %c0_40] : memref<1x256x128xf32, #tpu.memory_space<vmem>>, vector<1x256x128xf32>
    %48 = vector.shape_cast %47 : vector<1x256x128xf32> to vector<256x128xf32>
    %49 = vector.shape_cast %46 : vector<256x128xf32> to vector<1x256x128xf32>
    tpu.vector_store %arg5[%c0_38, %c0_39, %c0_40], %49 {strides = array<i32>} : memref<1x256x128xf32, #tpu.memory_space<vmem>>, vector<1x256x128xf32>,
    %c0_41 = arith.constant 0 : index
    %c0_42 = arith.constant 0 : index
    %c0_43 = arith.constant 0 : index
    %50 = vector.load %arg5[%c0_41, %c0_42, %c0_43] : memref<1x256x128xf32, #tpu.memory_space<vmem>>, vector<1x256x128xf32>
    %51 = vector.shape_cast %50 : vector<1x256x128xf32> to vector<256x128xf32>
    %cst_44 = arith.constant dense<0.000000e+00> : vector<128xf32>
    %52 = vector.multi_reduction <add>, %51, %cst_44 [0] : vector<256x128xf32> to vector<128xf32>
    %53 = vector.shape_cast %52 : vector<128xf32> to vector<1x128xf32>
    %54 = arith.mulf %51, %51 : vector<256x128xf32>
    %cst_45 = arith.constant dense<0.000000e+00> : vector<128xf32>
    %55 = vector.multi_reduction <add>, %54, %cst_45 [0] : vector<256x128xf32> to vector<128xf32>
    %56 = vector.shape_cast %55 : vector<128xf32> to vector<1x128xf32>
    %57 = tpu.concatenate %53, %56 in 0 : vector<1x128xf32>, vector<1x128xf32> -> vector<2x128xf32>
    %c0_46 = arith.constant 0 : index
    %c0_47 = arith.constant 0 : index
    %c0_48 = arith.constant 0 : index
    %58 = vector.load %arg6[%c0_46, %c0_47, %c0_48] : memref<1x2x128xf32, #tpu.memory_space<vmem>>, vector<1x2x128xf32>
    %59 = vector.shape_cast %58 : vector<1x2x128xf32> to vector<2x128xf32>
    %60 = vector.shape_cast %57 : vector<2x128xf32> to vector<1x2x128xf32>
    tpu.vector_store %arg6[%c0_46, %c0_47, %c0_48], %60 {strides = array<i32>} : memref<1x2x128xf32, #tpu.memory_space<vmem>>, vector<1x2x128xf32>,
    return
  }
  func.func @transform_0(%arg0: i32) -> (i32, i32, i32) {
    %c0_i32 = arith.constant 0 : i32
    %c0_i32_0 = arith.constant 0 : i32
    %c0_i32_1 = arith.constant 0 : i32
    return %arg0, %c0_i32, %c0_i32_0 : i32, i32, i32
  }
  func.func @transform_1(%arg0: i32) -> (i32, i32) {
    %c0_i32 = arith.constant 0 : i32
    %c0_i32_0 = arith.constant 0 : i32
    %c0_i32_1 = arith.constant 0 : i32
    return %c0_i32, %c0_i32_0 : i32, i32
  }
  func.func @transform_2(%arg0: i32) -> (i32, i32) {
    %c0_i32 = arith.constant 0 : i32
    %c0_i32_0 = arith.constant 0 : i32
    %c0_i32_1 = arith.constant 0 : i32
    return %c0_i32, %c0_i32_0 : i32, i32
  }
  func.func @transform_3(%arg0: i32) -> (i32, i32, i32) {
    %c0_i32 = arith.constant 0 : i32
    %c0_i32_0 = arith.constant 0 : i32
    %c0_i32_1 = arith.constant 0 : i32
    %c0_i32_2 = arith.constant 0 : i32
    return %c0_i32, %c0_i32_0, %c0_i32_1 : i32, i32, i32
  }
  func.func @transform_4(%arg0: i32) -> (i32, i32, i32) {
    %c0_i32 = arith.constant 0 : i32
    %c0_i32_0 = arith.constant 0 : i32
    %c0_i32_1 = arith.constant 0 : i32
    return %arg0, %c0_i32, %c0_i32_0 : i32, i32, i32
  }
  func.func @transform_5(%arg0: i32) -> (i32, i32, i32) {
    %c0_i32 = arith.constant 0 : i32
    %c0_i32_0 = arith.constant 0 : i32
    %c0_i32_1 = arith.constant 0 : i32
    return %arg0, %c0_i32, %c0_i32_0 : i32, i32, i32
  }
}

</mosaic_0001>

<bundles_post_ra>
// kernel: resnet18_basic_block.5
= control target key start
LH: loop header
LB: loop body
LE: loop exit
PB: predicated region body
PF: predicated region fallthrough
CT: control target
= control target key end

     0   :  { %s582_s15 = smov 0   ;;  %s783_s0 = inlined_call_operand.vmem [shape: f32[2,256,128], index: 0, kind: input, shape index: {}]   ;;  %s784_s1 = inlined_call_operand.vmem [shape: f32[1,128], index: 1, kind: input, shape index: {}]   ;;  %s785_s2 = inlined_call_operand.vmem [shape: f32[1,128], index: 2, kind: input, shape index: {}]   ;;  %s786_s3 = inlined_call_operand.vmem [shape: f32[2,256,128], index: 3, kind: input, shape index: {}]   ;;  %s787_s4 = inlined_call_operand.vmem [shape: f32[2,256,128], index: 4, kind: output, shape index: {}]  }
   0x1 LB: > { %s523_s16 = sadd.s32 4294967295, %s555_s15   ;;  %p527_p0 = scmp.ge.s32.totalorder %s555_s15, 1  ;;  %s555_s15 = sphi %s582_s15, %s14_s15  }
   0x2   : > { %p172_p1 = scmp.lt.s32.totalorder %s555_s15, 3 }
   0x4   : > { %p173_p2 = pnand %p527_p0, %p172_p1 }
   0x5   : > { %p203_p3 = scmp.lt.s32.totalorder (!%p173_p2), %s523_s16, 1 }
   0x6   : > { %176 = sbr.rel (%p173_p2) target bundleno = 53 (0x35), region = 36 }
   0xb   : > { %s789_s16 = smov (!%p203_p3, %s523_s16), 1  ;;  %v595_v0 = vld [vmem:[%s784_s1] ss:$0 sm:$0xff] }
   0xc   : > { %s590_s17 = sshll.u32 %s789_s16, 8  ;;  %v613_v2 = vld [vmem:[%s785_s2] ss:$0 sm:$0xff] }
   0xd   : > { %s601_s22 = scalar_lea.vmem %s783_s0, %s590_s17  ;;  %s607_s25 = scalar_lea.vmem %s786_s3, %s590_s17 }
   0xe   : > { %v218_v1 = vld [vmem:[%s601_s22] sm:$0xff]  ;;  %v219_v3 = vld [vmem:[%s601_s22 + $0x8] sm:$0xff]  ;;  %v220_v7 = vld [vmem:[%s601_s22 + $0x10] sm:$0xff]  ;;  %s643_s30 = scalar_lea.vmem %s787_s4, %s590_s17 }
   0xf   : > { %v257_v4 = vmul.f32 %v595_v0, %v218_v1  ;;  %v328_v5 = vld [vmem:[%s607_s25] sm:$0xff]  ;;  %v258_v6 = vmul.f32 %v595_v0, %v219_v3  ;;  %v329_v8 = vld [vmem:[%s607_s25 + $0x8] sm:$0xff]  ;;  %v259_v9 = vmul.f32 %v595_v0, %v220_v7  ;;  %v221_v10 = vld [vmem:[%s601_s22 + $0x18] sm:$0xff] }
  0x10   : > { %v222_v11 = vld [vmem:[%s601_s22 + $0x20] sm:$0xff]  ;;  %v330_v14 = vld [vmem:[%s607_s25 + $0x10] sm:$0xff]  ;;  %v260_v15 = vmul.f32 %v595_v0, %v221_v10  ;;  %v331_v16 = vld [vmem:[%s607_s25 + $0x18] sm:$0xff] }
  0x11   : > { %v296_v12 = vadd.f32 %v613_v2, %v257_v4  ;;  %v297_v13 = vadd.f32 %v613_v2, %v258_v6  ;;  %v261_v17 = vmul.f32 %v595_v0, %v222_v11  ;;  %v223_v18 = vld [vmem:[%s601_s22 + $0x28] sm:$0xff]  ;;  %v298_v19 = vadd.f32 %v613_v2, %v259_v9  ;;  %v332_v20 = vld [vmem:[%s607_s25 + $0x20] sm:$0xff]  ;;  %v224_v22 = vld [vmem:[%s601_s22 + $0x30] sm:$0xff] }
  0x12   : > { %v262_v21 = vmul.f32 %v595_v0, %v223_v18  ;;  %v225_v23 = vld [vmem:[%s601_s22 + $0x38] sm:$0xff]  ;;  %v299_v26 = vadd.f32 %v613_v2, %v260_v15  ;;  %v333_v28 = vld [vmem:[%s607_s25 + $0x28] sm:$0xff]  ;;  %v263_v31 = vmul.f32 %v595_v0, %v224_v22  ;;  %v226_v33 = vld [vmem:[%s601_s22 + $0x40] sm:$0xff] }
  0x13   : > { %v360_v24 = vadd.f32 %v328_v5, %v296_v12  ;;  %v361_v25 = vadd.f32 %v329_v8, %v297_v13  ;;  %v300_v27 = vadd.f32 %v613_v2, %v261_v17  ;;  %v362_v29 = vadd.f32 %v330_v14, %v298_v19  ;;  %v227_v34 = vld [vmem:[%s601_s22 + $0x48] sm:$0xff]  ;;  %v334_v39 = vld [vmem:[%s607_s25 + $0x30] sm:$0xff]  ;;  %v335_v40 = vld [vmem:[%s607_s25 + $0x38] sm:$0xff] }
  0x14   : > { %v301_v30 = vadd.f32 %v613_v2, %v262_v21  ;;  %v264_v32 = vmul.f32 %v595_v0, %v225_v23  ;;  %v363_v37 = vadd.f32 %v331_v16, %v299_v26  ;;  %v228_v41 = vld [vmem:[%s601_s22 + $0x50] sm:$0xff]  ;;  %v302_v44 = vadd.f32 %v613_v2, %v263_v31  ;;  %v229_v46 = vld [vmem:[%s601_s22 + $0x58] sm:$0xff]  ;;  %v230_v47 = vld [vmem:[%s601_s22 + $0x60] sm:$0xff] }
  0x15   : > { %v392_v35 = vmax.f32 %v360_v24, 0.0  ;;  %v393_v36 = vmax.f32 %v361_v25, 0.0  ;;  %v364_v38 = vadd.f32 %v332_v20, %v300_v27  ;;  %v394_v42 = vmax.f32 %v362_v29, 0.0  ;;  %v231_v52 = vld [vmem:[%s601_s22 + $0x68] sm:$0xff]  ;;  %v336_v56 = vld [vmem:[%s607_s25 + $0x40] sm:$0xff]  ;;  %v338_v61 = vld [vmem:[%s607_s25 + $0x50] sm:$0xff] }
  0x16   : > { %v365_v43 = vadd.f32 %v333_v28, %v301_v30  ;;  %v303_v45 = vadd.f32 %v613_v2, %v264_v32  ;;  %v395_v48 = vmax.f32 %v363_v37, 0.0  ;;  %v265_v50 = vmul.f32 %v595_v0, %v226_v33  ;;  %v337_v57 = vld [vmem:[%s607_s25 + $0x48] sm:$0xff]  ;;  %v232_v1 = vld [vmem:[%s601_s22 + $0x70] sm:$0xff]  ;;  %v233_v3 = vld [vmem:[%s601_s22 + $0x78] sm:$0xff] }
  0x17   : > { %424 = vst [vmem:[%s643_s30] sm:$0xff] %v392_v35  ;;  %425 = vst [vmem:[%s643_s30 + $0x8] sm:$0xff] %v393_v36  ;;  %v396_v49 = vmax.f32 %v364_v38, 0.0  ;;  %v266_v51 = vmul.f32 %v595_v0, %v227_v34  ;;  %v366_v54 = vadd.f32 %v334_v39, %v302_v44  ;;  %v267_v58 = vmul.f32 %v595_v0, %v228_v41  ;;  %v339_v7 = vld [vmem:[%s607_s25 + $0x58] sm:$0xff]  ;;  %v340_v8 = vld [vmem:[%s607_s25 + $0x60] sm:$0xff] }
  0x18   : > { %426 = vst [vmem:[%s643_s30 + $0x10] sm:$0xff] %v394_v42  ;;  %v397_v53 = vmax.f32 %v365_v43, 0.0  ;;  %v367_v55 = vadd.f32 %v335_v40, %v303_v45  ;;  %427 = vst [vmem:[%s643_s30 + $0x18] sm:$0xff] %v395_v48  ;;  %v304_v59 = vadd.f32 %v613_v2, %v265_v50  ;;  %v268_v62 = vmul.f32 %v595_v0, %v229_v46  ;;  %v341_v14 = vld [vmem:[%s607_s25 + $0x68] sm:$0xff]  ;;  %v234_v19 = vld [vmem:[%s601_s22 + $0x80] sm:$0xff] }
  0x19   : > { %428 = vst [vmem:[%s643_s30 + $0x20] sm:$0xff] %v396_v49  ;;  %v305_v60 = vadd.f32 %v613_v2, %v266_v51  ;;  %v269_v63 = vmul.f32 %v595_v0, %v230_v47  ;;  %v398_v4 = vmax.f32 %v366_v54, 0.0  ;;  %v306_v6 = vadd.f32 %v613_v2, %v267_v58  ;;  %v235_v20 = vld [vmem:[%s601_s22 + $0x88] sm:$0xff]  ;;  %v342_v25 = vld [vmem:[%s607_s25 + $0x70] sm:$0xff]  ;;  %v343_v26 = vld [vmem:[%s607_s25 + $0x78] sm:$0xff] }
  0x1a   : > { %429 = vst [vmem:[%s643_s30 + $0x28] sm:$0xff] %v397_v53  ;;  %v399_v5 = vmax.f32 %v367_v55, 0.0  ;;  %v270_v9 = vmul.f32 %v595_v0, %v231_v52  ;;  %v368_v10 = vadd.f32 %v336_v56, %v304_v59  ;;  %v307_v12 = vadd.f32 %v613_v2, %v268_v62  ;;  %v236_v27 = vld [vmem:[%s601_s22 + $0x90] sm:$0xff]  ;;  %v237_v32 = vld [vmem:[%s601_s22 + $0x98] sm:$0xff]  ;;  %v238_v33 = vld [vmem:[%s601_s22 + $0xa0] sm:$0xff] }
  0x1b   : > { %v369_v11 = vadd.f32 %v337_v57, %v305_v60  ;;  %v308_v13 = vadd.f32 %v613_v2, %v269_v63  ;;  %430 = vst [vmem:[%s643_s30 + $0x30] sm:$0xff] %v398_v4  ;;  %v370_v15 = vadd.f32 %v338_v61, %v306_v6  ;;  %v271_v17 = vmul.f32 %v595_v0, %v232_v1  ;;  %v239_v38 = vld [vmem:[%s601_s22 + $0xa8] sm:$0xff]  ;;  %v344_v42 = vld [vmem:[%s607_s25 + $0x80] sm:$0xff]  ;;  %v346_v47 = vld [vmem:[%s607_s25 + $0x90] sm:$0xff] }
  0x1c   : > { %431 = vst [vmem:[%s643_s30 + $0x38] sm:$0xff] %v399_v5  ;;  %v309_v16 = vadd.f32 %v613_v2, %v270_v9  ;;  %v272_v18 = vmul.f32 %v595_v0, %v233_v3  ;;  %v400_v21 = vmax.f32 %v368_v10, 0.0  ;;  %v371_v23 = vadd.f32 %v339_v7, %v307_v12  ;;  %v345_v43 = vld [vmem:[%s607_s25 + $0x88] sm:$0xff]  ;;  %v240_v50 = vld [vmem:[%s601_s22 + $0xb0] sm:$0xff]  ;;  %v241_v51 = vld [vmem:[%s601_s22 + $0xb8] sm:$0xff] }
  0x1d   : > { %v401_v22 = vmax.f32 %v369_v11, 0.0  ;;  %v372_v24 = vadd.f32 %v340_v8, %v308_v13  ;;  %v402_v28 = vmax.f32 %v370_v15, 0.0  ;;  %v310_v30 = vadd.f32 %v613_v2, %v271_v17  ;;  %v347_v55 = vld [vmem:[%s607_s25 + $0x98] sm:$0xff]  ;;  %v348_v56 = vld [vmem:[%s607_s25 + $0xa0] sm:$0xff]  ;;  %v349_v62 = vld [vmem:[%s607_s25 + $0xa8] sm:$0xff] }
  0x1e   : > { %v373_v29 = vadd.f32 %v341_v14, %v309_v16  ;;  %v311_v31 = vadd.f32 %v613_v2, %v272_v18  ;;  %432 = vst [vmem:[%s643_s30 + $0x40] sm:$0xff] %v400_v21  ;;  %v403_v34 = vmax.f32 %v371_v23, 0.0  ;;  %v273_v36 = vmul.f32 %v595_v0, %v234_v19  ;;  %v242_v5 = vld [vmem:[%s601_s22 + $0xc0] sm:$0xff]  ;;  %v243_v6 = vld [vmem:[%s601_s22 + $0xc8] sm:$0xff]  ;;  %v350_v11 = vld [vmem:[%s607_s25 + $0xb0] sm:$0xff] }
  0x1f   : > { %433 = vst [vmem:[%s643_s30 + $0x48] sm:$0xff] %v401_v22  ;;  %v404_v35 = vmax.f32 %v372_v24, 0.0  ;;  %v274_v37 = vmul.f32 %v595_v0, %v235_v20  ;;  %434 = vst [vmem:[%s643_s30 + $0x50] sm:$0xff] %v402_v28  ;;  %v374_v40 = vadd.f32 %v342_v25, %v310_v30  ;;  %v275_v44 = vmul.f32 %v595_v0, %v236_v27  ;;  %v351_v12 = vld [vmem:[%s607_s25 + $0xb8] sm:$0xff]  ;;  %v244_v13 = vld [vmem:[%s601_s22 + $0xd0] sm:$0xff] }
  0x20   : > { %v405_v39 = vmax.f32 %v373_v29, 0.0  ;;  %v375_v41 = vadd.f32 %v343_v26, %v311_v31  ;;  %435 = vst [vmem:[%s643_s30 + $0x58] sm:$0xff] %v403_v34  ;;  %v312_v45 = vadd.f32 %v613_v2, %v273_v36  ;;  %v276_v48 = vmul.f32 %v595_v0, %v237_v32  ;;  %v245_v18 = vld [vmem:[%s601_s22 + $0xd8] sm:$0xff]  ;;  %v246_v19 = vld [vmem:[%s601_s22 + $0xe0] sm:$0xff]  ;;  %v247_v24 = vld [vmem:[%s601_s22 + $0xe8] sm:$0xff] }
  0x21   : > { %436 = vst [vmem:[%s643_s30 + $0x60] sm:$0xff] %v404_v35  ;;  %v313_v46 = vadd.f32 %v613_v2, %v274_v37  ;;  %v277_v49 = vmul.f32 %v595_v0, %v238_v33  ;;  %v406_v52 = vmax.f32 %v374_v40, 0.0  ;;  %v314_v54 = vadd.f32 %v613_v2, %v275_v44  ;;  %v352_v28 = vld [vmem:[%s607_s25 + $0xc0] sm:$0xff]  ;;  %v353_v29 = vld [vmem:[%s607_s25 + $0xc8] sm:$0xff]  ;;  %v354_v33 = vld [vmem:[%s607_s25 + $0xd0] sm:$0xff] }
  0x22   : > { %437 = vst [vmem:[%s643_s30 + $0x68] sm:$0xff] %v405_v39  ;;  %v407_v53 = vmax.f32 %v375_v41, 0.0  ;;  %v278_v57 = vmul.f32 %v595_v0, %v239_v38  ;;  %v376_v58 = vadd.f32 %v344_v42, %v312_v45  ;;  %v315_v60 = vadd.f32 %v613_v2, %v276_v48  ;;  %v248_v36 = vld [vmem:[%s601_s22 + $0xf0] sm:$0xff]  ;;  %v249_v37 = vld [vmem:[%s601_s22 + $0xf8] sm:$0xff]  ;;  %v356_v42 = vld [vmem:[%s607_s25 + $0xe0] sm:$0xff] }
  0x23   : > { %v377_v59 = vadd.f32 %v345_v43, %v313_v46  ;;  %v316_v61 = vadd.f32 %v613_v2, %v277_v49  ;;  %438 = vst [vmem:[%s643_s30 + $0x70] sm:$0xff] %v406_v52  ;;  %v378_v63 = vadd.f32 %v346_v47, %v314_v54  ;;  %v279_v3 = vmul.f32 %v595_v0, %v240_v50  ;;  %v355_v41 = vld [vmem:[%s607_s25 + $0xd8] sm:$0xff]  ;;  %v357_v48 = vld [vmem:[%s607_s25 + $0xe8] sm:$0xff] }
  0x24   : > { %439 = vst [vmem:[%s643_s30 + $0x78] sm:$0xff] %v407_v53  ;;  %v317_v1 = vadd.f32 %v613_v2, %v278_v57  ;;  %v280_v4 = vmul.f32 %v595_v0, %v241_v51  ;;  %v408_v7 = vmax.f32 %v376_v58, 0.0  ;;  %v379_v9 = vadd.f32 %v347_v55, %v315_v60  ;;  %v358_v57 = vld [vmem:[%s607_s25 + $0xf0] sm:$0xff]  ;;  %v359_v58 = vld [vmem:[%s607_s25 + $0xf8] sm:$0xff] }
  0x25   : > { %v409_v8 = vmax.f32 %v377_v59, 0.0  ;;  %v380_v10 = vadd.f32 %v348_v56, %v316_v61  ;;  %v410_v14 = vmax.f32 %v378_v63, 0.0  ;;  %v318_v16 = vadd.f32 %v613_v2, %v279_v3 }
  0x26   : > { %v381_v15 = vadd.f32 %v349_v62, %v317_v1  ;;  %v319_v17 = vadd.f32 %v613_v2, %v280_v4  ;;  %440 = vst [vmem:[%s643_s30 + $0x80] sm:$0xff] %v408_v7  ;;  %v411_v20 = vmax.f32 %v379_v9, 0.0  ;;  %v281_v22 = vmul.f32 %v595_v0, %v242_v5 }
  0x27   : > { %441 = vst [vmem:[%s643_s30 + $0x88] sm:$0xff] %v409_v8  ;;  %v412_v21 = vmax.f32 %v380_v10, 0.0  ;;  %v282_v23 = vmul.f32 %v595_v0, %v243_v6  ;;  %442 = vst [vmem:[%s643_s30 + $0x90] sm:$0xff] %v410_v14  ;;  %v382_v26 = vadd.f32 %v350_v11, %v318_v16  ;;  %v283_v30 = vmul.f32 %v595_v0, %v244_v13 }
  0x28   : > { %v413_v25 = vmax.f32 %v381_v15, 0.0  ;;  %v383_v27 = vadd.f32 %v351_v12, %v319_v17  ;;  %443 = vst [vmem:[%s643_s30 + $0x98] sm:$0xff] %v411_v20  ;;  %v320_v31 = vadd.f32 %v613_v2, %v281_v22  ;;  %v284_v34 = vmul.f32 %v595_v0, %v245_v18 }
  0x29   : > { %444 = vst [vmem:[%s643_s30 + $0xa0] sm:$0xff] %v412_v21  ;;  %v321_v32 = vadd.f32 %v613_v2, %v282_v23  ;;  %v285_v35 = vmul.f32 %v595_v0, %v246_v19  ;;  %v414_v38 = vmax.f32 %v382_v26, 0.0  ;;  %v322_v40 = vadd.f32 %v613_v2, %v283_v30 }
  0x2a   : > { %445 = vst [vmem:[%s643_s30 + $0xa8] sm:$0xff] %v413_v25  ;;  %v415_v39 = vmax.f32 %v383_v27, 0.0  ;;  %v286_v43 = vmul.f32 %v595_v0, %v247_v24  ;;  %v384_v44 = vadd.f32 %v352_v28, %v320_v31  ;;  %v323_v46 = vadd.f32 %v613_v2, %v284_v34 }
  0x2b   : > { %v385_v45 = vadd.f32 %v353_v29, %v321_v32  ;;  %v324_v47 = vadd.f32 %v613_v2, %v285_v35  ;;  %446 = vst [vmem:[%s643_s30 + $0xb0] sm:$0xff] %v414_v38  ;;  %v386_v49 = vadd.f32 %v354_v33, %v322_v40  ;;  %v287_v51 = vmul.f32 %v595_v0, %v248_v36 }
  0x2c   : > { %447 = vst [vmem:[%s643_s30 + $0xb8] sm:$0xff] %v415_v39  ;;  %v325_v50 = vadd.f32 %v613_v2, %v286_v43  ;;  %v288_v52 = vmul.f32 %v595_v0, %v249_v37  ;;  %v416_v53 = vmax.f32 %v384_v44, 0.0  ;;  %v387_v55 = vadd.f32 %v355_v41, %v323_v46 }
  0x2d   : > { %v417_v54 = vmax.f32 %v385_v45, 0.0  ;;  %v388_v56 = vadd.f32 %v356_v42, %v324_v47  ;;  %v418_v59 = vmax.f32 %v386_v49, 0.0  ;;  %v326_v61 = vadd.f32 %v613_v2, %v287_v51 }
  0x2e   : > { %v389_v60 = vadd.f32 %v357_v48, %v325_v50  ;;  %v327_v62 = vadd.f32 %v613_v2, %v288_v52  ;;  %448 = vst [vmem:[%s643_s30 + $0xc0] sm:$0xff] %v416_v53  ;;  %v419_v0 = vmax.f32 %v387_v55, 0.0 }
  0x2f   : > { %449 = vst [vmem:[%s643_s30 + $0xc8] sm:$0xff] %v417_v54  ;;  %v420_v63 = vmax.f32 %v388_v56, 0.0  ;;  %450 = vst [vmem:[%s643_s30 + $0xd0] sm:$0xff] %v418_v59  ;;  %v390_v3 = vadd.f32 %v358_v57, %v326_v61 }
  0x30   : > { %v421_v1 = vmax.f32 %v389_v60, 0.0  ;;  %v391_v4 = vadd.f32 %v359_v58, %v327_v62  ;;  %451 = vst [vmem:[%s643_s30 + $0xd8] sm:$0xff] %v419_v0 }
  0x31   : > { %452 = vst [vmem:[%s643_s30 + $0xe0] sm:$0xff] %v420_v63  ;;  %v422_v5 = vmax.f32 %v390_v3, 0.0 }
  0x32   : > { %453 = vst [vmem:[%s643_s30 + $0xe8] sm:$0xff] %v421_v1  ;;  %v423_v6 = vmax.f32 %v391_v4, 0.0 }
  0x33   : > { %454 = vst [vmem:[%s643_s30 + $0xf0] sm:$0xff] %v422_v5 }
  0x34   : > { %455 = vst [vmem:[%s643_s30 + $0xf8] sm:$0xff] %v423_v6 }
  0x35 PF: > { %s14_s15 = sadd.s32 1, %s555_s15  }
  0x36   : > { %p11_p4 = scmp.ge.s32.totalorder %s14_s15, 4  }
  0x38   :  { %13 = sbr.rel (!%p11_p4) target bundleno = 1 (0x1), region = 69 }

// kernel: resnet18_basic_block.3
= control target key start
LH: loop header
LB: loop body
LE: loop exit
PB: predicated region body
PF: predicated region fallthrough
CT: control target
= control target key end

     0   :  { %s2351_s12 = smov 0   ;;  %s3010_s0 = inlined_call_operand.vmem [shape: bf16[2,18,18,4], index: 0, kind: input, shape index: {}]   ;;  %s3011_s1 = inlined_call_operand.vmem [shape: bf16[3,12,128], index: 1, kind: input, shape index: {}]   ;;  %s3012_s2 = inlined_call_operand.vmem [shape: f32[2,256,128], index: 2, kind: output, shape index: {0}]   ;;  %s3013_s3 = inlined_call_operand.vmem [shape: f32[2,2,128], index: 3, kind: output, shape index: {1}]  }
   0x1 LB: > { %s2009_s13 = sadd.s32 4294967295, %s2327_s12   ;;  %p2013_p0 = scmp.ge.s32.totalorder %s2327_s12, 1  ;;  %s2327_s12 = sphi %s2351_s12, %s14_s12  }
   0x2   : > { %p140_p1 = scmp.lt.s32.totalorder %s2327_s12, 3 }
   0x4   : > { %p141_p2 = pnand %p2013_p0, %p140_p1 }
   0x5   : > { %p168_p3 = scmp.lt.s32.totalorder (!%p141_p2), %s2009_s13, 1  ;;  %s2329_s20 = smov (!%p141_p2), 8  }
   0x6   : > { %144 = sbr.rel (%p141_p2) target bundleno = 495 (0x1ef), region = 28  ;;  %s2330_s21 = smov (!%p141_p2), 4  }
   0xb   : > { %vm711_vm0 = vcmask 1045504   ;;  %v2314_v0 = vld [vmem:[%s3011_s1] sm:$0x3f]   ;;  %s3015_s13 = smov (!%p168_p3, %s2009_s13), 1  ;;  %v2318_v13 = vld [vmem:[%s3011_s1 + $0x8] sm:$0x3f]  }
   0xc   : > { %2268 = vmatprep.subr.msk.bf16.mxu1 %vm711_vm0, %v2314_v0  ;;  %v713_v1 = vsel %vm711_vm0, %v2314_v0, 0  ;;  %2267 = vmatprep.subr.msk.bf16.mxu0 %vm711_vm0, %v2314_v0  ;;  %s2271_s16 = smul.u32 216, %s3015_s13  ;;  %v2450_v15 = vsel %vm711_vm0, %v2318_v13, 0  ;;  %v2320_v18 = vld [vmem:[%s3011_s1 + $0x10] sm:$0x3f]   ;;  %vm509_vm1 = vcmask 31744  }
   0xd   : > { %2266 = vmatpush3.bf16.msra.mxu1 %v713_v1  ;;  %2164 = vmatpush3.bf16.msra.mxu0 %v713_v1  ;;  %v2472_v20 = vsel %vm711_vm0, %v2320_v18, 0  ;;  %vm606_vm2 = vcmask 64512   ;;  %vm678_vm3 = vcmask 97280   ;;  %vm940_vm4 = vsmask.f32 7424  ;;  %s2111_s26 = sshll.u32 %s3015_s13, 8 }
   0xe   : > { %s2371_s19 = scalar_lea.vmem %s3010_s0, %s2271_s16  ;;  %2269 = vmatprep.subr.msk.bf16.mxu1 %vm711_vm0, %v2318_v13  ;;  %2270 = vmatprep.subr.msk.bf16.mxu0 %vm711_vm0, %v2320_v18  ;;  %vm1449_vm5 = vcmask 1046528   ;;  %s2946_s29 = scalar_lea.vmem %s3012_s2, %s2111_s26  ;;  %vm1920_vm6 = vcmask 1040384  }
   0xf   : > { %v2374_v2 = vld [vmem:[%s2371_s19 + $0x78] sm:$0xff]   ;;  %v2377_v3 = vld [vmem:[%s2371_s19 + $0x6c] sm:$0xff]   ;;  %v2382_v4 = vld [vmem:[%s2371_s19 + $0x84] sm:$0xff]   ;;  %s2017_s30 = sshll.u32 %s3015_s13, 1 }
  0x10   : > { %477 = vrot.lane.b32.xlu1 %v2374_v2, %s2329_s20  ;;  %405 = vrot.lane.b32.xlu0 %v2377_v3, %s2330_s21  ;;  %v2389_v5 = vld [vmem:[%s2371_s19 + $0x90] sm:$0xff]   ;;  %v2403_v7 = vld [vmem:[%s2371_s19 + $0x9c] sm:$0xff]   ;;  %s181_s6 = scalar_lea.vmem %s3013_s3, %s2017_s30 }
  0x11   : > { %v2396_v6 = vld [vmem:[%s2371_s19 + $0xc] sm:$0xff]   ;;  %v2406_v8 = vld [vmem:[%s2371_s19 + $0x18] sm:$0xff]   ;;  %v2413_v9 = vld [vmem:[%s2371_s19 + $0x24] sm:$0xff]  }
  0x12   : > { %v2420_v10 = vld [vmem:[%s2371_s19 + $0xa8] sm:$0xff]   ;;  %v2431_v11 = vld [vmem:[%s2371_s19 + $0x30] sm:$0xff]   ;;  %v2444_v14 = vld [vmem:[%s2371_s19 + $0x3c] sm:$0xff]  }
  0x13   : > { %v2436_v12 = vld [vmem:[%s2371_s19 + $0xb4] sm:$0xff]   ;;  %v2294_v16 = vld [vmem:[%s2371_s19 + $0xc0] sm:$0xff]   ;;  %v2295_v19 = vld [vmem:[%s2371_s19 + $0xcc] sm:$0xff]  }
  0x14   : > { %481 = vrot.lane.b32.xlu1 %v2382_v4, %s2329_s20  ;;  %409 = vrot.lane.b32.xlu0 %v2374_v2, %s2330_s21  ;;  %v2463_v17 = vld [vmem:[%s2371_s19 + $0x14] ss:$0 sps:$4 sm:$0x11]   ;;  %v2477_v21 = vld [vmem:[%s2371_s19 + $0x48] sm:$0xff]  }
  0x15   : > { %v2483_v22 = vld [vmem:[%s2371_s19 + $0x20] ss:$0 sps:$4 sm:$0x11]   ;;  %v2490_v23 = vld [vmem:[%s2371_s19 + $0x2c] ss:$0 sps:$4 sm:$0x11]  }
  0x16   : > { %v2495_v24 = vld [vmem:[%s2371_s19 + $0x54] sm:$0xff]   ;;  %v2301_v25 = vld [vmem:[%s2371_s19 + $0x60] sm:$0xff]   ;;  %v2521_v28 = vld [vmem:[%s2371_s19 + $0x50] ss:$0 sps:$4 sm:$0x11]  }
  0x17   : > { %v2508_v26 = vld [vmem:[%s2371_s19 + $0x38] ss:$0 sps:$4 sm:$0x11]   ;;  %v2514_v27 = vld [vmem:[%s2371_s19 + $0x44] ss:$0 sps:$4 sm:$0x11]  }
  0x18   : > { %417 = vrot.lane.b32.xlu1 %v2389_v5, %s2330_s21  ;;  %413 = vrot.lane.b32.xlu0 %v2382_v4, %s2330_s21  ;;  %v2528_v29 = vld [vmem:[%s2371_s19 + $0x5c] ss:$0 sps:$4 sm:$0x11]   ;;  %v2535_v30 = vld [vmem:[%s2371_s19 + $0x68] ss:$0 sps:$4 sm:$0x11]  }
  0x19   : > { %v2542_v31 = vld [vmem:[%s2371_s19 + $0x74] ss:$0 sps:$4 sm:$0x11]   ;;  %v2549_v32 = vld [vmem:[%s2371_s19 + $0x80] ss:$0 sps:$4 sm:$0x11]  }
  0x1a   : > { %v2556_v33 = vld [vmem:[%s2371_s19 + $0x8c] ss:$0 sps:$4 sm:$0x11]   ;;  %v2563_v34 = vld [vmem:[%s2371_s19 + $0x98] ss:$0 sps:$4 sm:$0x11]  }
  0x1b   : > { %v2570_v35 = vld [vmem:[%s2371_s19 + $0xa4] ss:$0 sps:$4 sm:$0x11]   ;;  %v2577_v36 = vld [vmem:[%s2371_s19 + $0xb0] ss:$0 sps:$4 sm:$0x11]  }
  0x1c   : > { %373 = vrot.lane.b32.xlu1 %v2396_v6, %s2330_s21  ;;  %485 = vrot.lane.b32.xlu0 %v2389_v5, %s2329_s20  ;;  %v2584_v37 = vld [vmem:[%s2371_s19 + $0xbc] ss:$0 sps:$4 sm:$0x11]   ;;  %v2315_v41 = vld [vmem:[%s2371_s19 + $0xc8] ss:$0 sps:$4 sm:$0x11]  }
  0x1d   : > { %v2316_v46 = vld [vmem:[%s2371_s19 + $0xd4] ss:$0 sps:$4 sm:$0x11]   ;;  %v2317_v55 = vld [vmem:[%s2371_s19] sm:$0xff]  }
  0x20   : > { %377 = vrot.lane.b32.xlu1 %v2406_v8, %s2330_s21  ;;  %489 = vrot.lane.b32.xlu0 %v2403_v7, %s2329_s20 }
  0x24   : > { %449 = vrot.lane.b32.xlu1 %v2413_v9, %s2329_s20  ;;  %445 = vrot.lane.b32.xlu0 %v2406_v8, %s2329_s20 }
  0x28   : > { %425 = vrot.lane.b32.xlu1 %v2420_v10, %s2330_s21  ;;  %421 = vrot.lane.b32.xlu0 %v2403_v7, %s2330_s21 }
  0x2c   : > { %381 = vrot.lane.b32.xlu1 %v2413_v9, %s2330_s21  ;;  %493 = vrot.lane.b32.xlu0 %v2420_v10, %s2329_s20 }
  0x30   : > { %385 = vrot.lane.b32.xlu1 %v2431_v11, %s2330_s21  ;;  %497 = vrot.lane.b32.xlu0 %v2436_v12, %s2329_s20 }
  0x34   : > { %457 = vrot.lane.b32.xlu1 %v2444_v14, %s2329_s20  ;;  %453 = vrot.lane.b32.xlu0 %v2431_v11, %s2329_s20 }
  0x38   : > { %433 = vrot.lane.b32.xlu1 %v2294_v16, %s2330_s21  ;;  %429 = vrot.lane.b32.xlu0 %v2436_v12, %s2330_s21 }
  0x3c   : > { %389 = vrot.lane.b32.xlu1 %v2444_v14, %s2330_s21  ;;  %501 = vrot.lane.b32.xlu0 %v2294_v16, %s2329_s20 }
  0x40   : > { %375 = vrot.lane.b32.xlu1 %v2463_v17, %s2330_s21  ;;  %505 = vrot.lane.b32.xlu0 %v2295_v19, %s2329_s20 }
  0x44   : > { %461 = vrot.lane.b32.xlu1 %v2477_v21, %s2329_s20  ;;  %393 = vrot.lane.b32.xlu0 %v2477_v21, %s2330_s21 }
  0x48   : > { %447 = vrot.lane.b32.xlu1 %v2483_v22, %s2329_s20  ;;  %379 = vrot.lane.b32.xlu0 %v2483_v22, %s2330_s21 }
  0x4c   : > { %451 = vrot.lane.b32.xlu1 %v2490_v23, %s2329_s20  ;;  %465 = vrot.lane.b32.xlu0 %v2495_v24, %s2329_s20 }
  0x50   : > { %383 = vrot.lane.b32.xlu1 %v2490_v23, %s2330_s21  ;;  %397 = vrot.lane.b32.xlu0 %v2495_v24, %s2330_s21 }
  0x54   : > { %469 = vrot.lane.b32.xlu1 %v2301_v25, %s2329_s20  ;;  %401 = vrot.lane.b32.xlu0 %v2301_v25, %s2330_s21 }
  0x58   : > { %455 = vrot.lane.b32.xlu1 %v2508_v26, %s2329_s20  ;;  %387 = vrot.lane.b32.xlu0 %v2508_v26, %s2330_s21 }
  0x5c   : > { %459 = vrot.lane.b32.xlu1 %v2514_v27, %s2329_s20  ;;  %473 = vrot.lane.b32.xlu0 %v2377_v3, %s2329_s20 }
  0x60   : > { %395 = vrot.lane.b32.xlu1 %v2521_v28, %s2330_s21  ;;  %391 = vrot.lane.b32.xlu0 %v2514_v27, %s2330_s21 }
  0x64   : > { %467 = vrot.lane.b32.xlu1 %v2528_v29, %s2329_s20  ;;  %463 = vrot.lane.b32.xlu0 %v2521_v28, %s2329_s20 }
  0x68   : > { %403 = vrot.lane.b32.xlu1 %v2535_v30, %s2330_s21  ;;  %399 = vrot.lane.b32.xlu0 %v2528_v29, %s2330_s21 }
  0x6c   : > { %475 = vrot.lane.b32.xlu1 %v2542_v31, %s2329_s20  ;;  %471 = vrot.lane.b32.xlu0 %v2535_v30, %s2329_s20 }
  0x70   : > { %411 = vrot.lane.b32.xlu1 %v2549_v32, %s2330_s21  ;;  %407 = vrot.lane.b32.xlu0 %v2542_v31, %s2330_s21 }
  0x74   : > { %483 = vrot.lane.b32.xlu1 %v2556_v33, %s2329_s20  ;;  %479 = vrot.lane.b32.xlu0 %v2549_v32, %s2329_s20 }
  0x78   : > { %419 = vrot.lane.b32.xlu1 %v2563_v34, %s2330_s21  ;;  %415 = vrot.lane.b32.xlu0 %v2556_v33, %s2330_s21 }
  0x7c   : > { %491 = vrot.lane.b32.xlu1 %v2570_v35, %s2329_s20  ;;  %487 = vrot.lane.b32.xlu0 %v2563_v34, %s2329_s20 }
  0x80   : > { %427 = vrot.lane.b32.xlu1 %v2577_v36, %s2330_s21  ;;  %423 = vrot.lane.b32.xlu0 %v2570_v35, %s2330_s21 }
  0x82   : > { %v478_v38 = vpop.permute.xlu1 %477  ;;  %v406_v39 = vpop.permute.xlu0 %405 }
  0x83   : > { %v560_v40 = vsel %vm509_vm1, %v2301_v25, %v406_v39 }
  0x84   : > { %499 = vrot.lane.b32.xlu1 %v2584_v37, %s2329_s20  ;;  %495 = vrot.lane.b32.xlu0 %v2577_v36, %s2329_s20  ;;  %v2595_v42 = vsel %vm606_vm2, %v560_v40, %v478_v38 }
  0x85   : > { %2181 = vmatprep.mubr.msk.bf16.mxu1 %vm678_vm3, %v2595_v42 }
  0x86   : > { %v482_v43 = vpop.permute.xlu1 %481  ;;  %v410_v44 = vpop.permute.xlu0 %409 }
  0x87   : > { %v566_v45 = vsel %vm509_vm1, %v2377_v3, %v410_v44 }
  0x88   : > { %435 = vrot.lane.b32.xlu1 %v2315_v41, %s2330_s21  ;;  %431 = vrot.lane.b32.xlu0 %v2584_v37, %s2330_s21  ;;  %v2606_v47 = vsel %vm606_vm2, %v566_v45, %v482_v43 }
  0x89   : > { %2182 = vmatmul.mubr.msk.bf16.vlgmr.msra.gmra.mxu1 %vm678_vm3, %v2606_v47 }
  0x8a   : > { %v418_v48 = vpop.permute.xlu1 %417  ;;  %v414_v49 = vpop.permute.xlu0 %413  ;;  %2198 = vmatpush3.bf16.msra.mxu1 %v2450_v15 }
  0x8b   : > { %v572_v51 = vsel %vm509_vm1, %v2374_v2, %v414_v49  ;;  %v578_v54 = vsel %vm509_vm1, %v2382_v4, %v418_v48 }
  0x8c   : > { %507 = vrot.lane.b32.xlu1 %v2316_v46, %s2329_s20  ;;  %503 = vrot.lane.b32.xlu0 %v2315_v41, %s2329_s20 }
  0x8e   : > { %v374_v50 = vpop.permute.xlu1 %373  ;;  %v486_v52 = vpop.permute.xlu0 %485 }
  0x8f   : > { %v2616_v53 = vsel %vm606_vm2, %v572_v51, %v486_v52  ;;  %v512_v60 = vsel %vm509_vm1, %v2317_v55, %v374_v50  ;;  %v2319_v51 = vld [vmem:[%s2371_s19 + $0x8] ss:$0 sps:$4 sm:$0x11]  }
  0x90   : > { %2185 = vmatprep.mubr.msk.bf16.mxu1 %vm678_vm3, %v2616_v53 }
  0x92   : > { %v378_v56 = vpop.permute.xlu1 %377  ;;  %v490_v57 = vpop.permute.xlu0 %489 }
  0x93   : > { %v2624_v58 = vsel %vm606_vm2, %v578_v54, %v490_v57  ;;  %v518_v59 = vsel %vm509_vm1, %v2396_v6, %v378_v56 }
  0x94   : > { %2186 = vmatmul.mubr.msk.bf16.gmra.mxu1 %vm678_vm3, %v2624_v58 }
  0x96   : > { %v450_v61 = vpop.permute.xlu1 %449  ;;  %v446_v62 = vpop.permute.xlu0 %445 }
  0x97   : > { %v2632_v63 = vsel %vm606_vm2, %v518_v59, %v450_v61  ;;  %v2635_v0 = vsel %vm606_vm2, %v512_v60, %v446_v62 }
  0x98   : > { %2165 = vmatprep.mubr.msk.bf16.mxu0 %vm678_vm3, %v2635_v0  ;;  %v953_v56 = vshll.u32 %v2632_v63, 16  ;;  %v941_v61 = vshrl.u32 %v2635_v0, 16 }
  0x99   : > { %2166 = vmatmul.mubr.msk.bf16.vlgmr.msra.gmra.mxu0 %vm678_vm3, %v2632_v63 }
  0x9a   : > { %v426_v1 = vpop.permute.xlu1 %425  ;;  %v422_v2 = vpop.permute.xlu0 %421  ;;  %2232 = vmatpush3.bf16.msra.mxu0 %v2472_v20 }
  0x9b   : > { %v584_v4 = vsel %vm509_vm1, %v2389_v5, %v422_v2  ;;  %v590_v15 = vsel %vm509_vm1, %v2403_v7, %v426_v1  ;;  %v951_v1 = vshrl.u32 %v2632_v63, 16 }
  0x9e   : > { %v382_v3 = vpop.permute.xlu1 %381  ;;  %v494_v6 = vpop.permute.xlu0 %493 }
  0x9f   : > { %v2645_v13 = vsel %vm606_vm2, %v584_v4, %v494_v6  ;;  %v524_v5 = vsel %vm509_vm1, %v2406_v8, %v382_v3  ;;  %v955_v3 = vrot.slane %v953_v56, 1 }
  0xa0   : > { %2189 = vmatprep.mubr.msk.bf16.mxu1 %vm678_vm3, %v2645_v13 }
  0xa2   : > { %v386_v16 = vpop.permute.xlu1 %385  ;;  %v498_v18 = vpop.permute.xlu0 %497 }
  0xa3   : > { %v2652_v19 = vsel %vm606_vm2, %v590_v15, %v498_v18  ;;  %v530_v20 = vsel %vm509_vm1, %v2413_v9, %v386_v16 }
  0xa4   : > { %2190 = vmatmul.mubr.msk.bf16.gmra.mxu1 %vm678_vm3, %v2652_v19 }
  0xa6   : > { %v458_v25 = vpop.permute.xlu1 %457  ;;  %v454_v38 = vpop.permute.xlu0 %453 }
  0xa7   : > { %v2661_v7 = vsel %vm606_vm2, %v530_v20, %v458_v25  ;;  %v2664_v39 = vsel %vm606_vm2, %v524_v5, %v454_v38 }
  0xa8   : > { %2169 = vmatprep.mubr.msk.bf16.mxu0 %vm678_vm3, %v2664_v39  ;;  %v971_v56 = vshrl.u32 %v2661_v7, 16 }
  0xa9   : > { %2170 = vmatmul.mubr.msk.bf16.gmra.mxu0 %vm678_vm3, %v2661_v7 }
  0xaa   : > { %v434_v9 = vpop.permute.xlu1 %433  ;;  %v430_v8 = vpop.permute.xlu0 %429 }
  0xab   : > { %v596_v41 = vsel %vm509_vm1, %v2420_v10, %v430_v8  ;;  %v602_v45 = vsel %vm509_vm1, %v2436_v12, %v434_v9  ;;  %v943_v10 = vshll.u32 %v2635_v0, 16 }
  0xae   : > { %v390_v40 = vpop.permute.xlu1 %389  ;;  %v502_v43 = vpop.permute.xlu0 %501 }
  0xaf   : > { %v2673_v44 = vsel %vm606_vm2, %v596_v41, %v502_v43  ;;  %v536_v49 = vsel %vm509_vm1, %v2431_v11, %v390_v40  ;;  %v945_v11 = vrot.slane %v943_v10, 1  ;;  %v963_v41 = vshll.u32 %v2664_v39, 16 }
  0xb0   : > { %2193 = vmatprep.mubr.msk.bf16.mxu1 %vm678_vm3, %v2673_v44  ;;  %v973_v10 = vshll.u32 %v2661_v7, 16 }
  0xb1   : > { %v946_v2 = vor.u32 %v945_v11, %v941_v61 }
  0xb2   : > { %v376_v46 = vpop.permute.xlu1 %375  ;;  %v506_v48 = vpop.permute.xlu0 %505  ;;  %v975_v61 = vrot.slane %v973_v10, 1 }
  0xb3   : > { %v2682_v50 = vsel %vm606_vm2, %v602_v45, %v506_v48  ;;  %v515_v55 = vsel %vm509_vm1, %v2319_v51, %v376_v46  ;;  %v965_v51 = vrot.slane %v963_v41, 1 }
  0xb4   : > { %2194 = vmatmul.mubr.msk.bf16.gmra.mxu1 %vm678_vm3, %v2682_v50 }
  0xb6   : > { %v462_v52 = vpop.permute.xlu1 %461  ;;  %v394_v54 = vpop.permute.xlu0 %393 }
  0xb7   : > { %v2689_v12 = vsel %vm606_vm2, %v536_v49, %v462_v52  ;;  %v542_v16 = vsel %vm509_vm1, %v2444_v14, %v394_v54 }
  0xb8   : > { %2173 = vmatprep.mubr.msk.bf16.mxu0 %vm678_vm3, %v2689_v12 }
  0xba   : > { %v448_v57 = vpop.permute.xlu1 %447  ;;  %v380_v59 = vpop.permute.xlu0 %379 }
  0xbb   : > { %v610_v60 = vsel %vm606_vm2, %v515_v55, %v448_v57  ;;  %v521_v4 = vsel %vm509_vm1, %v2463_v17, %v380_v59  ;;  %v956_v17 = vor.u32 %v955_v3, %v951_v1 }
  0xbc   : > { %v947_v62 = vshll.u32 %v610_v60, 16  ;;  %v1451_v57 = vrot.slane %v610_v60, 1 }
  0xbe   : > { %v949_v6 = vrot.slane %v947_v62, 1  ;;  %v452_v15 = vpop.permute.xlu1 %451  ;;  %v466_v18 = vpop.permute.xlu0 %465 }
  0xbf   : > { %v2703_v20 = vsel %vm606_vm2, %v521_v4, %v452_v15  ;;  %v2706_v5 = vsel %vm606_vm2, %v542_v16, %v466_v18 }
  0xc0   : > { %v957_v25 = vshll.u32 %v2703_v20, 16  ;;  %v950_v38 = vsel %vm940_vm4, %v946_v2, %v949_v6  ;;  %2174 = vmatmul.mubr.msk.bf16.gmra.mxu0 %vm678_vm3, %v2706_v5  ;;  %v1450_v2 = vrot.slane %v2635_v0, 1  ;;  %v976_v0 = vor.u32 %v975_v61, %v971_v56 }
  0xc1   : > { %2199 = vmatprep.mubr.msk.bf16.mxu1 %vm678_vm3, %v950_v38  ;;  %v983_v38 = vshll.u32 %v2689_v12, 16 }
  0xc2   : > { %v959_v9 = vrot.slane %v957_v25, 1  ;;  %v384_v8 = vpop.permute.xlu1 %383  ;;  %v398_v14 = vpop.permute.xlu0 %397 }
  0xc3   : > { %v548_v43 = vsel %vm509_vm1, %v2477_v21, %v398_v14  ;;  %v527_v49 = vsel %vm509_vm1, %v2483_v22, %v384_v8  ;;  %v961_v21 = vshrl.u32 %v2664_v39, 16 }
  0xc4   : > { %v960_v40 = vsel %vm940_vm4, %v956_v17, %v959_v9  ;;  %v1454_v9 = vrot.slane %v2703_v20, 1 }
  0xc5   : > { %2200 = vmatmul.mubr.msk.bf16.vlgmr.msra.gmra.mxu1 %vm678_vm3, %v960_v40  ;;  %v966_v59 = vor.u32 %v965_v51, %v961_v21  ;;  %v985_v51 = vrot.slane %v983_v38, 1 }
  0xc6   : > { %v470_v45 = vpop.permute.xlu1 %469  ;;  %v402_v46 = vpop.permute.xlu0 %401 }
  0xc7   : > { %v2719_v48 = vsel %vm606_vm2, %v548_v43, %v470_v45  ;;  %v554_v3 = vsel %vm509_vm1, %v2495_v24, %v402_v46  ;;  %v993_v24 = vshll.u32 %v2706_v5, 16  ;;  %v1453_v43 = vrot.slane %v2632_v63, 1 }
  0xc8   : > { %2177 = vmatprep.mubr.msk.bf16.mxu0 %vm678_vm3, %v2719_v48  ;;  %v1003_v61 = vshll.u32 %v2719_v48, 16 }
  0xc9   : > { %v995_v45 = vrot.slane %v993_v24, 1 }
  0xca   : > { %v456_v52 = vpop.permute.xlu1 %455  ;;  %v388_v54 = vpop.permute.xlu0 %387 }
  0xcb   : > { %v618_v55 = vsel %vm606_vm2, %v527_v49, %v456_v52  ;;  %v533_v22 = vsel %vm509_vm1, %v2490_v23, %v388_v54  ;;  %v1452_v23 = vsel %vm1449_vm5, %v1450_v2, %v1451_v57  ;;  %v1456_v49 = vrot.slane %v2664_v39, 1 }
  0xcc   : > { %v967_v11 = vshll.u32 %v618_v55, 16  ;;  %v1457_v40 = vrot.slane %v618_v55, 1  ;;  %v1455_v52 = vsel %vm1449_vm5, %v1453_v43, %v1454_v9  ;;  %v981_v55 = vshrl.u32 %v2689_v12, 16 }
  0xcd   : > { %v1001_v9 = vshrl.u32 %v2719_v48, 16 }
  0xce   : > { %v969_v62 = vrot.slane %v967_v11, 1  ;;  %v460_v1 = vpop.permute.xlu1 %459  ;;  %v474_v4 = vpop.permute.xlu0 %473  ;;  %v1458_v39 = vsel %vm1449_vm5, %v1456_v49, %v1457_v40 }
  0xcf   : > { %v2735_v6 = vsel %vm606_vm2, %v533_v22, %v460_v1  ;;  %v2738_v15 = vsel %vm606_vm2, %v554_v3, %v474_v4 }
  0xd0   : > { %v977_v60 = vshll.u32 %v2735_v6, 16  ;;  %v970_v16 = vsel %vm940_vm4, %v966_v59, %v969_v62  ;;  %2178 = vmatmul.mubr.msk.bf16.gmra.mxu0 %vm678_vm3, %v2738_v15  ;;  %v1013_v11 = vshll.u32 %v2738_v15, 16  ;;  %v986_v59 = vor.u32 %v985_v51, %v981_v55 }
  0xd1   : > { %2203 = vmatprep.mubr.msk.bf16.mxu1 %vm678_vm3, %v970_v16  ;;  %2233 = vmatprep.mubr.msk.bf16.mxu0 %vm678_vm3, %v1452_v23  ;;  %v1460_v1 = vrot.slane %v2735_v6, 1  ;;  %v1459_v23 = vrot.slane %v2661_v7, 1  ;;  %v1005_v6 = vrot.slane %v1003_v61, 1  ;;  %v1011_v38 = vshrl.u32 %v2738_v15, 16 }
  0xd2   : > { %v979_v18 = vrot.slane %v977_v60, 1  ;;  %v396_v25 = vpop.permute.xlu1 %395  ;;  %v392_v17 = vpop.permute.xlu0 %391  ;;  %v1021_v61 = vshrl.u32 %v2595_v42, 16 }
  0xd3   : > { %v545_v8 = vsel %vm509_vm1, %v2514_v27, %v396_v25  ;;  %v539_v41 = vsel %vm509_vm1, %v2508_v26, %v392_v17  ;;  %v991_v27 = vshrl.u32 %v2706_v5, 16  ;;  %v1461_v7 = vsel %vm1449_vm5, %v1459_v23, %v1460_v1 }
  0xd4   : > { %v980_v14 = vsel %vm940_vm4, %v976_v0, %v979_v18  ;;  %v1015_v0 = vrot.slane %v1013_v11, 1  ;;  %v1462_v18 = vrot.slane %v2689_v12, 1 }
  0xd5   : > { %2204 = vmatmul.mubr.msk.bf16.gmra.mxu1 %vm678_vm3, %v980_v14  ;;  %v996_v21 = vor.u32 %v995_v45, %v991_v27  ;;  %v1033_v14 = vshll.u32 %v2606_v47, 16  ;;  %v1023_v45 = vshll.u32 %v2595_v42, 16 }
  0xd6   : > { %v468_v46 = vpop.permute.xlu1 %467  ;;  %v464_v10 = vpop.permute.xlu0 %463  ;;  %v1016_v40 = vor.u32 %v1015_v0, %v1011_v38 }
  0xd7   : > { %v2759_v20 = vsel %vm606_vm2, %v545_v8, %v468_v46  ;;  %v626_v54 = vsel %vm606_vm2, %v539_v41, %v464_v10  ;;  %v1006_v46 = vor.u32 %v1005_v6, %v1001_v9  ;;  %v1025_v11 = vrot.slane %v1023_v45, 1 }
  0xd8   : > { %v997_v26 = vshll.u32 %v2759_v20, 16  ;;  %v987_v63 = vshll.u32 %v626_v54, 16  ;;  %2234 = vmatmul.mubr.msk.bf16.vlgmr.msra.gmra.mxu0 %vm678_vm3, %v1455_v52  ;;  %v1463_v4 = vrot.slane %v626_v54, 1  ;;  %v1466_v10 = vrot.slane %v2759_v20, 1 }
  0xd9   : > { %2237 = vmatprep.mubr.msk.bf16.mxu0 %vm678_vm3, %v1458_v39  ;;  %v1465_v39 = vrot.slane %v2706_v5, 1  ;;  %v1468_v20 = vrot.slane %v2719_v48, 1  ;;  %v1026_v23 = vor.u32 %v1025_v11, %v1021_v61  ;;  %v1474_v9 = vrot.slane %v2595_v42, 1 }
  0xda   : > { %v999_v56 = vrot.slane %v997_v26, 1  ;;  %v404_v57 = vpop.permute.xlu1 %403  ;;  %v989_v22 = vrot.slane %v987_v63, 1  ;;  %v400_v62 = vpop.permute.xlu0 %399  ;;  %v1464_v12 = vsel %vm1449_vm5, %v1462_v18, %v1463_v4  ;;  %v1035_v63 = vrot.slane %v1033_v14, 1 }
  0xdb   : > { %v557_v2 = vsel %vm509_vm1, %v2528_v29, %v404_v57  ;;  %v551_v60 = vsel %vm509_vm1, %v2521_v28, %v400_v62  ;;  %v1031_v57 = vshrl.u32 %v2606_v47, 16  ;;  %v1467_v5 = vsel %vm1449_vm5, %v1465_v39, %v1466_v10 }
  0xdc   : > { %v1000_v3 = vsel %vm940_vm4, %v996_v21, %v999_v56  ;;  %v990_v16 = vsel %vm940_vm4, %v986_v59, %v989_v22  ;;  %v1053_v62 = vshll.u32 %v2624_v58, 16  ;;  %v1043_v4 = vshll.u32 %v2616_v53, 16 }
  0xdd   : > { %2207 = vmatprep.mubr.msk.bf16.mxu1 %vm678_vm3, %v990_v16  ;;  %v1073_v45 = vshll.u32 %v2652_v19, 16  ;;  %v1063_v10 = vshll.u32 %v2645_v13, 16  ;;  %v1477_v11 = vrot.slane %v2606_v47, 1  ;;  %v1061_v47 = vshrl.u32 %v2645_v13, 16 }
  0xde   : > { %v476_v24 = vpop.permute.xlu1 %475  ;;  %v472_v25 = vpop.permute.xlu0 %471  ;;  %2208 = vmatmul.mubr.msk.bf16.gmra.mxu1 %vm678_vm3, %v1000_v3  ;;  %v1036_v3 = vor.u32 %v1035_v63, %v1031_v57  ;;  %v1480_v57 = vrot.slane %v2616_v53, 1 }
  0xdf   : > { %v2782_v29 = vsel %vm606_vm2, %v557_v2, %v476_v24  ;;  %v634_v28 = vsel %vm606_vm2, %v551_v60, %v472_v25 }
  0xe0   : > { %v1017_v17 = vshll.u32 %v2782_v29, 16  ;;  %v1007_v8 = vshll.u32 %v634_v28, 16  ;;  %2238 = vmatmul.mubr.msk.bf16.gmra.mxu0 %vm678_vm3, %v1461_v7  ;;  %v1469_v54 = vrot.slane %v634_v28, 1  ;;  %v1472_v0 = vrot.slane %v2782_v29, 1 }
  0xe1   : > { %2241 = vmatprep.mubr.msk.bf16.mxu0 %vm678_vm3, %v1464_v12  ;;  %v1055_v28 = vrot.slane %v1053_v62, 1  ;;  %v1045_v29 = vrot.slane %v1043_v4, 1  ;;  %v1051_v12 = vshrl.u32 %v2624_v58, 16  ;;  %v1093_v62 = vshll.u32 %v2682_v50, 16 }
  0xe2   : > { %v1019_v41 = vrot.slane %v1017_v17, 1  ;;  %v412_v43 = vpop.permute.xlu1 %411  ;;  %v1009_v49 = vrot.slane %v1007_v8, 1  ;;  %v408_v51 = vpop.permute.xlu0 %407  ;;  %v1470_v48 = vsel %vm1449_vm5, %v1468_v20, %v1469_v54  ;;  %v1471_v17 = vrot.slane %v2738_v15, 1 }
  0xe3   : > { %v569_v27 = vsel %vm509_vm1, %v2542_v31, %v412_v43  ;;  %v563_v26 = vsel %vm509_vm1, %v2535_v30, %v408_v51  ;;  %v1056_v43 = vor.u32 %v1055_v28, %v1051_v12  ;;  %v1075_v20 = vrot.slane %v1073_v45, 1 }
  0xe4   : > { %v1020_v52 = vsel %vm940_vm4, %v1016_v40, %v1019_v41  ;;  %v1010_v55 = vsel %vm940_vm4, %v1006_v46, %v1009_v49  ;;  %v1473_v15 = vsel %vm1449_vm5, %v1471_v17, %v1472_v0  ;;  %v1041_v40 = vshrl.u32 %v2616_v53, 16 }
  0xe5   : > { %2211 = vmatprep.mubr.msk.bf16.mxu1 %vm678_vm3, %v1010_v55  ;;  %v1083_v4 = vshll.u32 %v2673_v44, 16  ;;  %v1095_v28 = vrot.slane %v1093_v62, 1 }
  0xe6   : > { %v484_v21 = vpop.permute.xlu1 %483  ;;  %v480_v56 = vpop.permute.xlu0 %479  ;;  %2212 = vmatmul.mubr.msk.bf16.gmra.mxu1 %vm678_vm3, %v1020_v52  ;;  %v1046_v51 = vor.u32 %v1045_v29, %v1041_v40 }
  0xe7   : > { %v2806_v31 = vsel %vm606_vm2, %v569_v27, %v484_v21  ;;  %v642_v30 = vsel %vm606_vm2, %v563_v26, %v480_v56 }
  0xe8   : > { %v1037_v59 = vshll.u32 %v2806_v31, 16  ;;  %v1027_v22 = vshll.u32 %v642_v30, 16  ;;  %2242 = vmatmul.mubr.msk.bf16.gmra.mxu0 %vm678_vm3, %v1467_v5  ;;  %v1475_v6 = vrot.slane %v642_v30, 1  ;;  %v1478_v54 = vrot.slane %v2806_v31, 1 }
  0xe9   : > { %2245 = vmatprep.mubr.msk.bf16.mxu0 %vm678_vm3, %v1470_v48  ;;  %v1065_v31 = vrot.slane %v1063_v10, 1 }
  0xea   : > { %v1039_v1 = vrot.slane %v1037_v59, 1  ;;  %v420_v2 = vpop.permute.xlu1 %419  ;;  %v1029_v60 = vrot.slane %v1027_v22, 1  ;;  %v416_v16 = vpop.permute.xlu0 %415  ;;  %v1476_v42 = vsel %vm1449_vm5, %v1474_v9, %v1475_v6  ;;  %v1071_v59 = vshrl.u32 %v2652_v19, 16 }
  0xeb   : > { %v581_v24 = vsel %vm509_vm1, %v2556_v33, %v420_v2  ;;  %v575_v25 = vsel %vm509_vm1, %v2549_v32, %v416_v16  ;;  %v1479_v61 = vsel %vm1449_vm5, %v1477_v11, %v1478_v54  ;;  %v1085_v9 = vrot.slane %v1083_v4, 1 }
  0xec   : > { %v1040_v18 = vsel %vm940_vm4, %v1036_v3, %v1039_v1  ;;  %v1030_v38 = vsel %vm940_vm4, %v1026_v23, %v1029_v60  ;;  %v1076_v48 = vor.u32 %v1075_v20, %v1071_v59  ;;  %v1066_v3 = vor.u32 %v1065_v31, %v1061_v47 }
  0xed   : > { %2215 = vmatprep.mubr.msk.bf16.mxu1 %vm678_vm3, %v1030_v38  ;;  %v1483_v38 = vrot.slane %v2624_v58, 1  ;;  %v1081_v58 = vshrl.u32 %v2673_v44, 16  ;;  %v1495_v54 = vrot.slane %v2682_v50, 1 }
  0xee   : > { %v492_v7 = vpop.permute.xlu1 %491  ;;  %v488_v8 = vpop.permute.xlu0 %487  ;;  %2216 = vmatmul.mubr.msk.bf16.gmra.mxu1 %vm678_vm3, %v1040_v18 }
  0xef   : > { %v2830_v33 = vsel %vm606_vm2, %v581_v24, %v492_v7  ;;  %v650_v32 = vsel %vm606_vm2, %v575_v25, %v488_v8  ;;  %v1486_v7 = vrot.slane %v2645_v13, 1  ;;  %v1091_v8 = vshrl.u32 %v2682_v50, 16 }
  0xf0   : > { %v1057_v14 = vshll.u32 %v2830_v33, 16  ;;  %v1047_v41 = vshll.u32 %v650_v32, 16  ;;  %2246 = vmatmul.mubr.msk.bf16.gmra.mxu0 %vm678_vm3, %v1473_v15  ;;  %v1481_v63 = vrot.slane %v650_v32, 1  ;;  %v1484_v23 = vrot.slane %v2830_v33, 1 }
  0xf1   : > { %2249 = vmatprep.mubr.msk.bf16.mxu0 %vm678_vm3, %v1476_v42  ;;  %v1086_v40 = vor.u32 %v1085_v9, %v1081_v58 }
  0xf2   : > { %v1059_v46 = vrot.slane %v1057_v14, 1  ;;  %v428_v49 = vpop.permute.xlu1 %427  ;;  %v1049_v27 = vrot.slane %v1047_v41, 1  ;;  %v424_v52 = vpop.permute.xlu0 %423  ;;  %v1482_v53 = vsel %vm1449_vm5, %v1480_v57, %v1481_v63  ;;  %v1485_v12 = vsel %vm1449_vm5, %v1483_v38, %v1484_v23 }
  0xf3   : > { %v593_v26 = vsel %vm509_vm1, %v2570_v35, %v428_v49  ;;  %v587_v39 = vsel %vm509_vm1, %v2563_v34, %v424_v52  ;;  %v1096_v14 = vor.u32 %v1095_v28, %v1091_v8  ;;  %v1489_v49 = vrot.slane %v2652_v19, 1 }
  0xf4   : > { %v1060_v55 = vsel %vm940_vm4, %v1056_v43, %v1059_v46  ;;  %v1050_v21 = vsel %vm940_vm4, %v1046_v51, %v1049_v27  ;;  %v1492_v51 = vrot.slane %v2673_v44, 1 }
  0xf5   : > { %2219 = vmatprep.mubr.msk.bf16.mxu1 %vm678_vm3, %v1050_v21 }
  0xf6   : > { %v500_v56 = vpop.permute.xlu1 %499  ;;  %v496_v30 = vpop.permute.xlu0 %495  ;;  %2220 = vmatmul.mubr.msk.bf16.gmra.mxu1 %vm678_vm3, %v1060_v55 }
  0xf7   : > { %v662_v35 = vsel %vm606_vm2, %v593_v26, %v500_v56  ;;  %v658_v34 = vsel %vm606_vm2, %v587_v39, %v496_v30 }
  0xf8   : > { %v1077_v5 = vshll.u32 %v662_v35, 16  ;;  %v1067_v22 = vshll.u32 %v658_v34, 16  ;;  %2250 = vmatmul.mubr.msk.bf16.gmra.mxu0 %vm678_vm3, %v1479_v61  ;;  %v1487_v18 = vrot.slane %v658_v34, 1  ;;  %v1490_v42 = vrot.slane %v662_v35, 1 }
  0xf9   : > { %2253 = vmatprep.mubr.msk.bf16.mxu0 %vm678_vm3, %v1482_v53 }
  0xfa   : > { %v1079_v1 = vrot.slane %v1077_v5, 1  ;;  %v436_v2 = vpop.permute.xlu1 %435  ;;  %v1069_v60 = vrot.slane %v1067_v22, 1  ;;  %v432_v16 = vpop.permute.xlu0 %431  ;;  %v1488_v13 = vsel %vm1449_vm5, %v1486_v7, %v1487_v18  ;;  %v1491_v10 = vsel %vm1449_vm5, %v1489_v49, %v1490_v42 }
  0xfb   : > { %v605_v0 = vsel %vm509_vm1, %v2584_v37, %v436_v2  ;;  %v599_v6 = vsel %vm509_vm1, %v2577_v36, %v432_v16 }
  0xfc   : > { %v1080_v24 = vsel %vm940_vm4, %v1076_v48, %v1079_v1  ;;  %v1070_v25 = vsel %vm940_vm4, %v1066_v3, %v1069_v60 }
  0xfd   : > { %2223 = vmatprep.mubr.msk.bf16.mxu1 %vm678_vm3, %v1070_v25 }
  0xfe   : > { %v508_v17 = vpop.permute.xlu1 %507  ;;  %v504_v29 = vpop.permute.xlu0 %503  ;;  %2224 = vmatmul.mubr.msk.bf16.gmra.mxu1 %vm678_vm3, %v1080_v24 }
  0xff   : > { %v670_v37 = vsel %vm606_vm2, %v605_v0, %v508_v17  ;;  %v666_v36 = vsel %vm606_vm2, %v599_v6, %v504_v29 }
 0x100   : > { %v1097_v33 = vshll.u32 %v670_v37, 16  ;;  %v1087_v32 = vshll.u32 %v666_v36, 16  ;;  %2254 = vmatmul.mubr.msk.bf16.gmra.mxu0 %vm678_vm3, %v1485_v12  ;;  %v1493_v45 = vrot.slane %v666_v36, 1  ;;  %v1496_v52 = vrot.slane %v670_v37, 1 }
 0x101   : > { %2257 = vmatprep.mubr.msk.bf16.mxu0 %vm678_vm3, %v1488_v13 }
 0x102   : > { %v1099_v15 = vrot.slane %v1097_v33, 1  ;;  %v1089_v41 = vrot.slane %v1087_v32, 1  ;;  %v1494_v27 = vsel %vm1449_vm5, %v1492_v51, %v1493_v45  ;;  %v1497_v26 = vsel %vm1449_vm5, %v1495_v54, %v1496_v52 }
 0x104   : > { %v1100_v43 = vsel %vm940_vm4, %v1096_v14, %v1099_v15  ;;  %v1090_v46 = vsel %vm940_vm4, %v1086_v40, %v1089_v41 }
 0x105   : > { %2227 = vmatprep.mubr.msk.bf16.mxu1 %vm678_vm3, %v1090_v46 }
 0x106   : > { %2228 = vmatmul.mubr.msk.bf16.gmra.mxu1 %vm678_vm3, %v1100_v43 }
 0x108   : > { %2258 = vmatmul.mubr.msk.bf16.gmra.mxu0 %vm678_vm3, %v1491_v10 }
 0x109   : > { %2261 = vmatprep.mubr.msk.bf16.mxu0 %vm678_vm3, %v1494_v27 }
 0x110   : > { %2262 = vmatmul.mubr.msk.bf16.gmra.mxu0 %vm678_vm3, %v1497_v26 }
 0x149   : > { %v2896_v19 = vpop.f32.mrf.mxu1 }
 0x14b   : > { %v2898_v44 = vpop.f32.mrf.mxu1 }
 0x14d   : > { %v2900_v55 = vpop.f32.mrf.mxu1 }
 0x14f   : > { %v2902_v63 = vpop.f32.mrf.mxu1 }
 0x154   : > { %v2904_v39 = vpop.f32.mrf.mxu1 }
 0x156   : > { %v2906_v21 = vpop.f32.mrf.mxu1 }
 0x158   : > { %v2908_v11 = vpop.f32.mrf.mxu1 }
 0x159   : > { %v2167_v20 = vpop.f32.mrf.mxu0 }
 0x15a   : > { %v2910_v50 = vpop.f32.mrf.mxu1 }
 0x15b   : > { %v749_v56 = vpop.f32.mrf.mxu0 }
 0x15d   : > { %v2168_v31 = vpop.f32.mrf.mxu0 }
 0x15f   : > { %v752_v35 = vpop.f32.mrf.mxu0 }
 0x164   : > { %v2912_v57 = vpop.f32.mrf.mxu1 }
 0x166   : > { %v2914_v30 = vpop.f32.mrf.mxu1 }
 0x168   : > { %v2916_v59 = vpop.f32.mrf.mxu1 }
 0x169   : > { %v2171_v34 = vpop.f32.mrf.mxu0 }
 0x16a   : > { %v2918_v5 = vpop.f32.mrf.mxu1 }
 0x16b   : > { %v765_v61 = vpop.f32.mrf.mxu0 }
 0x16d   : > { %v2172_v22 = vpop.f32.mrf.mxu0 }
 0x16f   : > { %v768_v48 = vpop.f32.mrf.mxu0 }
 0x174   : > { %v2920_v47 = vpop.f32.mrf.mxu1 }
 0x176   : > { %v2922_v53 = vpop.f32.mrf.mxu1 }
 0x178   : > { %v2924_v62 = vpop.f32.mrf.mxu1 }
 0x17a   : > { %v2926_v2 = vpop.f32.mrf.mxu1 }
 0x180   : > { %v2175_v1 = vpop.f32.mrf.mxu0 }
 0x182   : > { %v2928_v3 = vpop.f32.mrf.mxu0 }
 0x184   : > { %v2930_v60 = vpop.f32.mrf.mxu0 }
 0x185   : > { %v2201_v4 = vpop.f32.mrf.mxu1 }
 0x186   : > { %v2932_v23 = vpop.f32.mrf.mxu0  ;;  %v1323_v7 = vadd.f32 %v2201_v4, %v2167_v20 }
 0x187   : > { %v1194_v16 = vpop.f32.mrf.mxu1 }
 0x188   : > { %v1321_v37 = vadd.f32 %v1194_v16, %v749_v56 }
 0x189   : > { %v2202_v0 = vpop.f32.mrf.mxu1 }
 0x18a   : > { %v1324_v12 = vadd.f32 %v2202_v0, %v2168_v31 }
 0x18b   : > { %v1197_v18 = vpop.f32.mrf.mxu1 }
 0x18c   : > { %v1322_v13 = vadd.f32 %v1197_v18, %v752_v35 }
 0x190   : > { %v2934_v24 = vpop.f32.mrf.mxu0 }
 0x192   : > { %v2936_v6 = vpop.f32.mrf.mxu0 }
 0x194   : > { %v2938_v25 = vpop.f32.mrf.mxu0 }
 0x195   : > { %v2205_v38 = vpop.f32.mrf.mxu1 }
 0x196   : > { %v2941_v28 = vpop.f32.mrf.mxu0  ;;  %v1327_v41 = vadd.f32 %v2205_v38, %v2171_v34 }
 0x197   : > { %v1210_v17 = vpop.f32.mrf.mxu1 }
 0x198   : > { %v2235_v9 = vpop.f32.mrf.mxu0  ;;  %v1325_v27 = vadd.f32 %v1210_v17, %v765_v61 }
 0x199   : > { %v2206_v29 = vpop.f32.mrf.mxu1  ;;  %v1720_v8 = vadd.f32 %v2235_v9, %v1323_v7 }
 0x19a   : > { %v1591_v36 = vpop.f32.mrf.mxu0  ;;  %v1328_v20 = vadd.f32 %v2206_v29, %v2172_v22 }
 0x19b   : > { %v1213_v33 = vpop.f32.mrf.mxu1  ;;  %1752 = vst [vmem:[%s2946_s29 + $0x10] sm:$0xff] %v1720_v8  ;;  %v1718_v58 = vadd.f32 %v1591_v36, %v1321_v37  ;;  %v1853_v26 = vmul.f32 %v1720_v8, %v1720_v8 }
 0x19c   : > { %v2236_v32 = vpop.f32.mrf.mxu0  ;;  %v1326_v7 = vadd.f32 %v1213_v33, %v768_v48 }
 0x19d   : > { %1750 = vst [vmem:[%s2946_s29] sm:$0xff] %v1718_v58  ;;  %v1721_v14 = vadd.f32 %v2236_v32, %v1324_v12  ;;  %v1851_v46 = vmul.f32 %v1718_v58, %v1718_v58 }
 0x19e   : > { %v2209_v15 = vpop.f32.mrf.mxu1  ;;  %v1594_v40 = vpop.f32.mrf.mxu0 }
 0x19f   : > { %1753 = vst [vmem:[%s2946_s29 + $0x18] sm:$0xff] %v1721_v14  ;;  %v1719_v42 = vadd.f32 %v1594_v40, %v1322_v13  ;;  %v1854_v16 = vmul.f32 %v1721_v14, %v1721_v14  ;;  %v1331_v9 = vadd.f32 %v2209_v15, %v2175_v1 }
 0x1a0   : > { %v1226_v43 = vpop.f32.mrf.mxu1  ;;  %v2239_v45 = vpop.f32.mrf.mxu0 }
 0x1a1   : > { %1751 = vst [vmem:[%s2946_s29 + $0x8] sm:$0xff] %v1719_v42  ;;  %v1814_v49 = vadd.f32 %v1719_v42, %v1718_v58  ;;  %v1852_v51 = vmul.f32 %v1719_v42, %v1719_v42  ;;  %v1724_v10 = vadd.f32 %v2239_v45, %v1327_v41  ;;  %v1329_v58 = vadd.f32 %v1226_v43, %v2928_v3 }
 0x1a2   : > { %v2210_v52 = vpop.f32.mrf.mxu1  ;;  %v1607_v54 = vpop.f32.mrf.mxu0 }
 0x1a3   : > { %v1815_v56 = vadd.f32 %v1814_v49, %v1720_v8  ;;  %v1883_v31 = vadd.f32 %v1852_v51, %v1851_v46  ;;  %1756 = vst [vmem:[%s2946_s29 + $0x30] sm:$0xff] %v1724_v10  ;;  %v1722_v35 = vadd.f32 %v1607_v54, %v1325_v27  ;;  %v1332_v1 = vadd.f32 %v2210_v52, %v2930_v60 }
 0x1a4   : > { %v1229_v34 = vpop.f32.mrf.mxu1  ;;  %v2240_v4 = vpop.f32.mrf.mxu0  ;;  %v1857_v41 = vmul.f32 %v1724_v10, %v1724_v10 }
 0x1a5   : > { %v1884_v0 = vadd.f32 %v1883_v31, %v1853_v26  ;;  %v1816_v18 = vadd.f32 %v1815_v56, %v1721_v14  ;;  %v1725_v38 = vadd.f32 %v2240_v4, %v1328_v20  ;;  %1754 = vst [vmem:[%s2946_s29 + $0x20] sm:$0xff] %v1722_v35  ;;  %v1855_v22 = vmul.f32 %v1722_v35, %v1722_v35 }
 0x1a6   : > { %v2213_v61 = vpop.f32.mrf.mxu1  ;;  %v1610_v17 = vpop.f32.mrf.mxu0  ;;  %v1330_v3 = vadd.f32 %v1229_v34, %v2932_v23 }
 0x1a7   : > { %v1817_v37 = vadd.f32 %v1816_v18, %v1722_v35  ;;  %v1885_v29 = vadd.f32 %v1884_v0, %v1854_v16  ;;  %1757 = vst [vmem:[%s2946_s29 + $0x38] sm:$0xff] %v1725_v38  ;;  %v1723_v8 = vadd.f32 %v1610_v17, %v1326_v7  ;;  %v1858_v51 = vmul.f32 %v1725_v38, %v1725_v38 }
 0x1a8   : > { %v1242_v36 = vpop.f32.mrf.mxu1  ;;  %v2243_v12 = vpop.f32.mrf.mxu0  ;;  %v1335_v60 = vadd.f32 %v2213_v61, %v2934_v24 }
 0x1a9   : > { %v1886_v32 = vadd.f32 %v1885_v29, %v1855_v22  ;;  %v1728_v13 = vadd.f32 %v2243_v12, %v1331_v9  ;;  %1755 = vst [vmem:[%s2946_s29 + $0x28] sm:$0xff] %v1723_v8  ;;  %v1818_v14 = vadd.f32 %v1817_v37, %v1723_v8  ;;  %v1856_v48 = vmul.f32 %v1723_v8, %v1723_v8 }
 0x1aa   : > { %v2214_v33 = vpop.f32.mrf.mxu1  ;;  %v1623_v40 = vpop.f32.mrf.mxu0  ;;  %v1333_v23 = vadd.f32 %v1242_v36, %v2936_v6 }
 0x1ab   : > { %1760 = vst [vmem:[%s2946_s29 + $0x50] sm:$0xff] %v1728_v13  ;;  %v1726_v15 = vadd.f32 %v1623_v40, %v1329_v58  ;;  %v1819_v42 = vadd.f32 %v1818_v14, %v1724_v10  ;;  %v1887_v45 = vadd.f32 %v1886_v32, %v1856_v48  ;;  %v1336_v24 = vadd.f32 %v2214_v33, %v2938_v25 }
 0x1ac   : > { %v1245_v46 = vpop.f32.mrf.mxu1  ;;  %v2244_v49 = vpop.f32.mrf.mxu0  ;;  %v1861_v17 = vmul.f32 %v1728_v13, %v1728_v13 }
 0x1ad   : > { %1758 = vst [vmem:[%s2946_s29 + $0x40] sm:$0xff] %v1726_v15  ;;  %v1729_v43 = vadd.f32 %v2244_v49, %v1332_v1  ;;  %v1888_v27 = vadd.f32 %v1887_v45, %v1857_v41  ;;  %v1820_v54 = vadd.f32 %v1819_v42, %v1725_v38  ;;  %v1859_v10 = vmul.f32 %v1726_v15, %v1726_v15 }
 0x1ae   : > { %v2217_v26 = vpop.f32.mrf.mxu1  ;;  %v1626_v20 = vpop.f32.mrf.mxu0  ;;  %v1334_v6 = vadd.f32 %v1245_v46, %v2941_v28 }
 0x1af   : > { %1761 = vst [vmem:[%s2946_s29 + $0x58] sm:$0xff] %v1729_v43  ;;  %v1727_v52 = vadd.f32 %v1626_v20, %v1330_v3  ;;  %v1821_v56 = vadd.f32 %v1820_v54, %v1726_v15  ;;  %v1889_v31 = vadd.f32 %v1888_v27, %v1858_v51  ;;  %v1862_v36 = vmul.f32 %v1729_v43, %v1729_v43 }
 0x1b0   : > { %v1258_v35 = vpop.f32.mrf.mxu1  ;;  %v2247_v4 = vpop.f32.mrf.mxu0  ;;  %v1339_v25 = vadd.f32 %v2217_v26, %v2896_v19 }
 0x1b1   : > { %1759 = vst [vmem:[%s2946_s29 + $0x48] sm:$0xff] %v1727_v52  ;;  %v1860_v34 = vmul.f32 %v1727_v52, %v1727_v52  ;;  %v1732_v16 = vadd.f32 %v2247_v4, %v1335_v60  ;;  %v1890_v0 = vadd.f32 %v1889_v31, %v1859_v10  ;;  %v1822_v18 = vadd.f32 %v1821_v56, %v1727_v52 }
 0x1b2   : > { %v2218_v38 = vpop.f32.mrf.mxu1  ;;  %v1639_v7 = vpop.f32.mrf.mxu0  ;;  %v1337_v28 = vadd.f32 %v1258_v35, %v2898_v44 }
 0x1b3   : > { %1764 = vst [vmem:[%s2946_s29 + $0x70] sm:$0xff] %v1732_v16  ;;  %v1730_v61 = vadd.f32 %v1639_v7, %v1333_v23  ;;  %v1823_v9 = vadd.f32 %v1822_v18, %v1728_v13  ;;  %v1891_v37 = vadd.f32 %v1890_v0, %v1860_v34  ;;  %v1340_v19 = vadd.f32 %v2218_v38, %v2900_v55 }
 0x1b4   : > { %v1261_v22 = vpop.f32.mrf.mxu1  ;;  %v2248_v29 = vpop.f32.mrf.mxu0  ;;  %v1865_v51 = vmul.f32 %v1732_v16, %v1732_v16 }
 0x1b5   : > { %1762 = vst [vmem:[%s2946_s29 + $0x60] sm:$0xff] %v1730_v61  ;;  %v1733_v8 = vadd.f32 %v2248_v29, %v1336_v24  ;;  %v1892_v12 = vadd.f32 %v1891_v37, %v1861_v17  ;;  %v1824_v58 = vadd.f32 %v1823_v9, %v1729_v43  ;;  %v1863_v13 = vmul.f32 %v1730_v61, %v1730_v61 }
 0x1b6   : > { %v2221_v32 = vpop.f32.mrf.mxu1  ;;  %v1642_v14 = vpop.f32.mrf.mxu0  ;;  %v1338_v44 = vadd.f32 %v1261_v22, %v2902_v63 }
 0x1b7   : > { %1765 = vst [vmem:[%s2946_s29 + $0x78] sm:$0xff] %v1733_v8  ;;  %v1731_v48 = vadd.f32 %v1642_v14, %v1334_v6  ;;  %v1825_v33 = vadd.f32 %v1824_v58, %v1730_v61  ;;  %v1893_v40 = vadd.f32 %v1892_v12, %v1862_v36  ;;  %v1866_v52 = vmul.f32 %v1733_v8, %v1733_v8 }
 0x1b8   : > { %v1274_v1 = vpop.f32.mrf.mxu1  ;;  %v2251_v15 = vpop.f32.mrf.mxu0  ;;  %v1343_v55 = vadd.f32 %v2221_v32, %v2904_v39 }
 0x1b9   : > { %1763 = vst [vmem:[%s2946_s29 + $0x68] sm:$0xff] %v1731_v48  ;;  %v1864_v41 = vmul.f32 %v1731_v48, %v1731_v48  ;;  %v1736_v42 = vadd.f32 %v2251_v15, %v1339_v25  ;;  %v1894_v45 = vadd.f32 %v1893_v40, %v1863_v13  ;;  %v1826_v46 = vadd.f32 %v1825_v33, %v1731_v48 }
 0x1ba   : > { %v2222_v49 = vpop.f32.mrf.mxu1  ;;  %v1655_v3 = vpop.f32.mrf.mxu0  ;;  %v1341_v63 = vadd.f32 %v1274_v1, %v2906_v21 }
 0x1bb   : > { %1768 = vst [vmem:[%s2946_s29 + $0x90] sm:$0xff] %v1736_v42  ;;  %v1734_v43 = vadd.f32 %v1655_v3, %v1337_v28  ;;  %v1827_v27 = vadd.f32 %v1826_v46, %v1732_v16  ;;  %v1895_v54 = vadd.f32 %v1894_v45, %v1864_v41  ;;  %v1344_v39 = vadd.f32 %v2222_v49, %v2908_v11 }
 0x1bc   : > { %v1277_v26 = vpop.f32.mrf.mxu1  ;;  %v2252_v20 = vpop.f32.mrf.mxu0  ;;  %v1869_v22 = vmul.f32 %v1736_v42, %v1736_v42 }
 0x1bd   : > { %1766 = vst [vmem:[%s2946_s29 + $0x80] sm:$0xff] %v1734_v43  ;;  %v1737_v60 = vadd.f32 %v2252_v20, %v1340_v19  ;;  %v1896_v56 = vadd.f32 %v1895_v54, %v1865_v51  ;;  %v1828_v10 = vadd.f32 %v1827_v27, %v1733_v8  ;;  %v1867_v34 = vmul.f32 %v1734_v43, %v1734_v43 }
 0x1be   : > { %v2225_v31 = vpop.f32.mrf.mxu1  ;;  %v1658_v35 = vpop.f32.mrf.mxu0  ;;  %v1342_v21 = vadd.f32 %v1277_v26, %v2910_v50 }
 0x1bf   : > { %1769 = vst [vmem:[%s2946_s29 + $0x98] sm:$0xff] %v1737_v60  ;;  %v1735_v4 = vadd.f32 %v1658_v35, %v1338_v44  ;;  %v1829_v23 = vadd.f32 %v1828_v10, %v1734_v43  ;;  %v1897_v16 = vadd.f32 %v1896_v56, %v1866_v52  ;;  %v1870_v58 = vmul.f32 %v1737_v60, %v1737_v60 }
 0x1c0   : > { %v1290_v0 = vpop.f32.mrf.mxu1  ;;  %v2255_v18 = vpop.f32.mrf.mxu0  ;;  %v1347_v11 = vadd.f32 %v2225_v31, %v2912_v57 }
 0x1c1   : > { %1767 = vst [vmem:[%s2946_s29 + $0x88] sm:$0xff] %v1735_v4  ;;  %v1868_v38 = vmul.f32 %v1735_v4, %v1735_v4  ;;  %v1740_v7 = vadd.f32 %v2255_v18, %v1343_v55  ;;  %v1898_v24 = vadd.f32 %v1897_v16, %v1867_v34  ;;  %v1830_v61 = vadd.f32 %v1829_v23, %v1735_v4 }
 0x1c2   : > { %v2226_v17 = vpop.f32.mrf.mxu1  ;;  %v1671_v9 = vpop.f32.mrf.mxu0  ;;  %v1345_v28 = vadd.f32 %v1290_v0, %v2914_v30 }
 0x1c3   : > { %1772 = vst [vmem:[%s2946_s29 + $0xb0] sm:$0xff] %v1740_v7  ;;  %v1738_v37 = vadd.f32 %v1671_v9, %v1341_v63  ;;  %v1831_v29 = vadd.f32 %v1830_v61, %v1736_v42  ;;  %v1899_v6 = vadd.f32 %v1898_v24, %v1868_v38  ;;  %v1348_v3 = vadd.f32 %v2226_v17, %v2916_v59 }
 0x1c4   : > { %v1293_v8 = vpop.f32.mrf.mxu1  ;;  %v2256_v36 = vpop.f32.mrf.mxu0  ;;  %v1873_v19 = vmul.f32 %v1740_v7, %v1740_v7 }
 0x1c5   : > { %1770 = vst [vmem:[%s2946_s29 + $0xa0] sm:$0xff] %v1738_v37  ;;  %v1741_v12 = vadd.f32 %v2256_v36, %v1344_v39  ;;  %v1900_v32 = vadd.f32 %v1899_v6, %v1869_v22  ;;  %v1832_v14 = vadd.f32 %v1831_v29, %v1737_v60  ;;  %v1871_v40 = vmul.f32 %v1738_v37, %v1738_v37 }
 0x1c6   : > { %v2229_v25 = vpop.f32.mrf.mxu1  ;;  %v1674_v48 = vpop.f32.mrf.mxu0  ;;  %v1346_v54 = vadd.f32 %v1293_v8, %v2918_v5 }
 0x1c7   : > { %1773 = vst [vmem:[%s2946_s29 + $0xb8] sm:$0xff] %v1741_v12  ;;  %v1739_v33 = vadd.f32 %v1674_v48, %v1342_v21  ;;  %v1833_v13 = vadd.f32 %v1832_v14, %v1738_v37  ;;  %v1901_v1 = vadd.f32 %v1900_v32, %v1870_v58  ;;  %v1874_v26 = vmul.f32 %v1741_v12, %v1741_v12 }
 0x1c8   : > { %v2259_v15 = vpop.f32.mrf.mxu0  ;;  %v1306_v46 = vpop.f32.mrf.mxu1  ;;  %v1351_v56 = vadd.f32 %v2229_v25, %v2920_v47 }
 0x1c9   : > { %1771 = vst [vmem:[%s2946_s29 + $0xa8] sm:$0xff] %v1739_v33  ;;  %v1872_v50 = vmul.f32 %v1739_v33, %v1739_v33  ;;  %v1744_v41 = vadd.f32 %v2259_v15, %v1347_v11  ;;  %v1902_v42 = vadd.f32 %v1901_v1, %v1871_v40  ;;  %v1834_v45 = vadd.f32 %v1833_v13, %v1739_v33 }
 0x1ca   : > { %v1687_v49 = vpop.f32.mrf.mxu0  ;;  %v2230_v44 = vpop.f32.mrf.mxu1  ;;  %v1349_v4 = vadd.f32 %v1306_v46, %v2922_v53 }
 0x1cb   : > { %1776 = vst [vmem:[%s2946_s29 + $0xd0] sm:$0xff] %v1744_v41  ;;  %v1742_v57 = vadd.f32 %v1687_v49, %v1345_v28  ;;  %v1835_v43 = vadd.f32 %v1834_v45, %v1740_v7  ;;  %v1903_v51 = vadd.f32 %v1902_v42, %v1872_v50  ;;  %v1352_v47 = vadd.f32 %v2230_v44, %v2924_v62 }
 0x1cc   : > { %v2260_v27 = vpop.f32.mrf.mxu0  ;;  %v1309_v16 = vpop.f32.mrf.mxu1  ;;  %v1877_v38 = vmul.f32 %v1744_v41, %v1744_v41 }
 0x1cd   : > { %1774 = vst [vmem:[%s2946_s29 + $0xc0] sm:$0xff] %v1742_v57  ;;  %v1745_v30 = vadd.f32 %v2260_v27, %v1348_v3  ;;  %v1904_v20 = vadd.f32 %v1903_v51, %v1873_v19  ;;  %v1836_v60 = vadd.f32 %v1835_v43, %v1741_v12  ;;  %v1875_v31 = vmul.f32 %v1742_v57, %v1742_v57 }
 0x1ce   : > { %v1690_v52 = vpop.f32.mrf.mxu0  ;;  %v1350_v53 = vadd.f32 %v1309_v16, %v2926_v2 }
 0x1cf   : > { %1777 = vst [vmem:[%s2946_s29 + $0xd8] sm:$0xff] %v1745_v30  ;;  %v1743_v59 = vadd.f32 %v1690_v52, %v1346_v54  ;;  %v1837_v10 = vadd.f32 %v1836_v60, %v1742_v57  ;;  %v1905_v35 = vadd.f32 %v1904_v20, %v1874_v26  ;;  %v1878_v9 = vmul.f32 %v1745_v30, %v1745_v30 }
 0x1d0   : > { %v2263_v55 = vpop.f32.mrf.mxu0 }
 0x1d1   : > { %1775 = vst [vmem:[%s2946_s29 + $0xc8] sm:$0xff] %v1743_v59  ;;  %v1876_v5 = vmul.f32 %v1743_v59, %v1743_v59  ;;  %v1748_v23 = vadd.f32 %v2263_v55, %v1351_v56  ;;  %v1906_v34 = vadd.f32 %v1905_v35, %v1875_v31  ;;  %v1838_v0 = vadd.f32 %v1837_v10, %v1743_v59 }
 0x1d2   : > { %v1703_v18 = vpop.f32.mrf.mxu0 }
 0x1d3   : > { %1780 = vst [vmem:[%s2946_s29 + $0xf0] sm:$0xff] %v1748_v23  ;;  %v1746_v63 = vadd.f32 %v1703_v18, %v1349_v4  ;;  %v1839_v7 = vadd.f32 %v1838_v0, %v1744_v41  ;;  %v1907_v24 = vadd.f32 %v1906_v34, %v1876_v5  ;;  %v1881_v58 = vmul.f32 %v1748_v23, %v1748_v23 }
 0x1d4   : > { %v2264_v61 = vpop.f32.mrf.mxu0 }
 0x1d5   : > { %1778 = vst [vmem:[%s2946_s29 + $0xe0] sm:$0xff] %v1746_v63  ;;  %v1749_v17 = vadd.f32 %v2264_v61, %v1352_v47  ;;  %v1908_v39 = vadd.f32 %v1907_v24, %v1877_v38  ;;  %v1840_v37 = vadd.f32 %v1839_v7, %v1745_v30  ;;  %v1879_v8 = vmul.f32 %v1746_v63, %v1746_v63 }
 0x1d6   : > { %v1706_v22 = vpop.f32.mrf.mxu0 }
 0x1d7   : > { %1781 = vst [vmem:[%s2946_s29 + $0xf8] sm:$0xff] %v1749_v17  ;;  %v1747_v29 = vadd.f32 %v1706_v22, %v1350_v53  ;;  %v1841_v6 = vadd.f32 %v1840_v37, %v1746_v63  ;;  %v1909_v62 = vadd.f32 %v1908_v39, %v1878_v9  ;;  %v1882_v2 = vmul.f32 %v1749_v17, %v1749_v17 }
 0x1d9   : > { %1779 = vst [vmem:[%s2946_s29 + $0xe8] sm:$0xff] %v1747_v29  ;;  %v1880_v36 = vmul.f32 %v1747_v29, %v1747_v29  ;;  %v1910_v21 = vadd.f32 %v1909_v62, %v1879_v8  ;;  %v1842_v12 = vadd.f32 %v1841_v6, %v1747_v29 }
 0x1db   : > { %v1843_v32 = vadd.f32 %v1842_v12, %v1748_v23  ;;  %v1911_v14 = vadd.f32 %v1910_v21, %v1880_v36 }
 0x1dd   : > { %v1844_v25 = vadd.f32 %v1843_v32, %v1749_v17  ;;  %v1912_v48 = vadd.f32 %v1911_v14, %v1881_v58 }
 0x1df   : > { %v1845_v11 = vrot.slane %v1844_v25, 4  ;;  %v1913_v33 = vadd.f32 %v1912_v48, %v1882_v2 }
 0x1e1   : > { %v1846_v13 = vadd.f32 %v1845_v11, %v1844_v25  ;;  %v1914_v40 = vrot.slane %v1913_v33, 4 }
 0x1e3   : > { %v1847_v1 = vrot.slane %v1846_v13, 2  ;;  %v1915_v15 = vadd.f32 %v1914_v40, %v1913_v33 }
 0x1e5   : > { %v1848_v28 = vadd.f32 %v1847_v1, %v1846_v13  ;;  %v1916_v50 = vrot.slane %v1915_v15, 2 }
 0x1e7   : > { %v1849_v41 = vrot.slane %v1848_v28, 1  ;;  %v1917_v42 = vadd.f32 %v1916_v50, %v1915_v15 }
 0x1e9   : > { %v1918_v45 = vrot.slane %v1917_v42, 1  ;;  %v1850_v46 = vadd.f32 %v1849_v41, %v1848_v28 }
 0x1eb   : > { %v1919_v49 = vadd.f32 %v1918_v45, %v1917_v42 }
 0x1ed   : > { %v1921_v3 = vsel %vm1920_vm6, %v1850_v46, %v1919_v49 }
 0x1ee   : > { %1922 = vst [vmem:[%s181_s6] sm:$0x3] %v1921_v3 }
 0x1ef PF: > { %s14_s12 = sadd.s32 1, %s2327_s12  }
 0x1f0   : > { %p11_p4 = scmp.ge.s32.totalorder %s14_s12, 4  }
 0x1f2   :  { %13 = sbr.rel (!%p11_p4) target bundleno = 1 (0x1), region = 72 }

// kernel: resnet18_basic_block.4
= control target key start
LH: loop header
LB: loop body
LE: loop exit
PB: predicated region body
PF: predicated region fallthrough
CT: control target
= control target key end

     0   :  { %s4511_s18 = smov 0   ;;  %s5887_s0 = inlined_call_operand.vmem [shape: f32[2,256,128], index: 0, kind: input, shape index: {}]   ;;  %s5888_s1 = inlined_call_operand.vmem [shape: f32[1,128], index: 1, kind: input, shape index: {}]   ;;  %s5889_s2 = inlined_call_operand.vmem [shape: f32[1,128], index: 2, kind: input, shape index: {}]   ;;  %s5890_s3 = inlined_call_operand.vmem [shape: bf16[3,384,128], index: 3, kind: input, shape index: {}]   ;;  %s5891_s4 = inlined_call_operand.vmem [shape: f32[2,256,128], index: 4, kind: output, shape index: {0}]   ;;  %s5892_s5 = inlined_call_operand.vmem [shape: f32[2,2,128], index: 5, kind: output, shape index: {1}]  }
   0x1 LB: > { %s3489_s19 = sadd.s32 4294967295, %s4478_s18   ;;  %p3493_p0 = scmp.ge.s32.totalorder %s4478_s18, 1  ;;  %s4478_s18 = sphi %s4511_s18, %s16_s18  }
   0x2   : > { %p190_p1 = scmp.lt.s32.totalorder %s4478_s18, 3 }
   0x4   : > { %p191_p2 = pnand %p3493_p0, %p190_p1 }
   0x6   : > { %194 = sbr.rel (%p191_p2) target bundleno = 567 (0x237), region = 36 }
   0xb   : > { %v4350_v0 = vld [vmem:[%s5890_s3 + $0x78] sm:$0xff]   ;;  %v4352_v2 = vld [vmem:[%s5890_s3 + $0x70] sm:$0xff]   ;;  %p4530_p3 = scmp.lt.s32.totalorder %s3489_s19, 1  ;;  %v4480_v3 = vmov 0   ;;  %v4354_v5 = vld [vmem:[%s5890_s3 + $0x68] sm:$0xff]   ;;  %vm853_vm0 = vcmask 1043456  }
   0xc   : > { %v4351_v1 = vld [vmem:[%s5890_s3 + $0x38] sm:$0xff]   ;;  %3773 = vmatprep.subr.bf16.mxu0 %v4350_v0  ;;  %4325 = vmatprep.subr.bf16.mxu1 %v4350_v0  ;;  %382 = vst [vmem:[#allocation2 + $0xc] sm:$0xf] %v4480_v3  ;;  %383 = vst [vmem:[#allocation2 + $0x10] sm:$0xf] %v4480_v3  ;;  %v4353_v4 = vld [vmem:[%s5890_s3 + $0x30] sm:$0xff]  }
   0xd   : > { %379 = vst [vmem:[#allocation2] sm:$0xf] %v4480_v3  ;;  %380 = vst [vmem:[#allocation2 + $0x4] sm:$0xf] %v4480_v3  ;;  %3774 = vmatpush3.bf16.msra.mxu0 %v4351_v1  ;;  %4333 = vmatpush3.bf16.msra.mxu1 %v4351_v1  ;;  %s5935_s19 = smov (!%p4530_p3, %s3489_s19), 1  ;;  %v4355_v6 = vld [vmem:[%s5890_s3 + $0x28] sm:$0xff]  }
   0xe   : > { %381 = vst [vmem:[#allocation2 + $0x8] sm:$0x1] %v4480_v3  ;;  %384 = vst [vmem:[#allocation2 + $0x14] sm:$0x1] %v4480_v3  ;;  %3775 = vmatprep.subr.bf16.mxu0 %v4352_v2  ;;  %4326 = vmatprep.subr.bf16.mxu1 %v4352_v2  ;;  %v4356_v7 = vld [vmem:[%s5890_s3 + $0x60] sm:$0xff]   ;;  %s3739_s10 = sshll.u32 %s5935_s19, 8 }
   0xf   : > { %385 = vst [vmem:[#allocation2 + $0x18] sm:$0xf] %v4480_v3  ;;  %386 = vst [vmem:[#allocation2 + $0x1c] sm:$0xf] %v4480_v3  ;;  %v4357_v8 = vld [vmem:[%s5890_s3 + $0x20] sm:$0xff]   ;;  %v4358_v9 = vld [vmem:[%s5890_s3 + $0x58] sm:$0xff]   ;;  %s4564_s17 = scalar_lea.vmem %s5887_s0, %s3739_s10  ;;  %s5725_s26 = scalar_lea.vmem %s5891_s4, %s3739_s10 }
  0x10   : > { %387 = vst [vmem:[#allocation2 + $0x20] sm:$0x1] %v4480_v3  ;;  %388 = vst [vmem:[#allocation2 + $0x24] sm:$0xf] %v4480_v3  ;;  %v4359_v10 = vld [vmem:[%s5890_s3 + $0x18] sm:$0xff]   ;;  %v4360_v11 = vld [vmem:[%s5890_s3 + $0x50] sm:$0xff]  }
  0x11   : > { %389 = vst [vmem:[#allocation2 + $0x28] sm:$0xf] %v4480_v3  ;;  %390 = vst [vmem:[#allocation2 + $0x2c] sm:$0x1] %v4480_v3  ;;  %3776 = vmatpush3.bf16.msra.mxu0 %v4353_v4  ;;  %4334 = vmatpush3.bf16.msra.mxu1 %v4353_v4  ;;  %v237_v12 = vld [vmem:[%s4564_s17] sm:$0xff]  ;;  %v238_v13 = vld [vmem:[%s4564_s17 + $0x8] sm:$0xff] }
  0x12   : > { %391 = vst [vmem:[#allocation2 + $0x30] sm:$0xf] %v4480_v3  ;;  %392 = vst [vmem:[#allocation2 + $0x34] sm:$0xf] %v4480_v3  ;;  %3777 = vmatprep.subr.bf16.mxu0 %v4354_v5  ;;  %4327 = vmatprep.subr.bf16.mxu1 %v4354_v5  ;;  %v4577_v14 = vld [vmem:[%s5888_s1] ss:$0 sm:$0xff] }
  0x13   : > { %393 = vst [vmem:[#allocation2 + $0x38] sm:$0x1] %v4480_v3  ;;  %394 = vst [vmem:[#allocation2 + $0x3c] sm:$0xf] %v4480_v3  ;;  %v276_v15 = vmul.f32 %v4577_v14, %v237_v12  ;;  %v277_v16 = vmul.f32 %v4577_v14, %v238_v13  ;;  %v4584_v17 = vld [vmem:[%s5889_s2] ss:$0 sm:$0xff] }
  0x14   : > { %395 = vst [vmem:[#allocation2 + $0x40] sm:$0xf] %v4480_v3  ;;  %396 = vst [vmem:[#allocation2 + $0x44] sm:$0x1] %v4480_v3  ;;  %v261_v18 = vld [vmem:[%s4564_s17 + $0xc0] sm:$0xff]  ;;  %v4361_v19 = vld [vmem:[%s5890_s3 + $0x10] sm:$0xff]  }
  0x15   : > { %397 = vst [vmem:[#allocation2 + $0x48] sm:$0xf] %v4480_v3  ;;  %398 = vst [vmem:[#allocation2 + $0x4c] sm:$0xf] %v4480_v3  ;;  %3778 = vmatpush3.bf16.msra.mxu0 %v4355_v6  ;;  %4335 = vmatpush3.bf16.msra.mxu1 %v4355_v6  ;;  %v4362_v20 = vld [vmem:[%s5890_s3 + $0x48] sm:$0xff]   ;;  %v315_v21 = vadd.f32 %v4584_v17, %v276_v15  ;;  %v316_v22 = vadd.f32 %v4584_v17, %v277_v16  ;;  %v259_v29 = vld [vmem:[%s4564_s17 + $0xb0] sm:$0xff] }
  0x16   : > { %399 = vst [vmem:[#allocation2 + $0x50] sm:$0x1] %v4480_v3  ;;  %400 = vst [vmem:[#allocation2 + $0x54] sm:$0xf] %v4480_v3  ;;  %3779 = vmatprep.subr.bf16.mxu0 %v4356_v7  ;;  %4328 = vmatprep.subr.bf16.mxu1 %v4356_v7  ;;  %v262_v23 = vld [vmem:[%s4564_s17 + $0xc8] sm:$0xff]  ;;  %v300_v24 = vmul.f32 %v4577_v14, %v261_v18  ;;  %v260_v30 = vld [vmem:[%s4564_s17 + $0xb8] sm:$0xff]  ;;  %v298_v32 = vmul.f32 %v4577_v14, %v259_v29 }
  0x17   : > { %401 = vst [vmem:[#allocation2 + $0x58] sm:$0xf] %v4480_v3  ;;  %402 = vst [vmem:[#allocation2 + $0x5c] sm:$0x1] %v4480_v3  ;;  %vm529_vm1 = vsmask.f32 256  ;;  %v301_v25 = vmul.f32 %v4577_v14, %v262_v23  ;;  %v299_v33 = vmul.f32 %v4577_v14, %v260_v30 }
  0x18   : > { %403 = vst [vmem:[#allocation2 + $0x60] sm:$0xf] %v4480_v3  ;;  %404 = vst [vmem:[#allocation2 + $0x64] sm:$0xf] %v4480_v3  ;;  %v347_v26 = vmax.f32 %v315_v21, 0.0  ;;  %v348_v27 = vmax.f32 %v316_v22, 0.0  ;;  %v339_v28 = vadd.f32 %v4584_v17, %v300_v24  ;;  %v337_v40 = vadd.f32 %v4584_v17, %v298_v32 }
  0x19   : > { %405 = vst [vmem:[#allocation2 + $0x68] sm:$0x1] %v4480_v3  ;;  %406 = vst [vmem:[#allocation2 + $0x6c] sm:$0xf] %v4480_v3  ;;  %3780 = vmatpush3.bf16.msra.mxu0 %v4357_v8  ;;  %4336 = vmatpush3.bf16.msra.mxu1 %v4357_v8  ;;  %vm530_vm2 = vsmask.f32 4368  ;;  %v340_v31 = vadd.f32 %v4584_v17, %v301_v25  ;;  %v338_v41 = vadd.f32 %v4584_v17, %v299_v33 }
  0x1a   : > { %407 = vst [vmem:[#allocation2 + $0x70] sm:$0xf] %v4480_v3  ;;  %408 = vst [vmem:[#allocation2 + $0x74] sm:$0x1] %v4480_v3  ;;  %3781 = vmatprep.subr.bf16.mxu0 %v4358_v9  ;;  %4329 = vmatprep.subr.bf16.mxu1 %v4358_v9  ;;  %vm854_vm3 = vsmask.f32 7938  ;;  %v3741_v35 = vpack.c.bf16 %v347_v26, %v347_v26  ;;  %v3742_v36 = vpack.c.bf16 %v348_v27, %v348_v27 }
  0x1b   : > { %409 = vst [vmem:[#allocation2 + $0x78] sm:$0xf] %v4480_v3  ;;  %410 = vst [vmem:[#allocation2 + $0x7c] sm:$0xf] %v4480_v3  ;;  %v4363_v34 = vld [vmem:[%s5890_s3 + $0x8] sm:$0xff]   ;;  %v371_v37 = vmax.f32 %v339_v28, 0.0 }
  0x1c   : > { %411 = vst [vmem:[#allocation2 + $0x80] sm:$0x1] %v4480_v3  ;;  %412 = vst [vmem:[#allocation2 + $0x84] sm:$0xf] %v4480_v3  ;;  %v4364_v38 = vld [vmem:[%s5890_s3 + $0x40] sm:$0xff]   ;;  %v372_v39 = vmax.f32 %v340_v31, 0.0 }
  0x1d   : > { %413 = vst [vmem:[#allocation2 + $0x88] sm:$0xf] %v4480_v3  ;;  %414 = vst [vmem:[#allocation2 + $0x8c] sm:$0x1] %v4480_v3  ;;  %3782 = vmatpush3.bf16.msra.mxu0 %v4359_v10  ;;  %4337 = vmatpush3.bf16.msra.mxu1 %v4359_v10  ;;  %v533_v42 = vshrl.u32 %v3741_v35, 16  ;;  %v536_v43 = vshll.u32 %v3741_v35, 16  ;;  %v3765_v51 = vpack.c.bf16 %v371_v37, %v371_v37 }
  0x1e   : > { %415 = vst [vmem:[#allocation2 + $0x90] sm:$0xf] %v4480_v3  ;;  %416 = vst [vmem:[#allocation2 + $0x94] sm:$0xf] %v4480_v3  ;;  %3783 = vmatprep.subr.bf16.mxu0 %v4360_v11  ;;  %4330 = vmatprep.subr.bf16.mxu1 %v4360_v11  ;;  %v541_v44 = vshrl.u32 %v3742_v36, 16  ;;  %v544_v45 = vshll.u32 %v3742_v36, 16  ;;  %v3766_v52 = vpack.c.bf16 %v372_v39, %v372_v39 }
  0x1f   : > { %417 = vst [vmem:[#allocation2 + $0x98] sm:$0x1] %v4480_v3  ;;  %418 = vst [vmem:[#allocation2 + $0x9c] sm:$0xf] %v4480_v3  ;;  %v239_v46 = vld [vmem:[%s4564_s17 + $0x10] sm:$0xff]  ;;  %v240_v47 = vld [vmem:[%s4564_s17 + $0x18] sm:$0xff] }
  0x20   : > { %419 = vst [vmem:[#allocation2 + $0xa0] sm:$0xf] %v4480_v3  ;;  %420 = vst [vmem:[#allocation2 + $0xa4] sm:$0x1] %v4480_v3  ;;  %v4365_v48 = vld [vmem:[%s5890_s3] sm:$0xff]   ;;  %v369_v53 = vmax.f32 %v337_v40, 0.0  ;;  %v278_v59 = vmul.f32 %v4577_v14, %v239_v46  ;;  %v279_v60 = vmul.f32 %v4577_v14, %v240_v47 }
  0x21   : > { %421 = vst [vmem:[#allocation2 + $0xa8] sm:$0xf] %v4480_v3  ;;  %422 = vst [vmem:[#allocation2 + $0xac] sm:$0xf] %v4480_v3  ;;  %3784 = vmatpush3.bf16.msra.mxu0 %v4361_v19  ;;  %4338 = vmatpush3.bf16.msra.mxu1 %v4361_v19  ;;  %v856_v50 = vld [vmem:[#allocation2 + $0xc] sm:$0xf] }
  0x22   : > { %423 = vst [vmem:[#allocation2 + $0xb0] sm:$0x1] %v4480_v3  ;;  %424 = vst [vmem:[#allocation2 + $0xb4] sm:$0xf] %v4480_v3  ;;  %3785 = vmatprep.subr.bf16.mxu0 %v4362_v20  ;;  %4331 = vmatprep.subr.bf16.mxu1 %v4362_v20  ;;  %v370_v54 = vmax.f32 %v338_v41, 0.0  ;;  %v535_v55 = vrot.slane %v533_v42, 7  ;;  %v3763_v5 = vpack.c.bf16 %v369_v53, %v369_v53 }
  0x23   : > { %425 = vst [vmem:[#allocation2 + $0xb8] sm:$0xf] %v4480_v3  ;;  %426 = vst [vmem:[#allocation2 + $0xbc] sm:$0x1] %v4480_v3  ;;  %v4623_v56 = vrot.slane %v541_v44, 7  ;;  %v4628_v57 = vld [vmem:[%s5890_s3 + $0xb8] sm:$0xff]   ;;  %v317_v10 = vadd.f32 %v4584_v17, %v278_v59  ;;  %v318_v25 = vadd.f32 %v4584_v17, %v279_v60 }
  0x24   : > { %427 = vst [vmem:[#allocation2 + $0xc0] sm:$0xf] %v4480_v3  ;;  %428 = vst [vmem:[#allocation2 + $0xc4] sm:$0xf] %v4480_v3  ;;  %v4633_v58 = vld [vmem:[%s5890_s3 + $0x178] sm:$0xff]   ;;  %v737_v62 = vshrl.u32 %v3765_v51, 16  ;;  %v538_v2 = vor.u32 %v536_v43, %v535_v55  ;;  %v3764_v9 = vpack.c.bf16 %v370_v54, %v370_v54 }
  0x25   : > { %429 = vst [vmem:[#allocation2 + $0xc8] sm:$0x1] %v4480_v3  ;;  %430 = vst [vmem:[#allocation2 + $0xcc] sm:$0xf] %v4480_v3  ;;  %3786 = vmatpush3.bf16.msra.mxu0 %v4363_v34  ;;  %4339 = vmatpush3.bf16.msra.mxu1 %v4363_v34  ;;  %v740_v63 = vshll.u32 %v3765_v51, 16  ;;  %v745_v0 = vshrl.u32 %v3766_v52, 16  ;;  %v546_v4 = vor.u32 %v544_v45, %v4623_v56 }
  0x26   : > { %431 = vst [vmem:[#allocation2 + $0xd0] sm:$0xf] %v4480_v3  ;;  %432 = vst [vmem:[#allocation2 + $0xd4] sm:$0x1] %v4480_v3  ;;  %3787 = vmatprep.subr.bf16.mxu0 %v4364_v38  ;;  %4332 = vmatprep.subr.bf16.mxu1 %v4364_v38  ;;  %v748_v1 = vshll.u32 %v3766_v52, 16  ;;  %v539_v3 = vrot.slane %v535_v55, 4 }
  0x27   : > { %vm4619_vm4 = vmor %vm529_vm1, %vm530_vm2  ;;  %v739_v6 = vrot.slane %v737_v62, 7  ;;  %v4644_v7 = vrot.slane %v745_v0, 7  ;;  %v942_v8 = vld [vmem:[#allocation2 + $0x9c] sm:$0xf]  ;;  %v720_v13 = vshrl.u32 %v3763_v5, 16  ;;  %v723_v15 = vshll.u32 %v3763_v5, 16 }
  0x28   : > { %vm4639_vm5 = vmand %vm853_vm0, %vm854_vm3  ;;  %v547_v11 = vsel %vm4619_vm4, %v539_v3, %v546_v4  ;;  %v263_v16 = vld [vmem:[%s4564_s17 + $0xd0] sm:$0xff]  ;;  %v728_v21 = vshrl.u32 %v3764_v9, 16  ;;  %v731_v24 = vshll.u32 %v3764_v9, 16  ;;  %v349_v26 = vmax.f32 %v317_v10, 0.0  ;;  %v264_v27 = vld [vmem:[%s4564_s17 + $0xd8] sm:$0xff]  ;;  %s3498_s10 = sshll.u32 %s5935_s19, 1 }
  0x29   : > { %3788 = vmatpush3.bf16.msra.mxu0 %v4365_v48  ;;  %4340 = vmatpush3.bf16.msra.mxu1 %v4365_v48  ;;  %v857_v12 = vsel %vm4639_vm5, %v538_v2, %v856_v50  ;;  %859 = vst [vmem:[#allocation2 + $0x10] sm:$0xf] %v547_v11  ;;  %v742_v18 = vor.u32 %v740_v63, %v739_v6  ;;  %v743_v19 = vrot.slane %v739_v6, 4  ;;  %v935_v22 = vld [vmem:[#allocation2 + $0x90] sm:$0xf]  ;;  %v722_v23 = vrot.slane %v720_v13, 7  ;;  %s235_s29 = scalar_lea.vmem %s5892_s5, %s3498_s10 }
  0x2a   : > { %858 = vst [vmem:[#allocation2 + $0xc] sm:$0xf] %v857_v12  ;;  %v750_v20 = vor.u32 %v748_v1, %v4644_v7  ;;  %4181 = vmatprep.subr.bf16.mxu1 %v4628_v57  ;;  %4229 = vmatprep.subr.bf16.mxu0 %v4633_v58  ;;  %v241_v28 = vld [vmem:[%s4564_s17 + $0x20] sm:$0xff]  ;;  %v4662_v31 = vrot.slane %v728_v21, 7  ;;  %v302_v32 = vmul.f32 %v4577_v14, %v263_v16  ;;  %v242_v33 = vld [vmem:[%s4564_s17 + $0x28] sm:$0xff]  ;;  %v350_v36 = vmax.f32 %v318_v25, 0.0 }
  0x2b   : > { %v943_v30 = vsel %vm4639_vm5, %v742_v18, %v942_v8  ;;  %v725_v34 = vor.u32 %v723_v15, %v722_v23  ;;  %v726_v35 = vrot.slane %v722_v23, 4  ;;  %v3743_v37 = vpack.c.bf16 %v349_v26, %v349_v26  ;;  %v265_v42 = vld [vmem:[%s4564_s17 + $0xe0] sm:$0xff]  ;;  %v266_v43 = vld [vmem:[%s4564_s17 + $0xe8] sm:$0xff]  ;;  %v865_v51 = vld [vmem:[#allocation2 + $0x18] sm:$0xf] }
  0x2c   : > { %v751_v29 = vsel %vm4619_vm4, %v743_v19, %v750_v20  ;;  %944 = vst [vmem:[#allocation2 + $0x9c] sm:$0xf] %v943_v30  ;;  %v733_v38 = vor.u32 %v731_v24, %v4662_v31  ;;  %v303_v39 = vmul.f32 %v4577_v14, %v264_v27  ;;  %v341_v40 = vadd.f32 %v4584_v17, %v302_v32  ;;  %v4368_v48 = vld [vmem:[#allocation2] sm:$0xff]   ;;  %v4377_v4 = vld [vmem:[%s5890_s3 + $0x170] sm:$0xff]   ;;  %v949_v25 = vld [vmem:[#allocation2 + $0xa8] sm:$0xf] }
  0x2d   : > { %945 = vst [vmem:[#allocation2 + $0xa0] sm:$0xf] %v751_v29  ;;  %v280_v41 = vmul.f32 %v4577_v14, %v241_v28  ;;  %v936_v44 = vsel %vm4639_vm5, %v725_v34, %v935_v22  ;;  %v3744_v45 = vpack.c.bf16 %v350_v36, %v350_v36  ;;  %v550_v46 = vshrl.u32 %v3743_v37, 16  ;;  %v4372_v21 = vld [vmem:[%s5890_s3 + $0xb0] sm:$0xff]   ;;  %v4385_v27 = vld [vmem:[%s5890_s3 + $0x168] sm:$0xff]  }
  0x2e   : > { %v553_v47 = vshll.u32 %v3743_v37, 16  ;;  %v734_v50 = vsel %vm4619_vm4, %v726_v35, %v733_v38  ;;  %937 = vst [vmem:[#allocation2 + $0x90] sm:$0xf] %v936_v44  ;;  %v342_v52 = vadd.f32 %v4584_v17, %v303_v39  ;;  %v373_v53 = vmax.f32 %v341_v40, 0.0  ;;  %v243_v26 = vld [vmem:[%s4564_s17 + $0x30] sm:$0xff] }
  0x2f   : > { %v281_v54 = vmul.f32 %v4577_v14, %v242_v33  ;;  %938 = vst [vmem:[#allocation2 + $0x94] sm:$0xf] %v734_v50  ;;  %v552_v59 = vrot.slane %v550_v46, 7  ;;  %v319_v60 = vadd.f32 %v4584_v17, %v280_v41  ;;  %v304_v62 = vmul.f32 %v4577_v14, %v265_v42  ;;  %v244_v33 = vld [vmem:[%s4564_s17 + $0x38] sm:$0xff] }
  0x30   : > { %v305_v63 = vmul.f32 %v4577_v14, %v266_v43  ;;  %v558_v0 = vshrl.u32 %v3744_v45, 16  ;;  %v561_v1 = vshll.u32 %v3744_v45, 16  ;;  %v374_v2 = vmax.f32 %v342_v52, 0.0  ;;  %v872_v43 = vld [vmem:[#allocation2 + $0x24] sm:$0xf] }
  0x31   : > { %v4678_v55 = vld [vmem:[#allocation2 + $0xc] sm:$0xff]   ;;  %v3767_v3 = vpack.c.bf16 %v373_v53, %v373_v53  ;;  %v555_v5 = vor.u32 %v553_v47, %v552_v59  ;;  %v556_v6 = vrot.slane %v552_v59, 4  ;;  %v320_v8 = vadd.f32 %v4584_v17, %v281_v54 }
  0x32   : > { %1410 = vmatprep.mubr.bf16.mxu0 %v4678_v55  ;;  %v351_v9 = vmax.f32 %v319_v60, 0.0  ;;  %v4690_v11 = vrot.slane %v558_v0, 7  ;;  %v3768_v12 = vpack.c.bf16 %v374_v2, %v374_v2  ;;  %v343_v13 = vadd.f32 %v4584_v17, %v304_v62  ;;  %v268_v0 = vld [vmem:[%s4564_s17 + $0xf8] sm:$0xff] }
  0x33   : > { %1411 = vmatmul.mubr.bf16.vlgmr.msra.gmra.mxu0 %v4368_v48  ;;  %v344_v15 = vadd.f32 %v4584_v17, %v305_v63  ;;  %v866_v16 = vsel %vm4639_vm5, %v555_v5, %v865_v51  ;;  %v754_v18 = vshrl.u32 %v3767_v3, 16  ;;  %v757_v19 = vshll.u32 %v3767_v3, 16  ;;  %v4390_v48 = vld [vmem:[%s5890_s3 + $0x160] sm:$0xff]   ;;  %v4375_v51 = vld [vmem:[%s5890_s3 + $0xa8] sm:$0xff]   ;;  %v267_v63 = vld [vmem:[%s4564_s17 + $0xf0] sm:$0xff] }
  0x34   : > { %v4688_v10 = vld [vmem:[#allocation2 + $0x9c] sm:$0xff]   ;;  %4230 = vmatpush3.bf16.msra.mxu0 %v4633_v58  ;;  %v352_v20 = vmax.f32 %v320_v8, 0.0  ;;  %v563_v22 = vor.u32 %v561_v1, %v4690_v11  ;;  %867 = vst [vmem:[#allocation2 + $0x18] sm:$0xf] %v866_v16  ;;  %v762_v23 = vshrl.u32 %v3768_v12, 16  ;;  %v765_v24 = vshll.u32 %v3768_v12, 16 }
  0x35   : > { %1506 = vmatprep.mubr.bf16.mxu1 %v4688_v10  ;;  %4231 = vmatprep.subr.bf16.mxu0 %v4377_v4  ;;  %v3745_v58 = vpack.c.bf16 %v351_v9, %v351_v9  ;;  %v756_v28 = vrot.slane %v754_v18, 7  ;;  %v375_v30 = vmax.f32 %v343_v13, 0.0  ;;  %v376_v32 = vmax.f32 %v344_v15, 0.0  ;;  %v4736_v5 = vld [vmem:[%s5890_s3 + $0xa0] sm:$0xff]   ;;  %v956_v9 = vld [vmem:[#allocation2 + $0xb4] sm:$0xf] }
  0x36   : > { %v3746_v29 = vpack.c.bf16 %v352_v20, %v352_v20  ;;  %v4707_v34 = vld [vmem:[#allocation2 + $0x90] sm:$0xff]   ;;  %v564_v35 = vsel %vm4619_vm4, %v556_v6, %v563_v22  ;;  %v4711_v36 = vrot.slane %v762_v23, 7  ;;  %v282_v53 = vmul.f32 %v4577_v14, %v243_v26  ;;  %v245_v15 = vld [vmem:[%s4564_s17 + $0x40] sm:$0xff]  ;;  %v246_v22 = vld [vmem:[%s4564_s17 + $0x48] sm:$0xff] }
  0x37   : > { %v567_v37 = vshrl.u32 %v3745_v58, 16  ;;  %v570_v38 = vshll.u32 %v3745_v58, 16  ;;  %868 = vst [vmem:[#allocation2 + $0x1c] sm:$0xf] %v564_v35  ;;  %v759_v39 = vor.u32 %v757_v19, %v756_v28  ;;  %v760_v40 = vrot.slane %v756_v28, 4  ;;  %1507 = vmatmul.mubr.bf16.vlgmr.msra.gmra.mxu1 %v4707_v34 }
  0x38   : > { %v575_v41 = vshrl.u32 %v3746_v29, 16  ;;  %v578_v42 = vshll.u32 %v3746_v29, 16  ;;  %4232 = vmatpush3.bf16.msra.mxu0 %v4377_v4  ;;  %v767_v44 = vor.u32 %v765_v24, %v4711_v36  ;;  %v3769_v46 = vpack.c.bf16 %v375_v30, %v375_v30  ;;  %4182 = vmatpush3.bf16.msra.mxu1 %v4628_v57 }
  0x39   : > { %v569_v45 = vrot.slane %v567_v37, 7  ;;  %v3770_v47 = vpack.c.bf16 %v376_v32, %v376_v32  ;;  %4233 = vmatprep.subr.bf16.mxu0 %v4385_v27  ;;  %v950_v50 = vsel %vm4639_vm5, %v759_v39, %v949_v25  ;;  %v283_v54 = vmul.f32 %v4577_v14, %v244_v33  ;;  %4183 = vmatprep.subr.bf16.mxu1 %v4372_v21  ;;  %v247_v37 = vld [vmem:[%s4564_s17 + $0x50] sm:$0xff] }
  0x3a   : > { %v4724_v52 = vrot.slane %v575_v41, 7  ;;  %v768_v59 = vsel %vm4619_vm4, %v760_v40, %v767_v44  ;;  %951 = vst [vmem:[#allocation2 + $0xa8] sm:$0xf] %v950_v50  ;;  %v771_v62 = vshrl.u32 %v3769_v46, 16  ;;  %v774_v2 = vshll.u32 %v3769_v46, 16  ;;  %v4380_v46 = vld [vmem:[%s5890_s3 + $0x98] sm:$0xff]  }
  0x3b   : > { %v572_v60 = vor.u32 %v570_v38, %v569_v45  ;;  %v573_v57 = vrot.slane %v569_v45, 4  ;;  %952 = vst [vmem:[#allocation2 + $0xac] sm:$0xf] %v768_v59  ;;  %v779_v3 = vshrl.u32 %v3770_v47, 16  ;;  %v782_v4 = vshll.u32 %v3770_v47, 16 }
  0x3c   : > { %v580_v1 = vor.u32 %v578_v42, %v4724_v52  ;;  %4234 = vmatpush3.bf16.msra.mxu0 %v4385_v27  ;;  %v773_v8 = vrot.slane %v771_v62, 7  ;;  %v321_v12 = vadd.f32 %v4584_v17, %v282_v53  ;;  %v322_v13 = vadd.f32 %v4584_v17, %v283_v54  ;;  %4184 = vmatpush3.bf16.msra.mxu1 %v4372_v21  ;;  %v4397_v54 = vld [vmem:[%s5890_s3 + $0x158] sm:$0xff]  }
  0x3d   : > { %v873_v6 = vsel %vm4639_vm5, %v572_v60, %v872_v43  ;;  %4235 = vmatprep.subr.bf16.mxu0 %v4390_v48  ;;  %v4745_v18 = vrot.slane %v779_v3, 7  ;;  %v306_v19 = vmul.f32 %v4577_v14, %v267_v63  ;;  %v307_v20 = vmul.f32 %v4577_v14, %v268_v0  ;;  %4185 = vmatprep.subr.bf16.mxu1 %v4375_v51  ;;  %v248_v62 = vld [vmem:[%s4564_s17 + $0x58] sm:$0xff] }
  0x3e   : > { %v581_v16 = vsel %vm4619_vm4, %v573_v57, %v580_v1  ;;  %874 = vst [vmem:[#allocation2 + $0x24] sm:$0xf] %v873_v6  ;;  %v4750_v23 = vld [vmem:[#allocation2 + $0x18] sm:$0xff]   ;;  %v776_v24 = vor.u32 %v774_v2, %v773_v8  ;;  %v777_v25 = vrot.slane %v773_v8, 4  ;;  %v353_v58 = vmax.f32 %v321_v12, 0.0  ;;  %v4381_v6 = vld [vmem:[%s5890_s3 + $0x90] sm:$0xff]  }
  0x3f   : > { %875 = vst [vmem:[#allocation2 + $0x28] sm:$0xf] %v581_v16  ;;  %v354_v21 = vmax.f32 %v322_v13, 0.0  ;;  %v784_v26 = vor.u32 %v782_v4, %v4745_v18  ;;  %v345_v27 = vadd.f32 %v4584_v17, %v306_v19  ;;  %v346_v28 = vadd.f32 %v4584_v17, %v307_v20  ;;  %1418 = vmatprep.mubr.bf16.mxu0 %v4750_v23  ;;  %v963_v16 = vld [vmem:[#allocation2 + $0xc0] sm:$0xf] }
  0x40   : > { %v284_v29 = vmul.f32 %v4577_v14, %v245_v15  ;;  %4236 = vmatpush3.bf16.msra.mxu0 %v4390_v48  ;;  %v957_v30 = vsel %vm4639_vm5, %v776_v24, %v956_v9  ;;  %v3747_v32 = vpack.c.bf16 %v353_v58, %v353_v58  ;;  %v285_v35 = vmul.f32 %v4577_v14, %v246_v22  ;;  %v879_v48 = vld [vmem:[#allocation2 + $0x30] sm:$0xf]  ;;  %v249_v20 = vld [vmem:[%s4564_s17 + $0x60] sm:$0xff]  ;;  %v886_v58 = vld [vmem:[#allocation2 + $0x3c] sm:$0xf] }
  0x41   : > { %v3748_v33 = vpack.c.bf16 %v354_v21, %v354_v21  ;;  %1419 = vmatmul.mubr.bf16.gmra.mxu0 %v4678_v55  ;;  %4186 = vmatpush3.bf16.msra.mxu1 %v4375_v51  ;;  %v785_v38 = vsel %vm4619_vm4, %v777_v25, %v784_v26  ;;  %958 = vst [vmem:[#allocation2 + $0xb4] sm:$0xf] %v957_v30  ;;  %v377_v39 = vmax.f32 %v345_v27, 0.0  ;;  %v378_v40 = vmax.f32 %v346_v28, 0.0  ;;  %v250_v26 = vld [vmem:[%s4564_s17 + $0x68] sm:$0xff]  ;;  %v251_v27 = vld [vmem:[%s4564_s17 + $0x70] sm:$0xff] }
  0x42   : > { %v323_v41 = vadd.f32 %v4584_v17, %v284_v29  ;;  %v4765_v42 = vld [vmem:[#allocation2 + $0xa8] sm:$0xff]   ;;  %4187 = vmatprep.subr.bf16.mxu1 %v4736_v5  ;;  %959 = vst [vmem:[#allocation2 + $0xb8] sm:$0xf] %v785_v38  ;;  %v584_v43 = vshrl.u32 %v3747_v32, 16  ;;  %v587_v44 = vshll.u32 %v3747_v32, 16  ;;  %v324_v55 = vadd.f32 %v4584_v17, %v285_v35  ;;  %4237 = vmatprep.subr.bf16.mxu0 %v4397_v54 }
  0x43   : > { %v592_v45 = vshrl.u32 %v3748_v33, 16  ;;  %v595_v47 = vshll.u32 %v3748_v33, 16  ;;  %v3771_v50 = vpack.c.bf16 %v377_v39, %v377_v39  ;;  %v3772_v51 = vpack.c.bf16 %v378_v40, %v378_v40  ;;  %1514 = vmatprep.mubr.bf16.mxu1 %v4765_v42  ;;  %v4384_v33 = vld [vmem:[%s5890_s3 + $0x88] sm:$0xff]  }
  0x44   : > { %v355_v53 = vmax.f32 %v323_v41, 0.0  ;;  %v586_v59 = vrot.slane %v584_v43, 7  ;;  %v356_v57 = vmax.f32 %v324_v55, 0.0  ;;  %v286_v63 = vmul.f32 %v4577_v14, %v247_v37  ;;  %1515 = vmatmul.mubr.bf16.gmra.mxu1 %v4688_v10  ;;  %4238 = vmatpush3.bf16.msra.mxu0 %v4397_v54  ;;  %v252_v37 = vld [vmem:[%s4564_s17 + $0x78] sm:$0xff] }
  0x45   : > { %v4776_v60 = vrot.slane %v592_v45, 7  ;;  %v788_v1 = vshrl.u32 %v3771_v50, 16  ;;  %v791_v2 = vshll.u32 %v3771_v50, 16  ;;  %v796_v3 = vshrl.u32 %v3772_v51, 16  ;;  %4188 = vmatpush3.bf16.msra.mxu1 %v4736_v5 }
  0x46   : > { %v4781_v0 = vld [vmem:[#allocation2 + $0x24] sm:$0xff]   ;;  %v3749_v4 = vpack.c.bf16 %v355_v53, %v355_v53  ;;  %v589_v8 = vor.u32 %v587_v44, %v586_v59  ;;  %v590_v9 = vrot.slane %v586_v59, 4  ;;  %v799_v10 = vshll.u32 %v3772_v51, 16  ;;  %4189 = vmatprep.subr.bf16.mxu1 %v4380_v46  ;;  %v4402_v53 = vld [vmem:[%s5890_s3 + $0x150] sm:$0xff]  }
  0x47   : > { %v597_v12 = vor.u32 %v595_v47, %v4776_v60  ;;  %1426 = vmatprep.mubr.bf16.mxu0 %v4781_v0  ;;  %v790_v13 = vrot.slane %v788_v1, 7  ;;  %v4789_v15 = vrot.slane %v796_v3, 7  ;;  %v3750_v5 = vpack.c.bf16 %v356_v57, %v356_v57  ;;  %v255_v1 = vld [vmem:[%s4564_s17 + $0x90] sm:$0xff]  ;;  %4239 = vmatprep.subr.bf16.mxu0 %v4402_v53 }
  0x48   : > { %v601_v19 = vshrl.u32 %v3749_v4, 16  ;;  %v880_v24 = vsel %vm4639_vm5, %v589_v8, %v879_v48  ;;  %v604_v25 = vshll.u32 %v3749_v4, 16  ;;  %v287_v21 = vmul.f32 %v4577_v14, %v248_v62  ;;  %4240 = vmatpush3.bf16.msra.mxu0 %v4402_v53 }
  0x49   : > { %v598_v22 = vsel %vm4619_vm4, %v590_v9, %v597_v12  ;;  %v4799_v28 = vld [vmem:[#allocation2 + $0xb4] sm:$0xff]   ;;  %1427 = vmatmul.mubr.bf16.gmra.mxu0 %v4750_v23  ;;  %881 = vst [vmem:[#allocation2 + $0x30] sm:$0xf] %v880_v24  ;;  %v793_v29 = vor.u32 %v791_v2, %v790_v13  ;;  %v794_v30 = vrot.slane %v790_v13, 4  ;;  %v801_v32 = vor.u32 %v799_v10, %v4789_v15  ;;  %v4386_v9 = vld [vmem:[%s5890_s3 + $0x80] sm:$0xff]  }
  0x4a   : > { %882 = vst [vmem:[#allocation2 + $0x34] sm:$0xf] %v598_v22  ;;  %v603_v35 = vrot.slane %v601_v19, 7  ;;  %4190 = vmatpush3.bf16.msra.mxu1 %v4380_v46  ;;  %v609_v38 = vshrl.u32 %v3750_v5, 16  ;;  %v612_v39 = vshll.u32 %v3750_v5, 16  ;;  %v325_v40 = vadd.f32 %v4584_v17, %v286_v63  ;;  %1522 = vmatprep.mubr.bf16.mxu1 %v4799_v28  ;;  %v253_v46 = vld [vmem:[%s4564_s17 + $0x80] sm:$0xff] }
  0x4b   : > { %v326_v41 = vadd.f32 %v4584_v17, %v287_v21  ;;  %4191 = vmatprep.subr.bf16.mxu1 %v4381_v6  ;;  %v802_v43 = vsel %vm4619_vm4, %v794_v30, %v801_v32  ;;  %v964_v44 = vsel %vm4639_vm5, %v793_v29, %v963_v16  ;;  %v288_v51 = vmul.f32 %v4577_v14, %v249_v20  ;;  %v254_v63 = vld [vmem:[%s4564_s17 + $0x88] sm:$0xff] }
  0x4c   : > { %v606_v45 = vor.u32 %v604_v25, %v603_v35  ;;  %v607_v55 = vrot.slane %v603_v35, 4  ;;  %965 = vst [vmem:[#allocation2 + $0xc0] sm:$0xf] %v964_v44  ;;  %966 = vst [vmem:[#allocation2 + $0xc4] sm:$0xf] %v802_v43  ;;  %v4815_v47 = vrot.slane %v609_v38, 7  ;;  %1523 = vmatmul.mubr.bf16.gmra.mxu1 %v4765_v42  ;;  %v289_v59 = vmul.f32 %v4577_v14, %v250_v26 }
  0x4d   : > { %v357_v48 = vmax.f32 %v325_v40, 0.0  ;;  %v358_v50 = vmax.f32 %v326_v41, 0.0  ;;  %v290_v57 = vmul.f32 %v4577_v14, %v251_v27  ;;  %v291_v62 = vmul.f32 %v4577_v14, %v252_v37  ;;  %v893_v21 = vld [vmem:[#allocation2 + $0x48] sm:$0xf] }
  0x4e   : > { %v887_v54 = vsel %vm4639_vm5, %v606_v45, %v886_v58  ;;  %4192 = vmatpush3.bf16.msra.mxu1 %v4381_v6  ;;  %v614_v2 = vor.u32 %v612_v39, %v4815_v47  ;;  %v327_v8 = vadd.f32 %v4584_v17, %v288_v51  ;;  %v328_v12 = vadd.f32 %v4584_v17, %v289_v59  ;;  %v256_v51 = vld [vmem:[%s4564_s17 + $0x98] sm:$0xff] }
  0x4f   : > { %888 = vst [vmem:[#allocation2 + $0x3c] sm:$0xf] %v887_v54  ;;  %v3751_v3 = vpack.c.bf16 %v357_v48, %v357_v48  ;;  %v3752_v4 = vpack.c.bf16 %v358_v50, %v358_v50  ;;  %4193 = vmatprep.subr.bf16.mxu1 %v4384_v33  ;;  %v329_v10 = vadd.f32 %v4584_v17, %v290_v57  ;;  %v900_v57 = vld [vmem:[#allocation2 + $0x54] sm:$0xf]  ;;  %vm860_vm6 = vcmask 1040384  }
  0x50   : > { %v330_v13 = vadd.f32 %v4584_v17, %v291_v62  ;;  %v292_v6 = vmul.f32 %v4577_v14, %v253_v46  ;;  %v615_v5 = vsel %vm4619_vm4, %v607_v55, %v614_v2  ;;  %v293_v20 = vmul.f32 %v4577_v14, %v254_v63  ;;  %v4409_v63 = vld [vmem:[%s5890_s3 + $0x148] sm:$0xff]   ;;  %vm4934_vm7 = vmand %vm860_vm6, %vm529_vm1 }
  0x51   : > { %v4838_v16 = vld [vmem:[#allocation2 + $0x30] sm:$0xff]   ;;  %v618_v19 = vshrl.u32 %v3751_v3, 16  ;;  %v4844_v22 = vmul.f32 %v4577_v14, %v255_v1  ;;  %889 = vst [vmem:[#allocation2 + $0x40] sm:$0xf] %v615_v5  ;;  %v621_v24 = vshll.u32 %v3751_v3, 16  ;;  %v626_v25 = vshrl.u32 %v3752_v4, 16  ;;  %4241 = vmatprep.subr.bf16.mxu0 %v4409_v63 }
  0x52   : > { %v629_v58 = vshll.u32 %v3752_v4, 16  ;;  %v359_v26 = vmax.f32 %v327_v8, 0.0  ;;  %1434 = vmatprep.mubr.bf16.mxu0 %v4838_v16  ;;  %4194 = vmatpush3.bf16.msra.mxu1 %v4384_v33  ;;  %v360_v29 = vmax.f32 %v328_v12, 0.0  ;;  %v361_v30 = vmax.f32 %v329_v10, 0.0  ;;  %v4388_v33 = vld [vmem:[%s5890_s3 + $0x138] sm:$0xff]  }
  0x53   : > { %v620_v27 = vrot.slane %v618_v19, 7  ;;  %v362_v32 = vmax.f32 %v330_v13, 0.0  ;;  %v4847_v35 = vld [vmem:[#allocation2 + $0xc0] sm:$0xff]   ;;  %1435 = vmatmul.mubr.bf16.gmra.mxu0 %v4781_v0  ;;  %4195 = vmatprep.subr.bf16.mxu1 %v4386_v9  ;;  %v4850_v37 = vrot.slane %v626_v25, 7  ;;  %v331_v39 = vadd.f32 %v4584_v17, %v292_v6  ;;  %v4389_v5 = vld [vmem:[%s5890_s3 + $0xf8] sm:$0xff]  }
  0x54   : > { %v3753_v38 = vpack.c.bf16 %v359_v26, %v359_v26  ;;  %v332_v40 = vadd.f32 %v4584_v17, %v293_v20  ;;  %v3754_v44 = vpack.c.bf16 %v360_v29, %v360_v29  ;;  %v3755_v45 = vpack.c.bf16 %v361_v30, %v361_v30  ;;  %1530 = vmatprep.mubr.bf16.mxu1 %v4847_v35  ;;  %v907_v8 = vld [vmem:[#allocation2 + $0x60] sm:$0xf]  ;;  %v258_v30 = vld [vmem:[%s4564_s17 + $0xa8] sm:$0xff] }
  0x55   : > { %v623_v41 = vor.u32 %v621_v24, %v620_v27  ;;  %v624_v43 = vrot.slane %v620_v27, 4  ;;  %v631_v55 = vor.u32 %v629_v58, %v4850_v37  ;;  %v3756_v50 = vpack.c.bf16 %v362_v32, %v362_v32  ;;  %1531 = vmatmul.mubr.bf16.gmra.mxu1 %v4799_v28  ;;  %v257_v58 = vld [vmem:[%s4564_s17 + $0xa0] sm:$0xff]  ;;  %4242 = vmatpush3.bf16.msra.mxu0 %v4409_v63 }
  0x56   : > { %v635_v46 = vshrl.u32 %v3753_v38, 16  ;;  %v638_v48 = vshll.u32 %v3753_v38, 16  ;;  %v643_v54 = vshrl.u32 %v3754_v44, 16  ;;  %v646_v59 = vshll.u32 %v3754_v44, 16  ;;  %4196 = vmatpush3.bf16.msra.mxu1 %v4386_v9  ;;  %4197 = vmatprep.mubr.bf16.mxu1 %v4750_v23 }
  0x57   : > { %v894_v53 = vsel %vm4639_vm5, %v623_v41, %v893_v21  ;;  %v652_v62 = vshrl.u32 %v3755_v45, 16  ;;  %v632_v1 = vsel %vm4619_vm4, %v624_v43, %v631_v55  ;;  %v655_v3 = vshll.u32 %v3755_v45, 16  ;;  %3909 = vmatprep.subr.bf16.mxu1 %v4388_v33  ;;  %v4412_v45 = vld [vmem:[%s5890_s3 + $0x140] sm:$0xff]  }
  0x58   : > { %895 = vst [vmem:[#allocation2 + $0x48] sm:$0xf] %v894_v53  ;;  %v637_v2 = vrot.slane %v635_v46, 7  ;;  %v660_v4 = vshrl.u32 %v3756_v50, 16  ;;  %v4869_v12 = vld [vmem:[#allocation2 + $0x3c] sm:$0xff]   ;;  %v4871_v10 = vrot.slane %v643_v54, 7  ;;  %v295_v9 = vmul.f32 %v4577_v14, %v256_v51  ;;  %4243 = vmatprep.subr.bf16.mxu0 %v4412_v45 }
  0x59   : > { %896 = vst [vmem:[#allocation2 + $0x4c] sm:$0xf] %v632_v1  ;;  %v654_v13 = vrot.slane %v652_v62, 7  ;;  %v663_v6 = vshll.u32 %v3756_v50, 16  ;;  %v363_v25 = vmax.f32 %v331_v39, 0.0  ;;  %1442 = vmatprep.mubr.bf16.mxu0 %v4869_v12  ;;  %v4392_v14 = vld [vmem:[%s5890_s3 + $0x130] sm:$0xff]   ;;  %v333_v33 = vadd.f32 %v4584_v17, %v4844_v22  ;;  %4244 = vmatpush3.bf16.msra.mxu0 %v4412_v45 }
  0x5a   : > { %v640_v19 = vor.u32 %v638_v48, %v637_v2  ;;  %v641_v20 = vrot.slane %v637_v2, 4  ;;  %v4877_v24 = vrot.slane %v660_v4, 7  ;;  %v648_v21 = vor.u32 %v646_v59, %v4871_v10  ;;  %v4393_v50 = vld [vmem:[%s5890_s3 + $0xf0] sm:$0xff]   ;;  %v914_v53 = vld [vmem:[#allocation2 + $0x6c] sm:$0xf] }
  0x5b   : > { %v657_v26 = vor.u32 %v655_v3, %v654_v13  ;;  %v658_v27 = vrot.slane %v654_v13, 4  ;;  %v364_v29 = vmax.f32 %v332_v40, 0.0  ;;  %1443 = vmatmul.mubr.bf16.gmra.mxu0 %v4838_v16  ;;  %v3757_v39 = vpack.c.bf16 %v363_v25, %v363_v25  ;;  %v4458_v59 = vld [vmem:[%s5888_s1] ss:$0 sm:$0xff]  ;;  %v4395_v3 = vld [vmem:[%s5890_s3 + $0x128] sm:$0xff]  }
  0x5c   : > { %v901_v32 = vsel %vm4639_vm5, %v640_v19, %v900_v57  ;;  %v665_v38 = vor.u32 %v663_v6, %v4877_v24  ;;  %v649_v41 = vsel %vm4619_vm4, %v641_v20, %v648_v21  ;;  %v334_v44 = vadd.f32 %v4584_v17, %v295_v9  ;;  %v4459_v13 = vld [vmem:[%s5889_s2] ss:$0 sm:$0xff]  ;;  %v4396_v9 = vld [vmem:[%s5890_s3 + $0xe8] sm:$0xff]  }
  0x5d   : > { %902 = vst [vmem:[#allocation2 + $0x54] sm:$0xf] %v901_v32  ;;  %v908_v43 = vsel %vm4639_vm5, %v657_v26, %v907_v8  ;;  %v3758_v40 = vpack.c.bf16 %v364_v29, %v364_v29  ;;  %903 = vst [vmem:[#allocation2 + $0x58] sm:$0xf] %v649_v41  ;;  %v669_v22 = vshrl.u32 %v3757_v39, 16  ;;  %v672_v46 = vshll.u32 %v3757_v39, 16  ;;  %4198 = vmatmul.mubr.bf16.vlgmr.msra.gmra.mxu1 %v4781_v0 }
  0x5e   : > { %v666_v55 = vsel %vm4619_vm4, %v658_v27, %v665_v38  ;;  %909 = vst [vmem:[#allocation2 + $0x60] sm:$0xf] %v908_v43  ;;  %v365_v48 = vmax.f32 %v333_v33, 0.0  ;;  %v366_v54 = vmax.f32 %v334_v44, 0.0  ;;  %v296_v57 = vmul.f32 %v4458_v59, %v257_v58  ;;  %3910 = vmatpush3.bf16.msra.mxu1 %v4389_v5  ;;  %4201 = vmatprep.mubr.bf16.mxu1 %v4838_v16  ;;  %v921_v27 = vld [vmem:[#allocation2 + $0x78] sm:$0xf] }
  0x5f   : > { %910 = vst [vmem:[#allocation2 + $0x64] sm:$0xf] %v666_v55  ;;  %v677_v17 = vshrl.u32 %v3758_v40, 16  ;;  %v680_v51 = vshll.u32 %v3758_v40, 16  ;;  %v671_v63 = vrot.slane %v669_v22, 7  ;;  %v297_v2 = vmul.f32 %v4458_v59, %v258_v30  ;;  %3911 = vmatprep.subr.bf16.mxu1 %v4392_v14  ;;  %v4400_v14 = vld [vmem:[%s5890_s3 + $0x120] sm:$0xff]  }
  0x60   : > { %v4909_v62 = vld [vmem:[#allocation2 + $0x48] sm:$0xff]   ;;  %v3759_v1 = vpack.c.bf16 %v365_v48, %v365_v48  ;;  %v3760_v8 = vpack.c.bf16 %v366_v54, %v366_v54  ;;  %v335_v6 = vadd.f32 %v4459_v13, %v296_v57  ;;  %v862_v30 = vld [vmem:[#allocation2 + $0x14] sm:$0x1]  ;;  %v548_v33 = vrot.slane %v4623_v56, 4  ;;  %v4421_v43 = vld [vmem:[%s5890_s3 + $0x1f8] sm:$0xff]  }
  0x61   : > { %v4915_v4 = vrot.slane %v677_v17, 7  ;;  %1450 = vmatprep.mubr.bf16.mxu0 %v4909_v62  ;;  %v674_v5 = vor.u32 %v672_v46, %v671_v63  ;;  %v675_v19 = vrot.slane %v671_v63, 4  ;;  %v336_v29 = vadd.f32 %v4459_v13, %v297_v2  ;;  %4045 = vmatprep.subr.bf16.mxu0 %v4421_v43  ;;  %v4401_v17 = vld [vmem:[%s5890_s3 + $0xe0] sm:$0xff]   ;;  %v4411_v43 = vld [vmem:[%s5890_s3 + $0xc8] sm:$0xff]   ;;  %v4429_v41 = vld [vmem:[%s5890_s3 + $0x230] sm:$0xff]  }
  0x62   : > { %v686_v20 = vshrl.u32 %v3759_v1, 16  ;;  %v689_v25 = vshll.u32 %v3759_v1, 16  ;;  %v694_v21 = vshrl.u32 %v3760_v8, 16  ;;  %v697_v26 = vshll.u32 %v3760_v8, 16  ;;  %3912 = vmatpush3.bf16.msra.mxu1 %v4393_v50  ;;  %v869_v57 = vld [vmem:[#allocation2 + $0x20] sm:$0x1] }
  0x63   : > { %v682_v58 = vor.u32 %v680_v51, %v4915_v4  ;;  %1451 = vmatmul.mubr.bf16.gmra.mxu0 %v4869_v12  ;;  %v915_v32 = vsel %vm4639_vm5, %v674_v5, %v914_v53  ;;  %v367_v39 = vmax.f32 %v335_v6, 0.0  ;;  %3913 = vmatprep.subr.bf16.mxu1 %v4395_v3  ;;  %v368_v22 = vmax.f32 %v336_v29, 0.0  ;;  %v928_v2 = vld [vmem:[#allocation2 + $0x84] sm:$0xf]  ;;  %v4405_v3 = vld [vmem:[%s5890_s3 + $0x118] sm:$0xff]  }
  0x64   : > { %v688_v38 = vrot.slane %v686_v20, 7  ;;  %v4941_v40 = vld [vmem:[#allocation2 + $0x54] sm:$0xff]   ;;  %916 = vst [vmem:[#allocation2 + $0x6c] sm:$0xf] %v915_v32  ;;  %v4945_v45 = vrot.slane %v694_v21, 7  ;;  %v863_v50 = vsel %vm4934_vm7, %v548_v33, %v862_v30  ;;  %v565_v8 = vrot.slane %v4690_v11, 4 }
  0x65   : > { %v683_v44 = vsel %vm4619_vm4, %v675_v19, %v682_v58  ;;  %v3761_v46 = vpack.c.bf16 %v367_v39, %v367_v39  ;;  %4202 = vmatmul.mubr.bf16.gmra.mxu1 %v4869_v12  ;;  %1458 = vmatprep.mubr.bf16.mxu0 %v4941_v40  ;;  %v3762_v53 = vpack.c.bf16 %v368_v22, %v368_v22  ;;  %v4406_v5 = vld [vmem:[%s5890_s3 + $0xd8] sm:$0xff]   ;;  %v876_v11 = vld [vmem:[#allocation2 + $0x2c] sm:$0x1]  ;;  %v582_v21 = vrot.slane %v4724_v52, 4  ;;  %v4408_v52 = vld [vmem:[%s5890_s3 + $0xd0] sm:$0xff]  }
  0x66   : > { %917 = vst [vmem:[#allocation2 + $0x70] sm:$0xf] %v683_v44  ;;  %v691_v56 = vor.u32 %v689_v25, %v688_v38  ;;  %v692_v55 = vrot.slane %v688_v38, 4  ;;  %v699_v48 = vor.u32 %v697_v26, %v4945_v45  ;;  %4205 = vmatprep.mubr.bf16.mxu1 %v4909_v62  ;;  %3914 = vmatpush3.bf16.msra.mxu1 %v4396_v9  ;;  %864 = vst [vmem:[#allocation2 + $0x14] sm:$0x1] %v863_v50  ;;  %v4958_v63 = vld [vmem:[#allocation2 + $0x60] sm:$0xff]  }
  0x67   : > { %v703_v54 = vshrl.u32 %v3761_v46, 16  ;;  %v706_v59 = vshll.u32 %v3761_v46, 16  ;;  %3915 = vmatprep.subr.bf16.mxu1 %v4400_v14  ;;  %v711_v6 = vshrl.u32 %v3762_v53, 16  ;;  %v714_v9 = vshll.u32 %v3762_v53, 16  ;;  %v4407_v14 = vld [vmem:[%s5890_s3 + $0x110] sm:$0xff]   ;;  %v4410_v32 = vld [vmem:[%s5890_s3 + $0x108] sm:$0xff]  }
  0x68   : > { %v922_v51 = vsel %vm4639_vm5, %v691_v56, %v921_v27  ;;  %v700_v1 = vsel %vm4619_vm4, %v692_v55, %v699_v48  ;;  %v870_v19 = vsel %vm4934_vm7, %v565_v8, %v869_v57  ;;  %v877_v29 = vsel %vm4934_vm7, %v582_v21, %v876_v11  ;;  %v883_v38 = vld [vmem:[#allocation2 + $0x38] sm:$0x1]  ;;  %v890_v33 = vld [vmem:[#allocation2 + $0x44] sm:$0x1]  ;;  %v897_v22 = vld [vmem:[#allocation2 + $0x50] sm:$0x1] }
  0x69   : > { %923 = vst [vmem:[#allocation2 + $0x78] sm:$0xf] %v922_v51  ;;  %924 = vst [vmem:[#allocation2 + $0x7c] sm:$0xf] %v700_v1  ;;  %v705_v13 = vrot.slane %v703_v54, 7  ;;  %v4972_v58 = vrot.slane %v711_v6, 7 }
  0x6a   : > { %3916 = vmatpush3.bf16.msra.mxu1 %v4401_v17  ;;  %871 = vst [vmem:[#allocation2 + $0x20] sm:$0x1] %v870_v19  ;;  %878 = vst [vmem:[#allocation2 + $0x2c] sm:$0x1] %v877_v29  ;;  %v599_v61 = vrot.slane %v4776_v60, 4  ;;  %v616_v39 = vrot.slane %v4815_v47, 4 }
  0x6b   : > { %1459 = vmatmul.mubr.bf16.gmra.mxu0 %v4909_v62  ;;  %v708_v20 = vor.u32 %v706_v59, %v705_v13  ;;  %v709_v25 = vrot.slane %v705_v13, 4  ;;  %3917 = vmatprep.subr.bf16.mxu1 %v4405_v3  ;;  %v716_v26 = vor.u32 %v714_v9, %v4972_v58  ;;  %v4414_v47 = vld [vmem:[%s5890_s3 + $0x100] sm:$0xff]   ;;  %v633_v55 = vrot.slane %v4850_v37, 4  ;;  %v5024_v37 = vld [vmem:[%s5890_s3 + $0x238] sm:$0xff]   ;;  %v911_v54 = vld [vmem:[#allocation2 + $0x68] sm:$0x1] }
  0x6c   : > { %1466 = vmatprep.mubr.bf16.mxu0 %v4958_v63  ;;  %v884_v44 = vsel %vm4934_vm7, %v599_v61, %v883_v38  ;;  %v891_v56 = vsel %vm4934_vm7, %v616_v39, %v890_v33  ;;  %v4415_v48 = vld [vmem:[%s5890_s3 + $0xc0] sm:$0xff]   ;;  %v650_v50 = vrot.slane %v4871_v10, 4  ;;  %v904_v17 = vld [vmem:[#allocation2 + $0x5c] sm:$0x1]  ;;  %v667_v10 = vrot.slane %v4877_v24, 4  ;;  %v5070_v61 = vld [vmem:[#allocation2 + $0x90] sm:$0xff]  }
  0x6d   : > { %v929_v27 = vsel %vm4639_vm5, %v708_v20, %v928_v2  ;;  %4206 = vmatmul.mubr.bf16.gmra.mxu1 %v4941_v40  ;;  %v717_v30 = vsel %vm4619_vm4, %v709_v25, %v716_v26  ;;  %v4996_v49 = vld [vmem:[#allocation2 + $0x6c] sm:$0xff]   ;;  %885 = vst [vmem:[#allocation2 + $0x38] sm:$0x1] %v884_v44  ;;  %892 = vst [vmem:[#allocation2 + $0x44] sm:$0x1] %v891_v56  ;;  %v898_v46 = vsel %vm4934_vm7, %v633_v55, %v897_v22  ;;  %v5050_v9 = vld [vmem:[#allocation2 + $0x9c] sm:$0xff]  }
  0x6e   : > { %930 = vst [vmem:[#allocation2 + $0x84] sm:$0xf] %v929_v27  ;;  %4209 = vmatprep.mubr.bf16.mxu1 %v4958_v63  ;;  %3918 = vmatpush3.bf16.msra.mxu1 %v4406_v5  ;;  %931 = vst [vmem:[#allocation2 + $0x88] sm:$0xf] %v717_v30  ;;  %v905_v51 = vsel %vm4934_vm7, %v650_v50, %v904_v17  ;;  %v912_v59 = vsel %vm4934_vm7, %v667_v10, %v911_v54  ;;  %v684_v57 = vrot.slane %v4915_v4, 4  ;;  %v5084_v44 = vld [vmem:[#allocation2] sm:$0xff]  }
  0x6f   : > { %3919 = vmatprep.subr.bf16.mxu1 %v4407_v14  ;;  %899 = vst [vmem:[#allocation2 + $0x50] sm:$0x1] %v898_v46  ;;  %906 = vst [vmem:[#allocation2 + $0x5c] sm:$0x1] %v905_v51  ;;  %v918_v1 = vld [vmem:[#allocation2 + $0x74] sm:$0x1] }
  0x70   : > { %v5004_v60 = vld [vmem:[#allocation2 + $0x78] sm:$0xff]   ;;  %913 = vst [vmem:[#allocation2 + $0x68] sm:$0x1] %v912_v59  ;;  %v919_v2 = vsel %vm4934_vm7, %v684_v57, %v918_v1  ;;  %v701_v24 = vrot.slane %v4945_v45, 4  ;;  %v925_v3 = vld [vmem:[#allocation2 + $0x80] sm:$0x1] }
  0x71   : > { %920 = vst [vmem:[#allocation2 + $0x74] sm:$0x1] %v919_v2  ;;  %v1792_v8 = vshll.u32 %v4750_v23, 16  ;;  %v932_v13 = vld [vmem:[#allocation2 + $0x8c] sm:$0x1]  ;;  %v718_v4 = vrot.slane %v4972_v58, 4 }
  0x72   : > { %3920 = vmatpush3.bf16.msra.mxu1 %v4408_v52  ;;  %v5045_v6 = vld [vmem:[#allocation2 + $0x20] ss:$0 sps:$4 sm:$0x11]   ;;  %v5053_v5 = vld [vmem:[#allocation2 + $0x14] ss:$0 sps:$4 sm:$0x11]  }
  0x73   : > { %1467 = vmatmul.mubr.bf16.gmra.mxu0 %v4941_v40  ;;  %3921 = vmatprep.subr.bf16.mxu1 %v4410_v32  ;;  %v5055_v45 = vld [vmem:[#allocation2 + $0xc] sm:$0xff]   ;;  %v933_v20 = vsel %vm4934_vm7, %v718_v4, %v932_v13  ;;  %vm1764_vm8 = vsmask.f32 7424  ;;  %v1790_v25 = vshrl.u32 %v4750_v23, 16  ;;  %v1794_v58 = vrot.slane %v1792_v8, 1 }
  0x74   : > { %1474 = vmatprep.mubr.bf16.mxu0 %v4996_v49  ;;  %v1780_v19 = vshll.u32 %v5055_v45, 16  ;;  %934 = vst [vmem:[#allocation2 + $0x8c] sm:$0x1] %v933_v20  ;;  %v1797_v11 = vshll.u32 %v5045_v6, 16  ;;  %v1778_v14 = vshrl.u32 %v5055_v45, 16  ;;  %v1804_v26 = vshll.u32 %v4781_v0, 16 }
  0x75   : > { %4210 = vmatmul.mubr.bf16.gmra.mxu1 %v4996_v49  ;;  %v5028_v53 = vld [vmem:[#allocation2 + $0x84] sm:$0xff]   ;;  %v735_v27 = vrot.slane %v4662_v31, 4  ;;  %v939_v29 = vld [vmem:[#allocation2 + $0x98] sm:$0x1]  ;;  %v752_v30 = vrot.slane %v4644_v7, 4  ;;  %v1785_v23 = vshll.u32 %v5053_v5, 16  ;;  %v1795_v39 = vor.u32 %v1794_v58, %v1790_v25 }
  0x76   : > { %4213 = vmatprep.mubr.bf16.mxu1 %v5004_v60  ;;  %3922 = vmatpush3.bf16.msra.mxu1 %v4411_v43  ;;  %v1782_v21 = vrot.slane %v1780_v19, 1  ;;  %v946_v52 = vld [vmem:[#allocation2 + $0xa4] sm:$0x1]  ;;  %v5074_v32 = vld [vmem:[#allocation2 + $0x8] ss:$0 sps:$4 sm:$0x11]  }
  0x77   : > { %3923 = vmatprep.subr.bf16.mxu1 %v4414_v47  ;;  %v1816_v38 = vshll.u32 %v4838_v16, 16  ;;  %v940_v31 = vsel %vm4934_vm7, %v735_v27, %v939_v29  ;;  %v1799_v33 = vrot.slane %v1797_v11, 1  ;;  %v5079_v43 = vld [vmem:[#allocation2 + $0x38] ss:$0 sps:$4 sm:$0x11]   ;;  %v947_v7 = vsel %vm4934_vm7, %v752_v30, %v946_v52  ;;  %v5093_v10 = vld [vmem:[#allocation2 + $0xcc] sm:$0xff]  }
  0x78   : > { %941 = vst [vmem:[#allocation2 + $0x98] sm:$0x1] %v940_v31  ;;  %v1768_v56 = vshll.u32 %v5084_v44, 16  ;;  %948 = vst [vmem:[#allocation2 + $0xa4] sm:$0x1] %v947_v7  ;;  %v1783_v47 = vor.u32 %v1782_v21, %v1778_v14  ;;  %v1766_v55 = vshrl.u32 %v5084_v44, 16 }
  0x79   : > { %v1802_v22 = vshrl.u32 %v4781_v0, 16  ;;  %v1814_v46 = vshrl.u32 %v4838_v16, 16  ;;  %v1806_v50 = vrot.slane %v1804_v26, 1  ;;  %v953_v51 = vld [vmem:[#allocation2 + $0xb0] sm:$0x1]  ;;  %v5096_v54 = vsel %vm1764_vm8, %v1795_v39, %v1799_v33  ;;  %v4422_v27 = vld [vmem:[%s5890_s3 + $0x1b8] sm:$0xff]  }
  0x7a   : > { %3924 = vmatpush3.bf16.msra.mxu1 %v4415_v48  ;;  %v1787_v48 = vrot.slane %v1785_v23, 1  ;;  %v1821_v59 = vshll.u32 %v5079_v43, 16  ;;  %v786_v57 = vrot.slane %v4745_v18, 4  ;;  %v960_v0 = vld [vmem:[#allocation2 + $0xbc] sm:$0x1]  ;;  %v1770_v1 = vrot.slane %v1768_v56, 1 }
  0x7b   : > { %1475 = vmatmul.mubr.bf16.gmra.mxu0 %v4958_v63  ;;  %4277 = vmatprep.subr.bf16.mxu1 %v5024_v37  ;;  %v1773_v16 = vshll.u32 %v5074_v32, 16  ;;  %v1807_v18 = vor.u32 %v1806_v50, %v1802_v22  ;;  %v5114_v20 = vld [vmem:[#allocation2 + $0x50] ss:$0 sps:$4 sm:$0x11]   ;;  %v803_v25 = vrot.slane %v4789_v15, 4  ;;  %v1826_v14 = vshrl.u32 %v4869_v12, 16 }
  0x7c   : > { %1482 = vmatprep.mubr.bf16.mxu0 %v5004_v60  ;;  %v5109_v8 = vsel %vm1764_vm8, %v1783_v47, %v1787_v48  ;;  %v1823_v19 = vrot.slane %v1821_v59, 1  ;;  %v1771_v58 = vor.u32 %v1770_v1, %v1766_v55  ;;  %v967_v21 = vld [vmem:[#allocation2 + $0xc8] sm:$0x1]  ;;  %v1838_v23 = vshrl.u32 %v4909_v62, 16  ;;  %v4426_v39 = vld [vmem:[%s5890_s3 + $0x1b0] sm:$0xff]   ;;  %v4434_v1 = vld [vmem:[%s5890_s3 + $0x1e0] sm:$0xff]  }
  0x7d   : > { %4214 = vmatmul.mubr.bf16.gmra.mxu1 %v5028_v53  ;;  %v1775_v11 = vrot.slane %v1773_v16, 1  ;;  %v968_v15 = vsel %vm4934_vm7, %v803_v25, %v967_v21  ;;  %v1845_v31 = vshll.u32 %v5114_v20, 16  ;;  %v4428_v7 = vld [vmem:[#allocation2 + $0x5c] ss:$0 sps:$4 sm:$0x11]   ;;  %v1852_v56 = vshll.u32 %v4941_v40, 16 }
  0x7e   : > { %4217 = vmatprep.mubr.bf16.mxu1 %v4707_v34  ;;  %v926_v34 = vsel %vm4934_vm7, %v701_v24, %v925_v3  ;;  %v1840_v24 = vshll.u32 %v4909_v62, 16  ;;  %v961_v3 = vsel %vm4934_vm7, %v786_v57, %v960_v0  ;;  %969 = vst [vmem:[#allocation2 + $0xc8] sm:$0x1] %v968_v15  ;;  %v4430_v62 = vld [vmem:[%s5890_s3 + $0x1e8] sm:$0xff]   ;;  %v1864_v22 = vshll.u32 %v4958_v63, 16 }
  0x7f   : > { %927 = vst [vmem:[#allocation2 + $0x80] sm:$0x1] %v926_v34  ;;  %v5112_v34 = vld [vmem:[#allocation2 + $0x44] ss:$0 sps:$4 sm:$0x11]   ;;  %v1776_v33 = vsel %vm1764_vm8, %v1771_v58, %v1775_v11  ;;  %v1847_v48 = vrot.slane %v1845_v31, 1 }
  0x80   : > { %962 = vst [vmem:[#allocation2 + $0xbc] sm:$0x1] %v961_v3  ;;  %v1833_v30 = vshll.u32 %v5112_v34, 16  ;;  %v4432_v50 = vld [vmem:[#allocation2 + $0x68] ss:$0 sps:$4 sm:$0x11]  }
  0x81   : > { %v1862_v57 = vshrl.u32 %v4958_v63, 16  ;;  %v1866_v0 = vrot.slane %v1864_v22, 1  ;;  %v4435_v3 = vld [vmem:[%s5890_s3 + $0x1a0] sm:$0xff]   ;;  %v4439_v58 = vld [vmem:[%s5890_s3 + $0x1d8] sm:$0xff]   ;;  %v2633_v21 = vrot.slane %v4428_v7, 1  ;;  %vm2610_vm9 = vcmask 1046528  }
  0x82   : > { %v1835_v55 = vrot.slane %v1833_v30, 1  ;;  %v4447_v11 = vld [vmem:[%s5890_s3 + $0x220] sm:$0xff]   ;;  %v2636_v30 = vrot.slane %v4432_v50, 1  ;;  %v1874_v15 = vshrl.u32 %v4996_v49, 16  ;;  %v4443_v22 = vld [vmem:[%s5890_s3 + $0x1d0] sm:$0xff]  }
  0x83   : > { %1483 = vmatmul.mubr.bf16.gmra.mxu0 %v4996_v49  ;;  %v1867_v25 = vor.u32 %v1866_v0, %v1862_v57  ;;  %v4455_v57 = vld [vmem:[%s5890_s3 + $0x210] sm:$0xff]  }
  0x84   : > { %1490 = vmatprep.mubr.bf16.mxu0 %v5028_v53 }
  0x85   : > { %4218 = vmatmul.mubr.bf16.gmra.mxu1 %v5050_v9 }
  0x86   : > { %4221 = vmatprep.mubr.bf16.mxu1 %v4765_v42  ;;  %v5067_v42 = vld [vmem:[#allocation2 + $0x2c] ss:$0 sps:$4 sm:$0x11]  }
  0x87   : > { %v1809_v17 = vshll.u32 %v5067_v42, 16 }
  0x89   : > { %v1811_v13 = vrot.slane %v1809_v17, 1  ;;  %v1850_v17 = vshrl.u32 %v4941_v40, 16 }
  0x8b   : > { %1491 = vmatmul.mubr.bf16.gmra.mxu0 %v5004_v60  ;;  %v5121_v26 = vsel %vm1764_vm8, %v1807_v18, %v1811_v13  ;;  %v1888_v18 = vshll.u32 %v5004_v60, 16 }
  0x8c   : > { %1498 = vmatprep.mubr.bf16.mxu0 %v5070_v61 }
  0x8d   : > { %4222 = vmatmul.mubr.bf16.gmra.mxu1 %v4799_v28  ;;  %v769_v28 = vrot.slane %v4711_v36, 4  ;;  %v1828_v36 = vshll.u32 %v4869_v12, 16  ;;  %v4425_v12 = vld [vmem:[%s5890_s3 + $0x1f0] sm:$0xff]  }
  0x8e   : > { %4225 = vmatprep.mubr.bf16.mxu1 %v4847_v35  ;;  %v1818_v35 = vrot.slane %v1816_v38, 1  ;;  %v1842_v38 = vrot.slane %v1840_v24, 1  ;;  %v4433_v24 = vld [vmem:[#allocation2 + $0x74] ss:$0 sps:$4 sm:$0x11]  }
  0x8f   : > { %v954_v2 = vsel %vm4934_vm7, %v769_v28, %v953_v51  ;;  %v1830_v29 = vrot.slane %v1828_v36, 1  ;;  %v1854_v28 = vrot.slane %v1852_v56, 1  ;;  %v1857_v51 = vshll.u32 %v4428_v7, 16  ;;  %v4438_v36 = vld [vmem:[%s5890_s3 + $0x228] sm:$0xff]  }
  0x90   : > { %955 = vst [vmem:[#allocation2 + $0xb0] sm:$0x1] %v954_v2  ;;  %v1819_v4 = vor.u32 %v1818_v35, %v1814_v46  ;;  %v1843_v46 = vor.u32 %v1842_v38, %v1838_v23  ;;  %v4431_v35 = vld [vmem:[%s5890_s3 + $0x1a8] sm:$0xff]   ;;  %v1869_v2 = vshll.u32 %v4432_v50, 16  ;;  %v2638_v23 = vrot.slane %v4996_v49, 1 }
  0x91   : > { %v1831_v47 = vor.u32 %v1830_v29, %v1826_v14  ;;  %v1859_v13 = vrot.slane %v1857_v51, 1  ;;  %v2632_v14 = vrot.slane %v4941_v40, 1  ;;  %v2635_v29 = vrot.slane %v4958_v63, 1  ;;  %v4437_v7 = vld [vmem:[#allocation2 + $0x8c] ss:$0 sps:$4 sm:$0x11]  }
  0x92   : > { %v5130_v52 = vsel %vm1764_vm8, %v1819_v4, %v1823_v19  ;;  %v5166_v16 = vsel %vm1764_vm8, %v1843_v46, %v1847_v48  ;;  %v4436_v4 = vld [vmem:[#allocation2 + $0x80] ss:$0 sps:$4 sm:$0x11]   ;;  %v1855_v19 = vor.u32 %v1854_v28, %v1850_v17  ;;  %v2639_v38 = vrot.slane %v4433_v24, 1 }
  0x93   : > { %1499 = vmatmul.mubr.bf16.gmra.mxu0 %v5028_v53  ;;  %v5158_v59 = vsel %vm1764_vm8, %v1831_v47, %v1835_v55  ;;  %v5193_v31 = vsel %vm2610_vm9, %v2635_v29, %v2636_v30  ;;  %v2641_v63 = vrot.slane %v5004_v60, 1  ;;  %v1890_v47 = vrot.slane %v1888_v18, 1 }
  0x94   : > { %4245 = vmatprep.mubr.bf16.mxu0 %v5096_v54  ;;  %v5204_v56 = vsel %vm2610_vm9, %v2638_v23, %v2639_v38  ;;  %v1893_v55 = vshll.u32 %v4436_v4, 16  ;;  %v2644_v48 = vrot.slane %v5028_v53, 1  ;;  %v2645_v50 = vrot.slane %v4437_v7, 1  ;;  %v4442_v23 = vld [vmem:[#allocation2 + $0xa4] ss:$0 sps:$4 sm:$0x11]  }
  0x95   : > { %4226 = vmatmul.mubr.bf16.gmra.mxu1 %v5093_v10  ;;  %v1900_v51 = vshll.u32 %v5028_v53, 16  ;;  %v1898_v18 = vshrl.u32 %v5028_v53, 16  ;;  %v4452_v53 = vld [vmem:[%s5890_s3 + $0x1c0] sm:$0xff]   ;;  %v1924_v29 = vshll.u32 %v5050_v9, 16 }
  0x96   : > { %2224 = vmatprep.mubr.bf16.mxu1 %v5109_v8  ;;  %v5229_v0 = vsel %vm2610_vm9, %v2644_v48, %v2645_v50  ;;  %v4453_v38 = vld [vmem:[%s5890_s3 + $0x180] sm:$0xff]  }
  0x9b   : > { %4246 = vmatmul.mubr.bf16.vlgmr.msra.gmra.mxu0 %v5121_v26 }
  0x9c   : > { %4046 = vmatpush3.bf16.msra.mxu0 %v4422_v27  ;;  %4249 = vmatprep.mubr.bf16.mxu0 %v5130_v52  ;;  %v1871_v27 = vrot.slane %v1869_v2, 1  ;;  %v4441_v2 = vld [vmem:[#allocation2 + $0x98] ss:$0 sps:$4 sm:$0x11]  }
  0x9d   : > { %4047 = vmatprep.subr.bf16.mxu0 %v4425_v12  ;;  %2225 = vmatmul.mubr.bf16.vlgmr.msra.gmra.mxu1 %v1776_v33  ;;  %v5188_v12 = vsel %vm2610_vm9, %v2632_v14, %v2633_v21  ;;  %v1886_v33 = vshrl.u32 %v5004_v60, 16  ;;  %v4454_v60 = vld [vmem:[%s5890_s3 + $0x218] sm:$0xff]   ;;  %v4456_v14 = vld [vmem:[%s5890_s3 + $0x208] sm:$0xff]   ;;  %v2647_v21 = vrot.slane %v5070_v61, 1 }
  0x9e   : > { %4278 = vmatpush3.bf16.msra.mxu1 %v5024_v37  ;;  %2232 = vmatprep.mubr.bf16.mxu1 %v5096_v54  ;;  %v1876_v37 = vshll.u32 %v4996_v49, 16  ;;  %v4440_v49 = vld [vmem:[%s5890_s3 + $0x198] sm:$0xff]  }
  0x9f   : > { %4279 = vmatprep.subr.bf16.mxu1 %v4429_v41 }
  0xa0   : > { %4048 = vmatpush3.bf16.msra.mxu0 %v4426_v39  ;;  %v1878_v40 = vrot.slane %v1876_v37, 1  ;;  %v2642_v39 = vrot.slane %v4436_v4, 1  ;;  %v1891_v37 = vor.u32 %v1890_v47, %v1886_v33  ;;  %v1905_v4 = vshll.u32 %v4437_v7, 16  ;;  %v4464_v33 = vld [vmem:[#allocation2 + $0xa8] sm:$0xff]  }
  0xa1   : > { %4049 = vmatprep.subr.bf16.mxu0 %v4430_v62  ;;  %v5207_v62 = vsel %vm1764_vm8, %v1867_v25, %v1871_v27  ;;  %v2648_v27 = vrot.slane %v4441_v2, 1  ;;  %v1936_v7 = vshll.u32 %v4464_v33, 16  ;;  %v1922_v47 = vshrl.u32 %v5050_v9, 16 }
  0xa2   : > { %4280 = vmatpush3.bf16.msra.mxu1 %v4429_v41  ;;  %v1881_v41 = vshll.u32 %v4433_v24, 16  ;;  %v5216_v46 = vsel %vm2610_vm9, %v2641_v63, %v2642_v39  ;;  %v1879_v17 = vor.u32 %v1878_v40, %v1874_v15  ;;  %v4448_v24 = vld [vmem:[%s5890_s3 + $0x1c8] sm:$0xff]   ;;  %v1907_v15 = vrot.slane %v1905_v4, 1 }
  0xa3   : > { %4250 = vmatmul.mubr.bf16.gmra.mxu0 %v5158_v59  ;;  %4281 = vmatprep.subr.bf16.mxu1 %v4438_v36  ;;  %v5265_v40 = vsel %vm2610_vm9, %v2647_v21, %v2648_v27  ;;  %v1934_v48 = vshrl.u32 %v4464_v33, 16  ;;  %v1938_v50 = vrot.slane %v1936_v7, 1  ;;  %v2653_v27 = vrot.slane %v4464_v33, 1 }
  0xa4   : > { %4253 = vmatprep.mubr.bf16.mxu0 %v5166_v16  ;;  %4050 = vmatpush3.bf16.msra.mxu0 %v4431_v35  ;;  %v1883_v28 = vrot.slane %v1881_v41, 1  ;;  %v4444_v35 = vld [vmem:[%s5890_s3 + $0x190] sm:$0xff]  }
  0xa5   : > { %4051 = vmatprep.subr.bf16.mxu0 %v4434_v1  ;;  %2233 = vmatmul.mubr.bf16.gmra.mxu1 %v5109_v8  ;;  %v5197_v8 = vsel %vm1764_vm8, %v1855_v19, %v1859_v13  ;;  %v1895_v1 = vrot.slane %v1893_v55, 1  ;;  %v1902_v13 = vrot.slane %v1900_v51, 1  ;;  %v4449_v19 = vld [vmem:[%s5890_s3 + $0x188] sm:$0xff]   ;;  %v4445_v41 = vld [vmem:[#allocation2 + $0xb0] ss:$0 sps:$4 sm:$0x11]  }
  0xa6   : > { %2240 = vmatprep.mubr.bf16.mxu1 %v5121_v26  ;;  %4282 = vmatpush3.bf16.msra.mxu1 %v4438_v36  ;;  %v1912_v36 = vshll.u32 %v5070_v61, 16  ;;  %v1926_v55 = vrot.slane %v1924_v29, 1  ;;  %v2654_v29 = vrot.slane %v4445_v41, 1 }
  0xa7   : > { %4283 = vmatprep.subr.bf16.mxu1 %v4447_v11  ;;  %v5245_v25 = vsel %vm1764_vm8, %v1891_v37, %v1895_v1  ;;  %v1903_v30 = vor.u32 %v1902_v13, %v1898_v18  ;;  %v4465_v37 = vld [vmem:[#allocation2 + $0xb4] sm:$0xff]   ;;  %v4450_v18 = vld [vmem:[#allocation2 + $0xc8] ss:$0 sps:$4 sm:$0x11]   ;;  %v4466_v13 = vld [vmem:[#allocation2 + $0xc0] sm:$0xff]  }
  0xa8   : > { %4052 = vmatpush3.bf16.msra.mxu0 %v4435_v3  ;;  %v5238_v3 = vsel %vm1764_vm8, %v1879_v17, %v1883_v28  ;;  %v1941_v17 = vshll.u32 %v4445_v41, 16  ;;  %v2651_v28 = vrot.slane %v4442_v23, 1  ;;  %v1927_v51 = vor.u32 %v1926_v55, %v1922_v47 }
  0xa9   : > { %4053 = vmatprep.subr.bf16.mxu0 %v4439_v58  ;;  %v1914_v58 = vrot.slane %v1912_v36, 1  ;;  %v1948_v1 = vshll.u32 %v4465_v37, 16  ;;  %v1939_v36 = vor.u32 %v1938_v50, %v1934_v48  ;;  %v1960_v4 = vshll.u32 %v4466_v13, 16 }
  0xaa   : > { %4284 = vmatpush3.bf16.msra.mxu1 %v4447_v11  ;;  %v1917_v11 = vshll.u32 %v4441_v2, 16  ;;  %v1965_v21 = vshll.u32 %v4450_v18, 16  ;;  %v1970_v41 = vshrl.u32 %v5093_v10, 16  ;;  %v2656_v55 = vrot.slane %v4465_v37, 1 }
  0xab   : > { %4254 = vmatmul.mubr.bf16.gmra.mxu0 %v5197_v8  ;;  %4285 = vmatprep.subr.bf16.mxu1 %v4454_v60 }
  0xac   : > { %4257 = vmatprep.mubr.bf16.mxu0 %v5207_v62  ;;  %4054 = vmatpush3.bf16.msra.mxu0 %v4440_v49  ;;  %v1919_v39 = vrot.slane %v1917_v11, 1  ;;  %v5270_v49 = vsel %vm1764_vm8, %v1903_v30, %v1907_v15  ;;  %v4451_v15 = vld [vmem:[#allocation2 + $0xd4] ss:$0 sps:$4 sm:$0x11]  }
  0xad   : > { %4055 = vmatprep.subr.bf16.mxu0 %v4443_v22  ;;  %2241 = vmatmul.mubr.bf16.gmra.mxu1 %v5096_v54  ;;  %v1910_v54 = vshrl.u32 %v5070_v61, 16  ;;  %v4457_v61 = vld [vmem:[%s5890_s3 + $0x200] sm:$0xff]   ;;  %v1929_v22 = vshll.u32 %v4442_v23, 16  ;;  %v1972_v23 = vshll.u32 %v5093_v10, 16  ;;  %v1977_v7 = vshll.u32 %v4451_v15, 16 }
  0xae   : > { %2248 = vmatprep.mubr.bf16.mxu1 %v5130_v52  ;;  %4286 = vmatpush3.bf16.msra.mxu1 %v4454_v60 }
  0xaf   : > { %4287 = vmatprep.subr.bf16.mxu1 %v4455_v57  ;;  %v1915_v63 = vor.u32 %v1914_v58, %v1910_v54  ;;  %v1950_v54 = vrot.slane %v1948_v1, 1  ;;  %v1974_v33 = vrot.slane %v1972_v23, 1  ;;  %v2663_v1 = vrot.slane %v4451_v15, 1 }
  0xb0   : > { %4056 = vmatpush3.bf16.msra.mxu0 %v4444_v35  ;;  %v1931_v35 = vrot.slane %v1929_v22, 1 }
  0xb1   : > { %4057 = vmatprep.subr.bf16.mxu0 %v4448_v24  ;;  %v5274_v60 = vsel %vm1764_vm8, %v1915_v63, %v1919_v39  ;;  %v1943_v24 = vrot.slane %v1941_v17, 1  ;;  %v1967_v63 = vrot.slane %v1965_v21, 1  ;;  %v1975_v48 = vor.u32 %v1974_v33, %v1970_v41 }
  0xb2   : > { %4288 = vmatpush3.bf16.msra.mxu1 %v4455_v57  ;;  %v4446_v57 = vld [vmem:[#allocation2 + $0xbc] ss:$0 sps:$4 sm:$0x11]   ;;  %v2614_v17 = vrot.slane %v5055_v45, 1  ;;  %v2612_v45 = vrot.slane %v5074_v32, 1  ;;  %v4468_v32 = vld [vmem:[#allocation2 + $0x24] sm:$0xff]  }
  0xb3   : > { %4258 = vmatmul.mubr.bf16.gmra.mxu0 %v5238_v3  ;;  %4289 = vmatprep.subr.bf16.mxu1 %v4456_v14  ;;  %v1953_v58 = vshll.u32 %v4446_v57, 16  ;;  %v5288_v11 = vsel %vm1764_vm8, %v1939_v36, %v1943_v24  ;;  %v2657_v22 = vrot.slane %v4446_v57, 1  ;;  %v2660_v57 = vrot.slane %v4450_v18, 1 }
  0xb4   : > { %4261 = vmatprep.mubr.bf16.mxu0 %v5245_v25  ;;  %4058 = vmatpush3.bf16.msra.mxu0 %v4449_v19  ;;  %v1946_v19 = vshrl.u32 %v4465_v37, 16  ;;  %v2662_v37 = vrot.slane %v5093_v10, 1  ;;  %v2611_v36 = vrot.slane %v5084_v44, 1  ;;  %v2620_v18 = vrot.slane %v4468_v32, 1 }
  0xb5   : > { %4059 = vmatprep.subr.bf16.mxu0 %v4452_v53  ;;  %2249 = vmatmul.mubr.bf16.gmra.mxu1 %v5121_v26  ;;  %v2650_v26 = vrot.slane %v5050_v9, 1  ;;  %v5285_v9 = vsel %vm1764_vm8, %v1927_v51, %v1931_v35  ;;  %v1958_v53 = vshrl.u32 %v4466_v13, 16  ;;  %v1955_v30 = vrot.slane %v1953_v58, 1 }
  0xb6   : > { %2256 = vmatprep.mubr.bf16.mxu1 %v5158_v59  ;;  %4290 = vmatpush3.bf16.msra.mxu1 %v4456_v14  ;;  %v1962_v14 = vrot.slane %v1960_v4, 1  ;;  %v5308_v50 = vsel %vm2610_vm9, %v2656_v55, %v2657_v22  ;;  %v2659_v35 = vrot.slane %v4466_v13, 1  ;;  %v2618_v4 = vrot.slane %v5045_v6, 1 }
  0xb7   : > { %4291 = vmatprep.subr.bf16.mxu1 %v4457_v61  ;;  %v5280_v2 = vsel %vm2610_vm9, %v2650_v26, %v2651_v28  ;;  %v2615_v26 = vrot.slane %v5053_v5, 1  ;;  %v2613_v10 = vsel %vm2610_vm9, %v2611_v36, %v2612_v45  ;;  %v2621_v13 = vrot.slane %v5067_v42, 1 }
  0xb8   : > { %4060 = vmatpush3.bf16.msra.mxu0 %v4453_v38  ;;  %v5294_v38 = vsel %vm2610_vm9, %v2653_v27, %v2654_v29  ;;  %v5320_v5 = vsel %vm2610_vm9, %v2659_v35, %v2660_v57  ;;  %v2624_v58 = vrot.slane %v5079_v43, 1  ;;  %v4471_v29 = vld [vmem:[#allocation2 + $0x48] sm:$0xff]  }
  0xb9   : > { %v2616_v51 = vsel %vm2610_vm9, %v2614_v17, %v2615_v26  ;;  %v5337_v6 = vsel %vm2610_vm9, %v2620_v18, %v2621_v13 }
  0xba   : > { %4292 = vmatpush3.bf16.msra.mxu1 %v4457_v61  ;;  %v1963_v61 = vor.u32 %v1962_v14, %v1958_v53  ;;  %v2627_v14 = vrot.slane %v5112_v34, 1 }
  0xbb   : > { %4262 = vmatmul.mubr.bf16.gmra.mxu0 %v5270_v49 }
  0xbc   : > { %4265 = vmatprep.mubr.bf16.mxu0 %v5274_v60  ;;  %v5303_v47 = vsel %vm1764_vm8, %v1963_v61, %v1967_v63 }
  0xbd   : > { %2257 = vmatmul.mubr.bf16.gmra.mxu1 %v5130_v52  ;;  %v1951_v52 = vor.u32 %v1950_v54, %v1946_v19  ;;  %v5324_v19 = vsel %vm2610_vm9, %v2662_v37, %v2663_v1 }
  0xbe   : > { %2264 = vmatprep.mubr.bf16.mxu1 %v5166_v16 }
  0xbf   : > { %v5299_v39 = vsel %vm1764_vm8, %v1951_v52, %v1955_v30  ;;  %v2629_v52 = vrot.slane %v4471_v29, 1  ;;  %v2630_v30 = vrot.slane %v5114_v20, 1 }
  0xc1   : > { %v5364_v61 = vsel %vm2610_vm9, %v2629_v52, %v2630_v30 }
  0xc3   : > { %4266 = vmatmul.mubr.bf16.gmra.mxu0 %v5285_v9 }
  0xc4   : > { %4269 = vmatprep.mubr.bf16.mxu0 %v5288_v11 }
  0xc5   : > { %2265 = vmatmul.mubr.bf16.gmra.mxu1 %v5158_v59  ;;  %v1979_v59 = vrot.slane %v1977_v7, 1 }
  0xc6   : > { %2272 = vmatprep.mubr.bf16.mxu1 %v5197_v8 }
  0xc7   : > { %v1980_v28 = vsel %vm1764_vm8, %v1975_v48, %v1979_v59 }
  0xcb   : > { %4270 = vmatmul.mubr.bf16.gmra.mxu0 %v5299_v39 }
  0xcc   : > { %4273 = vmatprep.mubr.bf16.mxu0 %v5303_v47 }
  0xcd   : > { %2273 = vmatmul.mubr.bf16.gmra.mxu1 %v5166_v16  ;;  %v4467_v16 = vld [vmem:[#allocation2 + $0x18] sm:$0xff]  }
  0xce   : > { %2280 = vmatprep.mubr.bf16.mxu1 %v5207_v62  ;;  %v2617_v24 = vrot.slane %v4467_v16, 1 }
  0xd0   : > { %v5330_v44 = vsel %vm2610_vm9, %v2617_v24, %v2618_v4 }
  0xd3   : > { %4274 = vmatmul.mubr.bf16.gmra.mxu0 %v1980_v28 }
  0xd4   : > { %2908 = vmatprep.mubr.bf16.mxu0 %v2616_v51 }
  0xd5   : > { %2281 = vmatmul.mubr.bf16.gmra.mxu1 %v5197_v8  ;;  %v4469_v8 = vld [vmem:[#allocation2 + $0x30] sm:$0xff]  }
  0xd6   : > { %2288 = vmatprep.mubr.bf16.mxu1 %v5238_v3  ;;  %v2623_v54 = vrot.slane %v4469_v8, 1 }
  0xd8   : > { %v5344_v42 = vsel %vm2610_vm9, %v2623_v54, %v2624_v58 }
  0xdb   : > { %2909 = vmatmul.mubr.bf16.vlgmr.msra.gmra.mxu0 %v2613_v10 }
  0xdc   : > { %2916 = vmatprep.mubr.bf16.mxu0 %v5330_v44 }
  0xdd   : > { %2289 = vmatmul.mubr.bf16.gmra.mxu1 %v5207_v62  ;;  %v4470_v62 = vld [vmem:[#allocation2 + $0x3c] sm:$0xff]  }
  0xde   : > { %2296 = vmatprep.mubr.bf16.mxu1 %v5245_v25  ;;  %v2626_v53 = vrot.slane %v4470_v62, 1 }
  0xe0   : > { %v5352_v43 = vsel %vm2610_vm9, %v2626_v53, %v2627_v14 }
  0xe3   : > { %2917 = vmatmul.mubr.bf16.gmra.mxu0 %v2616_v51 }
  0xe4   : > { %2924 = vmatprep.mubr.bf16.mxu0 %v5337_v6 }
  0xe5   : > { %2297 = vmatmul.mubr.bf16.gmra.mxu1 %v5238_v3 }
  0xe6   : > { %2304 = vmatprep.mubr.bf16.mxu1 %v5270_v49 }
  0xeb   : > { %2925 = vmatmul.mubr.bf16.gmra.mxu0 %v5330_v44 }
  0xec   : > { %2932 = vmatprep.mubr.bf16.mxu0 %v5344_v42 }
  0xed   : > { %2305 = vmatmul.mubr.bf16.gmra.mxu1 %v5245_v25 }
  0xee   : > { %2312 = vmatprep.mubr.bf16.mxu1 %v5274_v60 }
  0xf3   : > { %v3789_v3 = vpop.f32.mrf.mxu0  ;;  %2933 = vmatmul.mubr.bf16.gmra.mxu0 %v5337_v6 }
  0xf4   : > { %2940 = vmatprep.mubr.bf16.mxu0 %v5352_v43 }
  0xf5   : > { %v3790_v21 = vpop.f32.mrf.mxu0  ;;  %2313 = vmatmul.mubr.bf16.gmra.mxu1 %v5270_v49 }
  0xf6   : > { %v5356_v27 = vadd.f32 %v3790_v21, %v3789_v3  ;;  %2320 = vmatprep.mubr.bf16.mxu1 %v5285_v9 }
  0xf7   : > { %v3792_v34 = vpop.f32.mrf.mxu0  ;;  %v3861_v25 = vpop.f32.mrf.mxu1 }
  0xf9   : > { %v3793_v15 = vpop.f32.mrf.mxu0  ;;  %v3862_v63 = vpop.f32.mrf.mxu1 }
  0xfa   : > { %v5361_v23 = vadd.f32 %v3793_v15, %v3792_v34  ;;  %v5367_v41 = vadd.f32 %v3862_v63, %v3861_v25 }
  0xfb   : > { %2941 = vmatmul.mubr.bf16.gmra.mxu0 %v5344_v42  ;;  %v3864_v33 = vpop.f32.mrf.mxu1 }
  0xfc   : > { %2948 = vmatprep.mubr.bf16.mxu0 %v5364_v61 }
  0xfd   : > { %2321 = vmatmul.mubr.bf16.gmra.mxu1 %v5274_v60  ;;  %v3865_v20 = vpop.f32.mrf.mxu1 }
  0xfe   : > { %v5371_v49 = vadd.f32 %v3865_v20, %v3864_v33  ;;  %2328 = vmatprep.mubr.bf16.mxu1 %v5288_v11 }
 0x101   : > { %v3795_v7 = vpop.f32.mrf.mxu0 }
 0x103   : > { %2949 = vmatmul.mubr.bf16.gmra.mxu0 %v5352_v43  ;;  %v3796_v55 = vpop.f32.mrf.mxu0 }
 0x104   : > { %v3797_v22 = vadd.f32 %v3796_v55, %v3795_v7  ;;  %2956 = vmatprep.mubr.bf16.mxu0 %v5188_v12  ;;  %v3867_v48 = vpop.f32.mrf.mxu1 }
 0x105   : > { %v3798_v59 = vpop.f32.mrf.mxu0  ;;  %2329 = vmatmul.mubr.bf16.gmra.mxu1 %v5285_v9 }
 0x106   : > { %v3868_v17 = vpop.f32.mrf.mxu1  ;;  %2336 = vmatprep.mubr.bf16.mxu1 %v5299_v39 }
 0x107   : > { %v3799_v26 = vpop.f32.mrf.mxu0  ;;  %v5378_v60 = vadd.f32 %v3868_v17, %v3867_v48 }
 0x108   : > { %v3800_v28 = vadd.f32 %v3799_v26, %v3798_v59  ;;  %v3870_v51 = vpop.f32.mrf.mxu1 }
 0x109   : > { %v3801_v35 = vpop.f32.mrf.mxu0 }
 0x10a   : > { %v3871_v57 = vpop.f32.mrf.mxu1 }
 0x10b   : > { %2957 = vmatmul.mubr.bf16.gmra.mxu0 %v5364_v61  ;;  %v3802_v37 = vpop.f32.mrf.mxu0  ;;  %v5381_v1 = vadd.f32 %v3871_v57, %v3870_v51 }
 0x10c   : > { %v3803_v36 = vadd.f32 %v3802_v37, %v3801_v35  ;;  %2964 = vmatprep.mubr.bf16.mxu0 %v5193_v31  ;;  %v3873_v45 = vpop.f32.mrf.mxu1 }
 0x10d   : > { %v3804_v9 = vpop.f32.mrf.mxu0  ;;  %2337 = vmatmul.mubr.bf16.gmra.mxu1 %v5288_v11 }
 0x10e   : > { %v3874_v16 = vpop.f32.mrf.mxu1  ;;  %2344 = vmatprep.mubr.bf16.mxu1 %v5303_v47 }
 0x10f   : > { %v3805_v24 = vpop.f32.mrf.mxu0  ;;  %v5386_v4 = vadd.f32 %v3874_v16, %v3873_v45 }
 0x110   : > { %v3806_v10 = vadd.f32 %v3805_v24, %v3804_v9  ;;  %v3876_v32 = vpop.f32.mrf.mxu1 }
 0x112   : > { %v3877_v18 = vpop.f32.mrf.mxu1 }
 0x113   : > { %v3807_v13 = vpop.f32.mrf.mxu0  ;;  %2965 = vmatmul.mubr.bf16.gmra.mxu0 %v5188_v12  ;;  %v5389_v8 = vadd.f32 %v3877_v18, %v3876_v32 }
 0x114   : > { %2972 = vmatprep.mubr.bf16.mxu0 %v5204_v56 }
 0x115   : > { %v3808_v54 = vpop.f32.mrf.mxu0  ;;  %v3879_v58 = vpop.f32.mrf.mxu1  ;;  %2345 = vmatmul.mubr.bf16.gmra.mxu1 %v5299_v39 }
 0x116   : > { %v3809_v11 = vadd.f32 %v3808_v54, %v3807_v13  ;;  %4293 = vmatprep.mubr.bf16.mxu1 %v5330_v44 }
 0x117   : > { %v3810_v62 = vpop.f32.mrf.mxu0  ;;  %v3880_v47 = vpop.f32.mrf.mxu1 }
 0x118   : > { %v5394_v53 = vadd.f32 %v3880_v47, %v3879_v58 }
 0x119   : > { %v3811_v14 = vpop.f32.mrf.mxu0  ;;  %v3882_v3 = vpop.f32.mrf.mxu1 }
 0x11a   : > { %v3812_v21 = vadd.f32 %v3811_v14, %v3810_v62 }
 0x11b   : > { %v3813_v29 = vpop.f32.mrf.mxu0  ;;  %2973 = vmatmul.mubr.bf16.gmra.mxu0 %v5193_v31  ;;  %v3883_v52 = vpop.f32.mrf.mxu1 }
 0x11c   : > { %2980 = vmatprep.mubr.bf16.mxu0 %v5216_v46  ;;  %v5398_v30 = vadd.f32 %v3883_v52, %v3882_v3 }
 0x11d   : > { %v3814_v34 = vpop.f32.mrf.mxu0  ;;  %v4199_v39 = vpop.f32.mrf.mxu1  ;;  %4294 = vmatmul.mubr.bf16.vlgmr.msra.gmra.mxu1 %v5337_v6 }
 0x11e   : > { %v3815_v25 = vadd.f32 %v3814_v34, %v3813_v29  ;;  %v5401_v44 = vadd.f32 %v4199_v39, %v3797_v22  ;;  %4297 = vmatprep.mubr.bf16.mxu1 %v5344_v42 }
 0x11f   : > { %v3816_v15 = vpop.f32.mrf.mxu0  ;;  %v1573_v63 = vpop.f32.mrf.mxu1 }
 0x120   : > { %v5405_v33 = vadd.f32 %v5356_v27, %v1573_v63 }
 0x121   : > { %v3817_v20 = vpop.f32.mrf.mxu0  ;;  %v4200_v7 = vpop.f32.mrf.mxu1 }
 0x122   : > { %v3818_v55 = vadd.f32 %v3817_v20, %v3816_v15  ;;  %v5407_v48 = vadd.f32 %v4200_v7, %v3800_v28 }
 0x123   : > { %v3819_v59 = vpop.f32.mrf.mxu0  ;;  %2981 = vmatmul.mubr.bf16.gmra.mxu0 %v5204_v56  ;;  %v1576_v17 = vpop.f32.mrf.mxu1 }
 0x124   : > { %2988 = vmatprep.mubr.bf16.mxu0 %v5229_v0  ;;  %v5412_v6 = vadd.f32 %v5361_v23, %v1576_v17 }
 0x125   : > { %v3820_v22 = vpop.f32.mrf.mxu0  ;;  %v4203_v42 = vpop.f32.mrf.mxu1  ;;  %4298 = vmatmul.mubr.bf16.gmra.mxu1 %v5352_v43 }
 0x126   : > { %v3821_v27 = vadd.f32 %v3820_v22, %v3819_v59  ;;  %v5415_v26 = vadd.f32 %v4203_v42, %v3809_v11  ;;  %4301 = vmatprep.mubr.bf16.mxu1 %v5364_v61 }
 0x127   : > { %v3822_v51 = vpop.f32.mrf.mxu0  ;;  %v1589_v28 = vpop.f32.mrf.mxu1 }
 0x128   : > { %v5418_v35 = vadd.f32 %v3803_v36, %v1589_v28 }
 0x129   : > { %v3823_v57 = vpop.f32.mrf.mxu0  ;;  %v4204_v37 = vpop.f32.mrf.mxu1 }
 0x12a   : > { %v3824_v45 = vadd.f32 %v3823_v57, %v3822_v51  ;;  %v5420_v9 = vadd.f32 %v4204_v37, %v3812_v21 }
 0x12b   : > { %v3825_v23 = vpop.f32.mrf.mxu0  ;;  %2989 = vmatmul.mubr.bf16.gmra.mxu0 %v5216_v46  ;;  %v1592_v16 = vpop.f32.mrf.mxu1 }
 0x12c   : > { %2996 = vmatprep.mubr.bf16.mxu0 %v5265_v40  ;;  %v5424_v43 = vadd.f32 %v3806_v10, %v1592_v16 }
 0x12d   : > { %v3826_v24 = vpop.f32.mrf.mxu0  ;;  %v4207_v32 = vpop.f32.mrf.mxu1  ;;  %4302 = vmatmul.mubr.bf16.gmra.mxu1 %v5188_v12 }
 0x12e   : > { %v3827_v61 = vadd.f32 %v3826_v24, %v3825_v23  ;;  %v5427_v36 = vadd.f32 %v4207_v32, %v3821_v27  ;;  %4305 = vmatprep.mubr.bf16.mxu1 %v5193_v31 }
 0x12f   : > { %v3828_v18 = vpop.f32.mrf.mxu0  ;;  %v1605_v13 = vpop.f32.mrf.mxu1 }
 0x130   : > { %v5430_v54 = vadd.f32 %v3815_v25, %v1605_v13 }
 0x131   : > { %v3829_v58 = vpop.f32.mrf.mxu0  ;;  %v4208_v11 = vpop.f32.mrf.mxu1 }
 0x132   : > { %v3830_v62 = vadd.f32 %v3829_v58, %v3828_v18  ;;  %v5432_v47 = vadd.f32 %v4208_v11, %v3824_v45 }
 0x133   : > { %v3831_v10 = vpop.f32.mrf.mxu0  ;;  %2997 = vmatmul.mubr.bf16.gmra.mxu0 %v5229_v0  ;;  %v1608_v14 = vpop.f32.mrf.mxu1 }
 0x134   : > { %3004 = vmatprep.mubr.bf16.mxu0 %v5280_v2  ;;  %v5436_v12 = vadd.f32 %v3818_v55, %v1608_v14 }
 0x135   : > { %v3832_v3 = vpop.f32.mrf.mxu0  ;;  %v4211_v21 = vpop.f32.mrf.mxu1  ;;  %4306 = vmatmul.mubr.bf16.gmra.mxu1 %v5204_v56 }
 0x136   : > { %v3833_v31 = vadd.f32 %v3832_v3, %v3831_v10  ;;  %4309 = vmatprep.mubr.bf16.mxu1 %v5216_v46 }
 0x137   : > { %v3834_v29 = vpop.f32.mrf.mxu0  ;;  %v1621_v34 = vpop.f32.mrf.mxu1 }
 0x138   : > { %v5440_v52 = vadd.f32 %v4211_v21, %v3833_v31  ;;  %v5442_v39 = vadd.f32 %v3827_v61, %v1621_v34 }
 0x139   : > { %v3835_v25 = vpop.f32.mrf.mxu0  ;;  %v4212_v15 = vpop.f32.mrf.mxu1 }
 0x13a   : > { %v3836_v63 = vadd.f32 %v3835_v25, %v3834_v29 }
 0x13b   : > { %v3837_v20 = vpop.f32.mrf.mxu0  ;;  %3005 = vmatmul.mubr.bf16.gmra.mxu0 %v5265_v40  ;;  %v1624_v55 = vpop.f32.mrf.mxu1 }
 0x13c   : > { %v5445_v7 = vadd.f32 %v4212_v15, %v3836_v63  ;;  %3012 = vmatprep.mubr.bf16.mxu0 %v5294_v38  ;;  %v5448_v56 = vadd.f32 %v3830_v62, %v1624_v55 }
 0x13d   : > { %v3838_v59 = vpop.f32.mrf.mxu0  ;;  %v4215_v46 = vpop.f32.mrf.mxu1  ;;  %4310 = vmatmul.mubr.bf16.gmra.mxu1 %v5229_v0 }
 0x13e   : > { %v3839_v17 = vadd.f32 %v3838_v59, %v3837_v20  ;;  %4313 = vmatprep.mubr.bf16.mxu1 %v5265_v40 }
 0x13f   : > { %v3840_v22 = vpop.f32.mrf.mxu0  ;;  %v1637_v42 = vpop.f32.mrf.mxu1 }
 0x140   : > { %v5452_v27 = vadd.f32 %v3839_v17, %v1637_v42 }
 0x141   : > { %v3841_v51 = vpop.f32.mrf.mxu0  ;;  %v4216_v28 = vpop.f32.mrf.mxu1 }
 0x142   : > { %v3842_v57 = vadd.f32 %v3841_v51, %v3840_v22 }
 0x143   : > { %v3843_v37 = vpop.f32.mrf.mxu0  ;;  %3013 = vmatmul.mubr.bf16.gmra.mxu0 %v5280_v2  ;;  %v1640_v45 = vpop.f32.mrf.mxu1 }
 0x144   : > { %3020 = vmatprep.mubr.bf16.mxu0 %v5308_v50  ;;  %v5456_v23 = vadd.f32 %v3842_v57, %v1640_v45 }
 0x145   : > { %v3844_v16 = vpop.f32.mrf.mxu0  ;;  %v4219_v0 = vpop.f32.mrf.mxu1  ;;  %4314 = vmatmul.mubr.bf16.gmra.mxu1 %v5280_v2 }
 0x146   : > { %v3845_v24 = vadd.f32 %v3844_v16, %v3843_v37  ;;  %4317 = vmatprep.mubr.bf16.mxu1 %v5294_v38 }
 0x147   : > { %v3846_v40 = vpop.f32.mrf.mxu0  ;;  %v1653_v61 = vpop.f32.mrf.mxu1 }
 0x148   : > { %v5460_v32 = vadd.f32 %v4215_v46, %v3845_v24 }
 0x149   : > { %v3847_v18 = vpop.f32.mrf.mxu0  ;;  %v4220_v13 = vpop.f32.mrf.mxu1 }
 0x14a   : > { %v3848_v58 = vadd.f32 %v3847_v18, %v3846_v40 }
 0x14b   : > { %v3849_v11 = vpop.f32.mrf.mxu0  ;;  %3021 = vmatmul.mubr.bf16.gmra.mxu0 %v5294_v38  ;;  %v1656_v10 = vpop.f32.mrf.mxu1 }
 0x14c   : > { %v5463_v62 = vadd.f32 %v4216_v28, %v3848_v58  ;;  %3028 = vmatprep.mubr.bf16.mxu0 %v5320_v5 }
 0x14d   : > { %v3850_v14 = vpop.f32.mrf.mxu0  ;;  %v4223_v2 = vpop.f32.mrf.mxu1  ;;  %4318 = vmatmul.mubr.bf16.gmra.mxu1 %v5308_v50 }
 0x14e   : > { %v3851_v3 = vadd.f32 %v3850_v14, %v3849_v11  ;;  %v5468_v21 = vadd.f32 %v4223_v2, %v5378_v60  ;;  %4321 = vmatprep.mubr.bf16.mxu1 %v5320_v5 }
 0x14f   : > { %v3852_v31 = vpop.f32.mrf.mxu0  ;;  %v1669_v34 = vpop.f32.mrf.mxu1 }
 0x150   : > { %v5471_v29 = vadd.f32 %v3851_v3, %v1653_v61  ;;  %v5474_v38 = vadd.f32 %v5367_v41, %v1669_v34 }
 0x151   : > { %v3853_v25 = vpop.f32.mrf.mxu0  ;;  %v4224_v15 = vpop.f32.mrf.mxu1 }
 0x152   : > { %v3854_v63 = vadd.f32 %v3853_v25, %v3852_v31  ;;  %v5477_v20 = vadd.f32 %v4224_v15, %v5381_v1 }
 0x153   : > { %v3855_v55 = vpop.f32.mrf.mxu0  ;;  %3029 = vmatmul.mubr.bf16.gmra.mxu0 %v5308_v50  ;;  %v1672_v59 = vpop.f32.mrf.mxu1 }
 0x154   : > { %v5480_v60 = vadd.f32 %v3854_v63, %v1656_v10  ;;  %v5483_v5 = vadd.f32 %v5371_v49, %v1672_v59 }
 0x155   : > { %v3856_v46 = vpop.f32.mrf.mxu0  ;;  %v4227_v17 = vpop.f32.mrf.mxu1  ;;  %4322 = vmatmul.mubr.bf16.gmra.mxu1 %v5324_v19 }
 0x156   : > { %v3857_v41 = vadd.f32 %v3856_v46, %v3855_v55  ;;  %v5487_v22 = vadd.f32 %v4227_v17, %v5394_v53 }
 0x157   : > { %v3858_v42 = vpop.f32.mrf.mxu0  ;;  %v1685_v51 = vpop.f32.mrf.mxu1 }
 0x158   : > { %5900 = vst [vmem:[#allocation3_spill] sm:$0xff] %v5487_v22  ;;  %v5489_v1 = vadd.f32 %v4219_v0, %v3857_v41  ;;  %v5492_v50 = vadd.f32 %v5386_v4, %v1685_v51 }
 0x159   : > { %v3859_v28 = vpop.f32.mrf.mxu0  ;;  %v4228_v57 = vpop.f32.mrf.mxu1 }
 0x15a   : > { %v3860_v37 = vadd.f32 %v3859_v28, %v3858_v42  ;;  %v5495_v49 = vadd.f32 %v4228_v57, %v5398_v30 }
 0x15b   : > { %v4247_v45 = vpop.f32.mrf.mxu0  ;;  %v1688_v19 = vpop.f32.mrf.mxu1 }
 0x15c   : > { %5901 = vst [vmem:[#allocation4_spill] sm:$0xff] %v5495_v49  ;;  %v5497_v16 = vadd.f32 %v4220_v13, %v3860_v37  ;;  %v5500_v53 = vadd.f32 %v5389_v8, %v1688_v19 }
 0x15d   : > { %v2387_v24 = vpop.f32.mrf.mxu0  ;;  %v3925_v0 = vpop.f32.mrf.mxu1 }
 0x15f   : > { %v4248_v40 = vpop.f32.mrf.mxu0  ;;  %v3926_v61 = vpop.f32.mrf.mxu1 }
 0x160   : > { %v3927_v18 = vadd.f32 %v3926_v61, %v3925_v0 }
 0x161   : > { %v2390_v4 = vpop.f32.mrf.mxu0  ;;  %v3928_v58 = vpop.f32.mrf.mxu1 }
 0x162   : > { %v2388_v11 = vadd.f32 %v3927_v18, %v2387_v24 }
 0x163   : > { %v4251_v10 = vpop.f32.mrf.mxu0  ;;  %v3929_v14 = vpop.f32.mrf.mxu1 }
 0x164   : > { %v5503_v30 = vadd.f32 %v2388_v11, %v5405_v33  ;;  %v3930_v2 = vadd.f32 %v3929_v14, %v3928_v58 }
 0x165   : > { %v2403_v13 = vpop.f32.mrf.mxu0  ;;  %v3931_v3 = vpop.f32.mrf.mxu1 }
 0x166   : > { %v2391_v31 = vadd.f32 %v3930_v2, %v2390_v4 }
 0x167   : > { %v4252_v34 = vpop.f32.mrf.mxu0  ;;  %v3932_v8 = vpop.f32.mrf.mxu1 }
 0x168   : > { %v5506_v25 = vadd.f32 %v2391_v31, %v5412_v6  ;;  %v3933_v15 = vadd.f32 %v3932_v8, %v3931_v3 }
 0x169   : > { %v2406_v63 = vpop.f32.mrf.mxu0  ;;  %v3934_v55 = vpop.f32.mrf.mxu1 }
 0x16a   : > { %v2396_v59 = vadd.f32 %v4247_v45, %v3933_v15 }
 0x16b   : > { %v4255_v46 = vpop.f32.mrf.mxu0  ;;  %v3935_v17 = vpop.f32.mrf.mxu1 }
 0x16c   : > { %v5509_v41 = vadd.f32 %v2396_v59, %v5401_v44  ;;  %v3936_v33 = vadd.f32 %v3935_v17, %v3934_v55 }
 0x16d   : > { %v2419_v42 = vpop.f32.mrf.mxu0  ;;  %v3937_v51 = vpop.f32.mrf.mxu1 }
 0x16e   : > { %v2399_v28 = vadd.f32 %v4248_v40, %v3936_v33 }
 0x16f   : > { %v4256_v57 = vpop.f32.mrf.mxu0  ;;  %v3938_v37 = vpop.f32.mrf.mxu1 }
 0x170   : > { %v5512_v19 = vadd.f32 %v2399_v28, %v5407_v48  ;;  %v3939_v6 = vadd.f32 %v3938_v37, %v3937_v51 }
 0x171   : > { %v2422_v24 = vpop.f32.mrf.mxu0  ;;  %v3940_v0 = vpop.f32.mrf.mxu1 }
 0x172   : > { %v2404_v61 = vadd.f32 %v3939_v6, %v2403_v13 }
 0x173   : > { %v5514_v18 = vpop.f32.mrf.mxu0  ;;  %v3941_v45 = vpop.f32.mrf.mxu1 }
 0x174   : > { %v5517_v4 = vadd.f32 %v2404_v61, %v5418_v35  ;;  %v3942_v44 = vadd.f32 %v3941_v45, %v3940_v0 }
 0x175   : > { %v2435_v58 = vpop.f32.mrf.mxu0  ;;  %v3943_v11 = vpop.f32.mrf.mxu1 }
 0x176   : > { %v2407_v14 = vadd.f32 %v3942_v44, %v2406_v63 }
 0x177   : > { %v5519_v40 = vpop.f32.mrf.mxu0  ;;  %v3944_v2 = vpop.f32.mrf.mxu1 }
 0x178   : > { %v5522_v48 = vadd.f32 %v2407_v14, %v5424_v43  ;;  %v3945_v3 = vadd.f32 %v3944_v2, %v3943_v11 }
 0x179   : > { %v2438_v31 = vpop.f32.mrf.mxu0  ;;  %v3946_v8 = vpop.f32.mrf.mxu1 }
 0x17a   : > { %v2412_v13 = vadd.f32 %v4251_v10, %v3945_v3 }
 0x17b   : > { %v5524_v15 = vpop.f32.mrf.mxu0  ;;  %v3947_v55 = vpop.f32.mrf.mxu1 }
 0x17c   : > { %v5527_v35 = vadd.f32 %v2412_v13, %v5415_v26  ;;  %v3948_v59 = vadd.f32 %v3947_v55, %v3946_v8 }
 0x17d   : > { %v5529_v17 = vpop.f32.mrf.mxu0  ;;  %v3949_v63 = vpop.f32.mrf.mxu1 }
 0x17e   : > { %v2415_v33 = vadd.f32 %v4252_v34, %v3948_v59 }
 0x17f   : > { %v5531_v51 = vpop.f32.mrf.mxu0  ;;  %v3950_v28 = vpop.f32.mrf.mxu1 }
 0x180   : > { %v5534_v43 = vadd.f32 %v2415_v33, %v5420_v9  ;;  %v3951_v37 = vadd.f32 %v3950_v28, %v3949_v63 }
 0x181   : > { %v5536_v6 = vpop.f32.mrf.mxu0  ;;  %v3952_v10 = vpop.f32.mrf.mxu1 }
 0x182   : > { %v2420_v0 = vadd.f32 %v3951_v37, %v2419_v42 }
 0x183   : > { %v5538_v61 = vpop.f32.mrf.mxu0  ;;  %v3953_v26 = vpop.f32.mrf.mxu1 }
 0x184   : > { %v5541_v45 = vadd.f32 %v2420_v0, %v5430_v54  ;;  %v3954_v44 = vadd.f32 %v3953_v26, %v3952_v10 }
 0x185   : > { %v5543_v11 = vpop.f32.mrf.mxu0  ;;  %v3955_v34 = vpop.f32.mrf.mxu1 }
 0x186   : > { %v2423_v14 = vadd.f32 %v3954_v44, %v2422_v24 }
 0x187   : > { %v5545_v2 = vpop.f32.mrf.mxu0  ;;  %v3956_v9 = vpop.f32.mrf.mxu1 }
 0x188   : > { %v5548_v3 = vadd.f32 %v2423_v14, %v5436_v12  ;;  %v3957_v8 = vadd.f32 %v3956_v9, %v3955_v34 }
 0x189   : > { %v5550_v13 = vpop.f32.mrf.mxu0  ;;  %v3958_v42 = vpop.f32.mrf.mxu1 }
 0x18a   : > { %v2428_v55 = vadd.f32 %v4255_v46, %v3957_v8 }
 0x18b   : > { %v5552_v59 = vpop.f32.mrf.mxu0  ;;  %v3959_v54 = vpop.f32.mrf.mxu1 }
 0x18c   : > { %v5555_v63 = vadd.f32 %v2428_v55, %v5427_v36  ;;  %v3960_v33 = vadd.f32 %v3959_v54, %v3958_v42 }
 0x18d   : > { %v5557_v28 = vpop.f32.mrf.mxu0  ;;  %v3961_v24 = vpop.f32.mrf.mxu1 }
 0x18e   : > { %v2431_v37 = vadd.f32 %v4256_v57, %v3960_v33 }
 0x18f   : > { %v5559_v10 = vpop.f32.mrf.mxu0  ;;  %v3962_v12 = vpop.f32.mrf.mxu1 }
 0x190   : > { %v5562_v0 = vadd.f32 %v2431_v37, %v5432_v47  ;;  %v3963_v26 = vadd.f32 %v3962_v12, %v3961_v24 }
 0x191   : > { %v5564_v44 = vpop.f32.mrf.mxu0  ;;  %v3964_v46 = vpop.f32.mrf.mxu1 }
 0x192   : > { %v2436_v34 = vadd.f32 %v3963_v26, %v2435_v58 }
 0x193   : > { %v5566_v14 = vpop.f32.mrf.mxu0  ;;  %v3965_v36 = vpop.f32.mrf.mxu1 }
 0x194   : > { %5902 = vst [vmem:[#allocation5_spill] sm:$0xff] %v5566_v14  ;;  %v5569_v9 = vadd.f32 %v2436_v34, %v5442_v39  ;;  %v3966_v8 = vadd.f32 %v3965_v36, %v3964_v46 }
 0x195   : > { %v5571_v42 = vpop.f32.mrf.mxu0  ;;  %v3967_v57 = vpop.f32.mrf.mxu1 }
 0x196   : > { %v2439_v55 = vadd.f32 %v3966_v8, %v2438_v31 }
 0x197   : > { %v5573_v54 = vpop.f32.mrf.mxu0  ;;  %v3968_v47 = vpop.f32.mrf.mxu1 }
 0x198   : > { %5903 = vst [vmem:[#allocation6_spill] sm:$0xff] %v5573_v54  ;;  %v5576_v33 = vadd.f32 %v2439_v55, %v5448_v56  ;;  %v3969_v24 = vadd.f32 %v3968_v47, %v3967_v57 }
 0x199   : > { %v5578_v37 = vpop.f32.mrf.mxu0  ;;  %v3970_v58 = vpop.f32.mrf.mxu1 }
 0x19a   : > { %v2444_v12 = vadd.f32 %v5514_v18, %v3969_v24 }
 0x19b   : > { %v4061_v26 = vpop.f32.mrf.mxu0  ;;  %v3971_v39 = vpop.f32.mrf.mxu1 }
 0x19c   : > { %v5582_v46 = vadd.f32 %v2444_v12, %v5440_v52  ;;  %v3972_v34 = vadd.f32 %v3971_v39, %v3970_v58 }
 0x19d   : > { %v4062_v36 = vpop.f32.mrf.mxu0  ;;  %v3973_v31 = vpop.f32.mrf.mxu1 }
 0x19e   : > { %v5584_v8 = vadd.f32 %v4062_v36, %v4061_v26  ;;  %v2447_v49 = vadd.f32 %v5519_v40, %v3972_v34 }
 0x19f   : > { %v4064_v56 = vpop.f32.mrf.mxu0  ;;  %v3974_v55 = vpop.f32.mrf.mxu1 }
 0x1a0   : > { %v5588_v57 = vadd.f32 %v2447_v49, %v5445_v7  ;;  %v3975_v47 = vadd.f32 %v3974_v55, %v3973_v31 }
 0x1a1   : > { %v4065_v54 = vpop.f32.mrf.mxu0  ;;  %v3976_v18 = vpop.f32.mrf.mxu1 }
 0x1a2   : > { %v5590_v24 = vadd.f32 %v4065_v54, %v4064_v56  ;;  %v2452_v52 = vadd.f32 %v3975_v47, %v5529_v17 }
 0x1a3   : > { %v5593_v12 = vpop.f32.mrf.mxu0  ;;  %v3977_v58 = vpop.f32.mrf.mxu1 }
 0x1a4   : > { %v5596_v26 = vadd.f32 %v2452_v52, %v5452_v27  ;;  %v3978_v39 = vadd.f32 %v3977_v58, %v3976_v18 }
 0x1a5   : > { %v5598_v40 = vpop.f32.mrf.mxu0  ;;  %v3979_v34 = vpop.f32.mrf.mxu1 }
 0x1a6   : > { %v2455_v7 = vadd.f32 %v3978_v39, %v5536_v6 }
 0x1a7   : > { %v5601_v49 = vpop.f32.mrf.mxu0  ;;  %v3980_v36 = vpop.f32.mrf.mxu1 }
 0x1a8   : > { %v5604_v54 = vadd.f32 %v2455_v7, %v5456_v23  ;;  %v3981_v31 = vadd.f32 %v3980_v36, %v3979_v34 }
 0x1a9   : > { %v5606_v17 = vpop.f32.mrf.mxu0  ;;  %v3982_v56 = vpop.f32.mrf.mxu1 }
 0x1aa   : > { %5904 = vst [vmem:[#allocation7_spill] sm:$0xff] %v5604_v54  ;;  %v2460_v55 = vadd.f32 %v5524_v15, %v3981_v31 }
 0x1ab   : > { %v5609_v27 = vpop.f32.mrf.mxu0  ;;  %v3983_v47 = vpop.f32.mrf.mxu1 }
 0x1ac   : > { %v5612_v18 = vadd.f32 %v2460_v55, %v5460_v32  ;;  %v3984_v52 = vadd.f32 %v3983_v47, %v3982_v56 }
 0x1ad   : > { %v5614_v6 = vpop.f32.mrf.mxu0  ;;  %v3985_v58 = vpop.f32.mrf.mxu1 }
 0x1ae   : > { %v2463_v39 = vadd.f32 %v5531_v51, %v3984_v52 }
 0x1af   : > { %v5617_v23 = vpop.f32.mrf.mxu0  ;;  %v3986_v34 = vpop.f32.mrf.mxu1 }
 0x1b0   : > { %v5620_v7 = vadd.f32 %v2463_v39, %v5463_v62  ;;  %v3987_v36 = vadd.f32 %v3986_v34, %v3985_v58 }
 0x1b1   : > { %v5622_v15 = vpop.f32.mrf.mxu0  ;;  %v3988_v31 = vpop.f32.mrf.mxu1 }
 0x1b2   : > { %v2468_v22 = vadd.f32 %v3987_v36, %v5543_v11 }
 0x1b3   : > { %v5625_v32 = vpop.f32.mrf.mxu0  ;;  %v3989_v56 = vpop.f32.mrf.mxu1 }
 0x1b4   : > { %v5628_v55 = vadd.f32 %v2468_v22, %v5471_v29  ;;  %v3990_v47 = vadd.f32 %v3989_v56, %v3988_v31 }
 0x1b5   : > { %v5630_v51 = vpop.f32.mrf.mxu0  ;;  %v3991_v52 = vpop.f32.mrf.mxu1 }
 0x1b6   : > { %5905 = vst [vmem:[#allocation8_spill] sm:$0xff] %v5628_v55  ;;  %v2471_v14 = vadd.f32 %v3990_v47, %v5550_v13 }
 0x1b7   : > { %v5633_v62 = vpop.f32.mrf.mxu0  ;;  %v3992_v58 = vpop.f32.mrf.mxu1 }
 0x1b8   : > { %v5636_v39 = vadd.f32 %v2471_v14, %v5480_v60  ;;  %v3993_v34 = vadd.f32 %v3992_v58, %v3991_v52 }
 0x1b9   : > { %v5638_v11 = vpop.f32.mrf.mxu0  ;;  %v3994_v36 = vpop.f32.mrf.mxu1 }
 0x1ba   : > { %5906 = vst [vmem:[#allocation9_spill] sm:$0xff] %v5636_v39  ;;  %v2476_v54 = vadd.f32 %v5538_v61, %v3993_v34 }
 0x1bb   : > { %v5641_v29 = vpop.f32.mrf.mxu0  ;;  %v3995_v22 = vpop.f32.mrf.mxu1 }
 0x1bc   : > { %v5644_v31 = vadd.f32 %v2476_v54, %v5489_v1  ;;  %v3996_v56 = vadd.f32 %v3995_v22, %v3994_v36 }
 0x1bd   : > { %v5646_v13 = vpop.f32.mrf.mxu0  ;;  %v3997_v47 = vpop.f32.mrf.mxu1 }
 0x1be   : > { %5907 = vst [vmem:[#allocation10_spill] sm:$0xff] %v5644_v31  ;;  %v2479_v55 = vadd.f32 %v5545_v2, %v3996_v56 }
 0x1bf   : > { %v5649_v60 = vpop.f32.mrf.mxu0  ;;  %v3998_v14 = vpop.f32.mrf.mxu1 }
 0x1c0   : > { %v5652_v52 = vadd.f32 %v2479_v55, %v5497_v16  ;;  %v3999_v58 = vadd.f32 %v3998_v14, %v3997_v47 }
 0x1c1   : > { %v5654_v61 = vpop.f32.mrf.mxu0  ;;  %v4000_v34 = vpop.f32.mrf.mxu1 }
 0x1c2   : > { %5908 = vst [vmem:[#allocation11_spill] sm:$0xff] %v5652_v52  ;;  %v2484_v39 = vadd.f32 %v3999_v58, %v5557_v28 }
 0x1c3   : > { %v5657_v1 = vpop.f32.mrf.mxu0  ;;  %v4001_v54 = vpop.f32.mrf.mxu1 }
 0x1c4   : > { %v5660_v36 = vadd.f32 %v2484_v39, %v5474_v38  ;;  %v4002_v22 = vadd.f32 %v4001_v54, %v4000_v34 }
 0x1c5   : > { %v5662_v2 = vpop.f32.mrf.mxu0  ;;  %v4003_v56 = vpop.f32.mrf.mxu1 }
 0x1c6   : > { %5909 = vst [vmem:[#allocation12_spill] sm:$0xff] %v5660_v36  ;;  %v2487_v31 = vadd.f32 %v4002_v22, %v5564_v44 }
 0x1c7   : > { %v5665_v16 = vpop.f32.mrf.mxu0  ;;  %v4004_v55 = vpop.f32.mrf.mxu1 }
 0x1c8   : > { %v5668_v47 = vadd.f32 %v2487_v31, %v5483_v5  ;;  %v4005_v14 = vadd.f32 %v4004_v55, %v4003_v56 }
 0x1c9   : > { %v5670_v28 = vpop.f32.mrf.mxu0  ;;  %v4006_v58 = vpop.f32.mrf.mxu1 }
 0x1ca   : > { %5910 = vst [vmem:[#allocation13_spill] sm:$0xff] %v5668_v47  ;;  %v2492_v52 = vadd.f32 %v5552_v59, %v4005_v14 }
 0x1cb   : > { %v5673_v38 = vpop.f32.mrf.mxu0  ;;  %v4007_v39 = vpop.f32.mrf.mxu1 }
 0x1cc   : > { %v5676_v34 = vadd.f32 %v2492_v52, %v5468_v21  ;;  %v4008_v54 = vadd.f32 %v4007_v39, %v4006_v58 }
 0x1cd   : > { %v5678_v44 = vpop.f32.mrf.mxu0  ;;  %v4009_v22 = vpop.f32.mrf.mxu1 }
 0x1ce   : > { %5911 = vst [vmem:[#allocation14_spill] sm:$0xff] %v5676_v34  ;;  %v2495_v36 = vadd.f32 %v5559_v10, %v4008_v54  ;;  %v4081_v34 = vadd.f32 %v5630_v51, %v5625_v32 }
 0x1cf   : > { %v5681_v5 = vpop.f32.mrf.mxu0  ;;  %v4010_v31 = vpop.f32.mrf.mxu1 }
 0x1d0   : > { %v5684_v56 = vadd.f32 %v2495_v36, %v5477_v20  ;;  %v4011_v55 = vadd.f32 %v4010_v31, %v4009_v22 }
 0x1d1   : > { %v5686_v59 = vpop.f32.mrf.mxu0  ;;  %v4012_v14 = vpop.f32.mrf.mxu1 }
 0x1d2   : > { %5912 = vst [vmem:[#allocation15_spill] sm:$0xff] %v5684_v56  ;;  %v2500_v47 = vadd.f32 %v4011_v55, %v5571_v42 }
 0x1d3   : > { %v5689_v21 = vpop.f32.mrf.mxu0  ;;  %v4013_v52 = vpop.f32.mrf.mxu1 }
 0x1d4   : > { %v5692_v58 = vadd.f32 %v2500_v47, %v5492_v50  ;;  %v4014_v39 = vadd.f32 %v4013_v52, %v4012_v14  ;;  %v4069_v14 = vadd.f32 %v5598_v40, %v5593_v12 }
 0x1d5   : > { %v5694_v10 = vpop.f32.mrf.mxu0  ;;  %v5696_v54 = vpop.f32.mrf.mxu1 }
 0x1d6   : > { %5913 = vst [vmem:[#allocation16_spill] sm:$0xff] %v5692_v58  ;;  %v2503_v20 = vadd.f32 %v4014_v39, %v5578_v37 }
 0x1d7   : > { %v5699_v36 = vpop.f32.mrf.mxu0  ;;  %v5701_v22 = vpop.f32.mrf.mxu1 }
 0x1d8   : > { %v5704_v42 = vadd.f32 %v2503_v20, %v5500_v53  ;;  %v4072_v20 = vadd.f32 %v5606_v17, %v5601_v49 }
 0x1d9   : > { %v5706_v31 = vpop.f32.mrf.mxu0  ;;  %v5708_v55 = vpop.f32.mrf.mxu1 }
 0x1da   : > { %5914 = vst [vmem:[#allocation17_spill] sm:$0xff] %v5704_v42  ;;  %5915 = vst [vmem:[#allocation18_spill] sm:$0xff] %v5708_v55 }
 0x1db   : > { %v5710_v50 = vpop.f32.mrf.mxu0  ;;  %v5712_v47 = vpop.f32.mrf.mxu1 }
 0x1dc   : > { %5916 = vst [vmem:[#allocation19_spill] sm:$0xff] %v5712_v47 }
 0x1dd   : > { %v5716_v52 = vpop.f32.mrf.mxu0  ;;  %v4295_v37 = vpop.f32.mrf.mxu1 }
 0x1de   : > { %v3080_v39 = vadd.f32 %v4295_v37, %v4069_v14 }
 0x1df   : > { %v5718_v58 = vpop.f32.mrf.mxu0  ;;  %v3071_v53 = vpop.f32.mrf.mxu1 }
 0x1e0   : > { %v3200_v12 = vadd.f32 %v3080_v39, %v5509_v41  ;;  %v3072_v40 = vadd.f32 %v5584_v8, %v3071_v53  ;;  %v4075_v39 = vadd.f32 %v5614_v6, %v5609_v27  ;;  %v4078_v27 = vadd.f32 %v5622_v15, %v5617_v23 }
 0x1e1   : > { %v5731_v14 = vpop.f32.mrf.mxu0  ;;  %v4296_v37 = vpop.f32.mrf.mxu1 }
 0x1e2   : > { %3232 = vst [vmem:[%s5725_s26 + $0x10] sm:$0xff] %v3200_v12  ;;  %v3198_v42 = vadd.f32 %v3072_v40, %v5503_v30  ;;  %v3083_v56 = vadd.f32 %v4296_v37, %v4072_v20 }
 0x1e3   : > { %v5735_v47 = vpop.f32.mrf.mxu0  ;;  %v3074_v55 = vpop.f32.mrf.mxu1 }
 0x1e4   : > { %3230 = vst [vmem:[%s5725_s26] sm:$0xff] %v3198_v42  ;;  %v3201_v41 = vadd.f32 %v3083_v56, %v5512_v19  ;;  %v3075_v49 = vadd.f32 %v5590_v24, %v3074_v55  ;;  %v3331_v40 = vmul.f32 %v3198_v42, %v3198_v42 }
 0x1e5   : > { %v5742_v8 = vpop.f32.mrf.mxu0  ;;  %v4299_v17 = vpop.f32.mrf.mxu1 }
 0x1e6   : > { %3233 = vst [vmem:[%s5725_s26 + $0x18] sm:$0xff] %v3201_v41  ;;  %v3199_v30 = vadd.f32 %v3075_v49, %v5506_v25  ;;  %v3096_v53 = vadd.f32 %v4299_v17, %v4081_v34  ;;  %v4084_v25 = vadd.f32 %v5638_v11, %v5633_v62  ;;  %v3333_v34 = vmul.f32 %v3200_v12, %v3200_v12 }
 0x1e7   : > { %v5748_v20 = vpop.f32.mrf.mxu0  ;;  %v3087_v32 = vpop.f32.mrf.mxu1 }
 0x1e8   : > { %3231 = vst [vmem:[%s5725_s26 + $0x8] sm:$0xff] %v3199_v30  ;;  %v3294_v51 = vadd.f32 %v3199_v30, %v3198_v42  ;;  %v3332_v19 = vmul.f32 %v3199_v30, %v3199_v30  ;;  %v3204_v24 = vadd.f32 %v3096_v53, %v5527_v35  ;;  %v3088_v56 = vadd.f32 %v4075_v39, %v3087_v32 }
 0x1e9   : > { %v5752_v55 = vpop.f32.mrf.mxu0  ;;  %v4300_v6 = vpop.f32.mrf.mxu1  ;;  %v4093_v35 = vadd.f32 %v5662_v2, %v5657_v1  ;;  %v3334_v53 = vmul.f32 %v3201_v41, %v3201_v41 }
 0x1ea   : > { %v3295_v37 = vadd.f32 %v3294_v51, %v3200_v12  ;;  %v3363_v49 = vadd.f32 %v3332_v19, %v3331_v40  ;;  %3236 = vst [vmem:[%s5725_s26 + $0x30] sm:$0xff] %v3204_v24  ;;  %v3202_v42 = vadd.f32 %v3088_v56, %v5517_v4  ;;  %v3099_v39 = vadd.f32 %v4300_v6, %v4084_v25 }
 0x1eb   : > { %v5760_v17 = vpop.f32.mrf.mxu0  ;;  %v3090_v30 = vpop.f32.mrf.mxu1  ;;  %v4087_v56 = vadd.f32 %v5646_v13, %v5641_v29  ;;  %v3337_v29 = vmul.f32 %v3204_v24, %v3204_v24 }
 0x1ec   : > { %v3364_v23 = vadd.f32 %v3363_v49, %v3333_v34  ;;  %3234 = vst [vmem:[%s5725_s26 + $0x20] sm:$0xff] %v3202_v42  ;;  %v3296_v15 = vadd.f32 %v3295_v37, %v3201_v41  ;;  %v3091_v62 = vadd.f32 %v4078_v27, %v3090_v30  ;;  %v3335_v12 = vmul.f32 %v3202_v42, %v3202_v42 }
 0x1ed   : > { %v5765_v11 = vpop.f32.mrf.mxu0  ;;  %v3205_v40 = vadd.f32 %v3099_v39, %v5534_v43  ;;  %v4303_v4 = vpop.f32.mrf.mxu1  ;;  %v4096_v41 = vadd.f32 %v5670_v28, %v5665_v16 }
 0x1ee   : > { %v3297_v32 = vadd.f32 %v3296_v15, %v3202_v42  ;;  %v3365_v51 = vadd.f32 %v3364_v23, %v3334_v53  ;;  %v3203_v19 = vadd.f32 %v3091_v62, %v5522_v48  ;;  %v3112_v1 = vadd.f32 %v4303_v4, %v4093_v35 }
 0x1ef   : > { %v5769_v2 = vpop.f32.mrf.mxu0  ;;  %3237 = vst [vmem:[%s5725_s26 + $0x38] sm:$0xff] %v3205_v40  ;;  %v3103_v27 = vpop.f32.mrf.mxu1  ;;  %v4090_v48 = vadd.f32 %v5654_v61, %v5649_v60  ;;  %v3338_v39 = vmul.f32 %v3205_v40, %v3205_v40  ;;  %v4105_v62 = vadd.f32 %v5694_v10, %v5689_v21 }
 0x1f0   : > { %v3366_v25 = vadd.f32 %v3365_v51, %v3335_v12  ;;  %3235 = vst [vmem:[%s5725_s26 + $0x28] sm:$0xff] %v3203_v19  ;;  %v3298_v43 = vadd.f32 %v3297_v32, %v3203_v19  ;;  %v3336_v6 = vmul.f32 %v3203_v19, %v3203_v19  ;;  %v3208_v34 = vadd.f32 %v3112_v1, %v5555_v63 }
 0x1f1   : > { %v5778_v37 = vpop.f32.mrf.mxu0  ;;  %v3104_v49 = vadd.f32 %v4087_v56, %v3103_v27  ;;  %v4304_v42 = vpop.f32.mrf.mxu1 }
 0x1f2   : > { %v3299_v13 = vadd.f32 %v3298_v43, %v3204_v24  ;;  %v3367_v35 = vadd.f32 %v3366_v25, %v3336_v6  ;;  %3240 = vst [vmem:[%s5725_s26 + $0x50] sm:$0xff] %v3208_v34  ;;  %v3115_v16 = vadd.f32 %v4304_v42, %v4096_v41  ;;  %v4099_v24 = vadd.f32 %v5678_v44, %v5673_v38 }
 0x1f3   : > { %v5783_v28 = vpop.f32.mrf.mxu0  ;;  %v3206_v30 = vadd.f32 %v3104_v49, %v5541_v45  ;;  %v3106_v63 = vpop.f32.mrf.mxu1  ;;  %v3341_v41 = vmul.f32 %v3208_v34, %v3208_v34  ;;  %v4117_v49 = vadd.f32 %v5742_v8, %v5735_v47 }
 0x1f4   : > { %v3368_v53 = vadd.f32 %v3367_v35, %v3337_v29  ;;  %v3300_v23 = vadd.f32 %v3299_v13, %v3205_v40  ;;  %v3209_v15 = vadd.f32 %v3115_v16, %v5562_v0  ;;  %v3107_v60 = vadd.f32 %v4090_v48, %v3106_v63 }
 0x1f5   : > { %v5787_v61 = vpop.f32.mrf.mxu0  ;;  %3238 = vst [vmem:[%s5725_s26 + $0x40] sm:$0xff] %v3206_v30  ;;  %v4307_v12 = vpop.f32.mrf.mxu1  ;;  %v3339_v32 = vmul.f32 %v3206_v30, %v3206_v30  ;;  %v4108_v0 = vadd.f32 %v5706_v31, %v5699_v36  ;;  %v4102_v48 = vadd.f32 %v5686_v59, %v5681_v5 }
 0x1f6   : > { %v3301_v4 = vadd.f32 %v3300_v23, %v3206_v30  ;;  %v3369_v45 = vadd.f32 %v3368_v53, %v3338_v39  ;;  %3241 = vst [vmem:[%s5725_s26 + $0x58] sm:$0xff] %v3209_v15  ;;  %v3207_v40 = vadd.f32 %v3107_v60, %v5548_v3  ;;  %v3128_v19 = vadd.f32 %v4307_v12, %v4105_v62 }
 0x1f7   : > { %v5796_v51 = vpop.f32.mrf.mxu0  ;;  %v3119_v1 = vpop.f32.mrf.mxu1  ;;  %v3342_v29 = vmul.f32 %v3209_v15, %v3209_v15  ;;  %v4114_v12 = vadd.f32 %v5731_v14, %v5718_v58 }
 0x1f8   : > { %v3370_v56 = vadd.f32 %v3369_v45, %v3339_v32  ;;  %3239 = vst [vmem:[%s5725_s26 + $0x48] sm:$0xff] %v3207_v40  ;;  %v3302_v38 = vadd.f32 %v3301_v4, %v3207_v40  ;;  %v3340_v44 = vmul.f32 %v3207_v40, %v3207_v40  ;;  %v3120_v21 = vadd.f32 %v4099_v24, %v3119_v1 }
 0x1f9   : > { %v5801_v10 = vpop.f32.mrf.mxu0  ;;  %v3212_v27 = vadd.f32 %v3128_v19, %v5582_v46  ;;  %v4308_v3 = vpop.f32.mrf.mxu1  ;;  %v4129_v40 = vadd.f32 %v5787_v61, %v5783_v28 }
 0x1fa   : > { %v3303_v25 = vadd.f32 %v3302_v38, %v3208_v34  ;;  %v3371_v43 = vadd.f32 %v3370_v56, %v3340_v44  ;;  %v3210_v6 = vadd.f32 %v3120_v21, %v5569_v9  ;;  %v3131_v36 = vadd.f32 %v4308_v3, %v4108_v0  ;;  %v5917_v44 = vld [vmem:[#allocation7_spill] sm:$0xff] }
 0x1fb   : > { %v5805_v31 = vpop.f32.mrf.mxu0  ;;  %3244 = vst [vmem:[%s5725_s26 + $0x70] sm:$0xff] %v3212_v27  ;;  %v3122_v42 = vpop.f32.mrf.mxu1  ;;  %v4111_v9 = vadd.f32 %v5716_v52, %v5710_v50  ;;  %v4123_v38 = vadd.f32 %v5765_v11, %v5760_v17 }
 0x1fc   : > { %v3372_v13 = vadd.f32 %v3371_v43, %v3341_v41  ;;  %3242 = vst [vmem:[%s5725_s26 + $0x60] sm:$0xff] %v3210_v6  ;;  %v3304_v46 = vadd.f32 %v3303_v25, %v3209_v15  ;;  %v3213_v34 = vadd.f32 %v3131_v36, %v5588_v57  ;;  %v3123_v16 = vadd.f32 %v4102_v48, %v3122_v42 }
 0x1fd   : > { %v5814_v35 = vpop.f32.mrf.mxu0  ;;  %v4311_v5 = vpop.f32.mrf.mxu1  ;;  %v3343_v39 = vmul.f32 %v3210_v6, %v3210_v6  ;;  %v4120_v57 = vadd.f32 %v5752_v55, %v5748_v20  ;;  %v3345_v55 = vmul.f32 %v3212_v27, %v3212_v27  ;;  %v4132_v25 = vadd.f32 %v5801_v10, %v5796_v51 }
 0x1fe   : > { %v3305_v59 = vadd.f32 %v3304_v46, %v3210_v6  ;;  %v3373_v30 = vadd.f32 %v3372_v13, %v3342_v29  ;;  %3245 = vst [vmem:[%s5725_s26 + $0x78] sm:$0xff] %v3213_v34  ;;  %v3144_v47 = vadd.f32 %v4311_v5, %v4117_v49  ;;  %v3211_v63 = vadd.f32 %v3123_v16, %v5576_v33  ;;  %v5918_v6 = vld [vmem:[#allocation10_spill] sm:$0xff]  ;;  %v5919_v13 = vld [vmem:[#allocation8_spill] sm:$0xff] }
 0x1ff   : > { %v5819_v8 = vpop.f32.mrf.mxu0  ;;  %v3135_v53 = vpop.f32.mrf.mxu1  ;;  %v3346_v58 = vmul.f32 %v3213_v34, %v3213_v34  ;;  %v4126_v29 = vadd.f32 %v5778_v37, %v5769_v2  ;;  %v4017_v2 = vadd.f32 %v5701_v22, %v5696_v54  ;;  %v5922_v22 = vld [vmem:[#allocation14_spill] sm:$0xff] }
 0x200   : > { %v3374_v23 = vadd.f32 %v3373_v30, %v3343_v39  ;;  %v3216_v50 = vadd.f32 %v3144_v47, %v5612_v18  ;;  %v3136_v52 = vadd.f32 %v4111_v9, %v3135_v53  ;;  %3243 = vst [vmem:[%s5725_s26 + $0x68] sm:$0xff] %v3211_v63  ;;  %v3306_v60 = vadd.f32 %v3305_v59, %v3211_v63  ;;  %v5920_v39 = vld [vmem:[#allocation11_spill] sm:$0xff] }
 0x201   : > { %v5825_v15 = vpop.f32.mrf.mxu0  ;;  %v3344_v24 = vmul.f32 %v3211_v63, %v3211_v63  ;;  %v4312_v62 = vpop.f32.mrf.mxu1 }
 0x202   : > { %3248 = vst [vmem:[%s5725_s26 + $0x90] sm:$0xff] %v3216_v50  ;;  %v3214_v33 = vadd.f32 %v3136_v52, %v5596_v26  ;;  %v3147_v4 = vadd.f32 %v4312_v62, %v4120_v57  ;;  %v3307_v32 = vadd.f32 %v3306_v60, %v3212_v27  ;;  %v3349_v51 = vmul.f32 %v3216_v50, %v3216_v50 }
 0x203   : > { %v4139_v20 = vpop.f32.mrf.mxu0  ;;  %v3375_v18 = vadd.f32 %v3374_v23, %v3344_v24  ;;  %v3138_v45 = vpop.f32.mrf.mxu1  ;;  %v4135_v52 = vadd.f32 %v5814_v35, %v5805_v31 }
 0x204   : > { %3246 = vst [vmem:[%s5725_s26 + $0x80] sm:$0xff] %v3214_v33  ;;  %v3217_v0 = vadd.f32 %v3147_v4, %v5620_v7  ;;  %v3139_v19 = vadd.f32 %v4114_v12, %v3138_v45  ;;  %v3308_v56 = vadd.f32 %v3307_v32, %v3213_v34  ;;  %v3347_v61 = vmul.f32 %v3214_v33, %v3214_v33 }
 0x205   : > { %v4140_v1 = vpop.f32.mrf.mxu0  ;;  %v3376_v14 = vadd.f32 %v3375_v18, %v3345_v55  ;;  %v4315_v26 = vpop.f32.mrf.mxu1 }
 0x206   : > { %3249 = vst [vmem:[%s5725_s26 + $0x98] sm:$0xff] %v3217_v0  ;;  %v3215_v21 = vadd.f32 %v3139_v19, %v5917_v44  ;;  %v3160_v41 = vadd.f32 %v4315_v26, %v4129_v40  ;;  %v3309_v28 = vadd.f32 %v3308_v56, %v3214_v33  ;;  %v4141_v59 = vadd.f32 %v4140_v1, %v4139_v20  ;;  %v5923_v40 = vld [vmem:[#allocation5_spill] sm:$0xff]  ;;  %v5924_v1 = vld [vmem:[#allocation18_spill] sm:$0xff]  ;;  %v5926_v26 = vld [vmem:[#allocation12_spill] sm:$0xff] }
 0x207   : > { %v4142_v27 = vpop.f32.mrf.mxu0  ;;  %v3377_v3 = vadd.f32 %v3376_v14, %v3346_v58  ;;  %v3151_v7 = vpop.f32.mrf.mxu1  ;;  %v3350_v37 = vmul.f32 %v3217_v0, %v3217_v0  ;;  %v2508_v31 = vadd.f32 %v5923_v40, %v4017_v2  ;;  %v5925_v58 = vld [vmem:[#allocation19_spill] sm:$0xff]  ;;  %v4138_v56 = vadd.f32 %v5825_v15, %v5819_v8 }
 0x208   : > { %3247 = vst [vmem:[%s5725_s26 + $0x88] sm:$0xff] %v3215_v21  ;;  %v3348_v43 = vmul.f32 %v3215_v21, %v3215_v21  ;;  %v3220_v36 = vadd.f32 %v3160_v41, %v5918_v6  ;;  %v3152_v48 = vadd.f32 %v4123_v38, %v3151_v7  ;;  %v3310_v49 = vadd.f32 %v3309_v28, %v3215_v21 }
 0x209   : > { %v4143_v17 = vpop.f32.mrf.mxu0  ;;  %v3378_v11 = vadd.f32 %v3377_v3, %v3347_v61  ;;  %v4316_v42 = vpop.f32.mrf.mxu1  ;;  %v4020_v14 = vadd.f32 %v5925_v58, %v5924_v1  ;;  %v5927_v3 = vld [vmem:[#allocation15_spill] sm:$0xff] }
 0x20a   : > { %3252 = vst [vmem:[%s5725_s26 + $0xb0] sm:$0xff] %v3220_v36  ;;  %v3218_v46 = vadd.f32 %v3152_v48, %v5919_v13  ;;  %v3163_v34 = vadd.f32 %v4316_v42, %v4132_v25  ;;  %v3311_v10 = vadd.f32 %v3310_v49, %v3216_v50  ;;  %v5921_v50 = vld [vmem:[#allocation9_spill] sm:$0xff]  ;;  %v4144_v55 = vadd.f32 %v4143_v17, %v4142_v27  ;;  %v5929_v42 = vld [vmem:[#allocation6_spill] sm:$0xff] }
 0x20b   : > { %v4145_v9 = vpop.f32.mrf.mxu0  ;;  %v3379_v16 = vadd.f32 %v3378_v11, %v3348_v43  ;;  %v3154_v5 = vpop.f32.mrf.mxu1  ;;  %v3353_v41 = vmul.f32 %v3220_v36, %v3220_v36  ;;  %v5928_v11 = vld [vmem:[#allocation3_spill] sm:$0xff] }
 0x20c   : > { %3250 = vst [vmem:[%s5725_s26 + $0xa0] sm:$0xff] %v3218_v46  ;;  %v3221_v30 = vadd.f32 %v3163_v34, %v5920_v39  ;;  %v3155_v47 = vadd.f32 %v4126_v29, %v3154_v5  ;;  %v3312_v57 = vadd.f32 %v3311_v10, %v3217_v0  ;;  %v3351_v33 = vmul.f32 %v3218_v46, %v3218_v46 }
 0x20d   : > { %v4146_v63 = vpop.f32.mrf.mxu0  ;;  %v3380_v53 = vadd.f32 %v3379_v16, %v3349_v51  ;;  %v4319_v23 = vpop.f32.mrf.mxu1  ;;  %v2544_v49 = vadd.f32 %v2508_v31, %v5928_v11  ;;  %v2511_v29 = vadd.f32 %v5929_v42, %v4020_v14  ;;  %v5933_v31 = vld [vmem:[#allocation17_spill] sm:$0xff] }
 0x20e   : > { %3253 = vst [vmem:[%s5725_s26 + $0xb8] sm:$0xff] %v3221_v30  ;;  %v3219_v60 = vadd.f32 %v3155_v47, %v5921_v50  ;;  %v3176_v24 = vadd.f32 %v4319_v23, %v4141_v59  ;;  %v3313_v12 = vadd.f32 %v3312_v57, %v3218_v46  ;;  %v3354_v6 = vmul.f32 %v3221_v30, %v3221_v30  ;;  %v5932_v50 = vld [vmem:[#allocation16_spill] sm:$0xff] }
 0x20f   : > { %v4148_v62 = vpop.f32.mrf.mxu0  ;;  %v3381_v4 = vadd.f32 %v3380_v53, %v3350_v37  ;;  %v3167_v20 = vpop.f32.mrf.mxu1  ;;  %v4147_v13 = vadd.f32 %v4146_v63, %v4145_v9  ;;  %v5931_v63 = vld [vmem:[#allocation4_spill] sm:$0xff] }
 0x210   : > { %3251 = vst [vmem:[%s5725_s26 + $0xa8] sm:$0xff] %v3219_v60  ;;  %v3352_v54 = vmul.f32 %v3219_v60, %v3219_v60  ;;  %v3224_v32 = vadd.f32 %v3176_v24, %v5922_v22  ;;  %v3168_v18 = vadd.f32 %v4135_v52, %v3167_v20  ;;  %v3314_v0 = vadd.f32 %v3313_v12, %v3219_v60 }
 0x211   : > { %v4149_v45 = vpop.f32.mrf.mxu0  ;;  %v3382_v35 = vadd.f32 %v3381_v4, %v3351_v33  ;;  %v4320_v19 = vpop.f32.mrf.mxu1  ;;  %v2545_v23 = vadd.f32 %v2511_v29, %v5931_v63 }
 0x212   : > { %3256 = vst [vmem:[%s5725_s26 + $0xd0] sm:$0xff] %v3224_v32  ;;  %v3222_v38 = vadd.f32 %v3168_v18, %v5926_v26  ;;  %v3179_v44 = vadd.f32 %v4320_v19, %v4144_v55  ;;  %v3315_v27 = vadd.f32 %v3314_v0, %v3220_v36  ;;  %v5930_v36 = vld [vmem:[#allocation13_spill] sm:$0xff]  ;;  %v4150_v52 = vadd.f32 %v4149_v45, %v4148_v62 }
 0x213   : > { %v4151_v21 = vpop.f32.mrf.mxu0  ;;  %v3383_v28 = vadd.f32 %v3382_v35, %v3352_v54  ;;  %v3170_v61 = vpop.f32.mrf.mxu1  ;;  %v3357_v24 = vmul.f32 %v3224_v32, %v3224_v32 }
 0x214   : > { %3254 = vst [vmem:[%s5725_s26 + $0xc0] sm:$0xff] %v3222_v38  ;;  %v3225_v7 = vadd.f32 %v3179_v44, %v5927_v3  ;;  %v3171_v25 = vadd.f32 %v4138_v56, %v3170_v61  ;;  %v3316_v17 = vadd.f32 %v3315_v27, %v3221_v30  ;;  %v3355_v10 = vmul.f32 %v3222_v38, %v3222_v38 }
 0x215   : > { %v4152_v43 = vpop.f32.mrf.mxu0  ;;  %v3384_v48 = vadd.f32 %v3383_v28, %v3353_v41  ;;  %v4323_v8 = vpop.f32.mrf.mxu1 }
 0x216   : > { %v4153_v15 = vadd.f32 %v4152_v43, %v4151_v21  ;;  %3257 = vst [vmem:[%s5725_s26 + $0xd8] sm:$0xff] %v3225_v7  ;;  %v3223_v46 = vadd.f32 %v3171_v25, %v5930_v36  ;;  %v3317_v51 = vadd.f32 %v3316_v17, %v3222_v38  ;;  %v3358_v54 = vmul.f32 %v3225_v7, %v3225_v7 }
 0x217   : > { %v4154_v34 = vpop.f32.mrf.mxu0  ;;  %v3385_v16 = vadd.f32 %v3384_v48, %v3354_v6  ;;  %v3183_v59 = vpop.f32.mrf.mxu1 }
 0x218   : > { %v3192_v5 = vadd.f32 %v4323_v8, %v4153_v15  ;;  %3255 = vst [vmem:[%s5725_s26 + $0xc8] sm:$0xff] %v3223_v46  ;;  %v3356_v39 = vmul.f32 %v3223_v46, %v3223_v46  ;;  %v3184_v30 = vadd.f32 %v4147_v13, %v3183_v59  ;;  %v3318_v37 = vadd.f32 %v3317_v51, %v3223_v46 }
 0x219   : > { %v4155_v47 = vpop.f32.mrf.mxu0  ;;  %v3386_v2 = vadd.f32 %v3385_v16, %v3355_v10  ;;  %v4324_v57 = vpop.f32.mrf.mxu1 }
 0x21a   : > { %v3228_v53 = vadd.f32 %v3192_v5, %v2544_v49  ;;  %v4156_v9 = vadd.f32 %v4155_v47, %v4154_v34  ;;  %v3226_v60 = vadd.f32 %v3184_v30, %v5932_v50  ;;  %v3319_v12 = vadd.f32 %v3318_v37, %v3224_v32 }
 0x21b   : > { %v3387_v33 = vadd.f32 %v3386_v2, %v3356_v39  ;;  %v3186_v20 = vpop.f32.mrf.mxu1 }
 0x21c   : > { %3260 = vst [vmem:[%s5725_s26 + $0xf0] sm:$0xff] %v3228_v53  ;;  %v3195_v4 = vadd.f32 %v4324_v57, %v4156_v9  ;;  %3258 = vst [vmem:[%s5725_s26 + $0xe0] sm:$0xff] %v3226_v60  ;;  %v3187_v55 = vadd.f32 %v4150_v52, %v3186_v20  ;;  %v3320_v18 = vadd.f32 %v3319_v12, %v3225_v7 }
 0x21d   : > { %v3388_v22 = vadd.f32 %v3387_v33, %v3357_v24  ;;  %v3359_v62 = vmul.f32 %v3226_v60, %v3226_v60  ;;  %v3361_v58 = vmul.f32 %v3228_v53, %v3228_v53 }
 0x21e   : > { %v3229_v40 = vadd.f32 %v3195_v4, %v2545_v23  ;;  %v3227_v35 = vadd.f32 %v3187_v55, %v5933_v31  ;;  %v3321_v0 = vadd.f32 %v3320_v18, %v3226_v60 }
 0x21f   : > { %v3389_v45 = vadd.f32 %v3388_v22, %v3358_v54 }
 0x220   : > { %3261 = vst [vmem:[%s5725_s26 + $0xf8] sm:$0xff] %v3229_v40  ;;  %3259 = vst [vmem:[%s5725_s26 + $0xe8] sm:$0xff] %v3227_v35  ;;  %v3360_v19 = vmul.f32 %v3227_v35, %v3227_v35  ;;  %v3322_v1 = vadd.f32 %v3321_v0, %v3227_v35  ;;  %v3362_v26 = vmul.f32 %v3229_v40, %v3229_v40 }
 0x221   : > { %v3390_v32 = vadd.f32 %v3389_v45, %v3359_v62 }
 0x222   : > { %v3323_v14 = vadd.f32 %v3322_v1, %v3228_v53 }
 0x223   : > { %v3391_v56 = vadd.f32 %v3390_v32, %v3360_v19 }
 0x224   : > { %v3324_v38 = vadd.f32 %v3323_v14, %v3229_v40 }
 0x225   : > { %v3392_v44 = vadd.f32 %v3391_v56, %v3361_v58 }
 0x226   : > { %v3325_v21 = vrot.slane %v3324_v38, 4 }
 0x227   : > { %v3393_v41 = vadd.f32 %v3392_v44, %v3362_v26 }
 0x228   : > { %v3326_v27 = vadd.f32 %v3325_v21, %v3324_v38 }
 0x229   : > { %v3394_v28 = vrot.slane %v3393_v41, 4 }
 0x22a   : > { %v3327_v61 = vrot.slane %v3326_v27, 2 }
 0x22b   : > { %v3395_v3 = vadd.f32 %v3394_v28, %v3393_v41 }
 0x22c   : > { %v3328_v7 = vadd.f32 %v3327_v61, %v3326_v27 }
 0x22d   : > { %v3396_v25 = vrot.slane %v3395_v3, 2 }
 0x22e   : > { %v3329_v43 = vrot.slane %v3328_v7, 1 }
 0x22f   : > { %v3397_v6 = vadd.f32 %v3396_v25, %v3395_v3 }
 0x230   : > { %v3330_v17 = vadd.f32 %v3329_v43, %v3328_v7 }
 0x231   : > { %v3398_v48 = vrot.slane %v3397_v6, 1 }
 0x233   : > { %v3399_v8 = vadd.f32 %v3398_v48, %v3397_v6 }
 0x235   : > { %v3401_v15 = vsel %vm860_vm6, %v3330_v17, %v3399_v8 }
 0x236   : > { %3402 = vst [vmem:[%s235_s29] sm:$0x3] %v3401_v15 }
 0x237 PF: > { %s16_s18 = sadd.s32 1, %s4478_s18  }
 0x238   : > { %p13_p4 = scmp.ge.s32.totalorder %s16_s18, 4  }
 0x23a   :  { %15 = sbr.rel (!%p13_p4) target bundleno = 1 (0x1), region = 81 }

</bundles_post_ra>
